<compile_context>
chip_gen: v6e
topology: v6e:2x2x1
jax: 0.10.0
libtpu: 0.0.40
codegen_flags: <defaults>
</compile_context>

<pallas_src>
import jax
import jax.numpy as jnp
from jax import lax
from jax.experimental import pallas as pl
from jax.experimental.pallas import tpu as pltpu

KSIZE = 4
STRIDE = 2
PAD = 1
BN_EPS = 1e-5
NEG_SLOPE = 0.01               # nn.LeakyReLU() default negative_slope
_VMEM_LIMIT_BYTES = 48 << 20   # > all default scoped limits, < v7x's 64 MiB physical VMEM


def _pick_tile_h(h, w, c_in, c_out, budget_bytes=8 << 20):
    """Largest divisor of H whose per-band VMEM footprint fits the budget.

    Per input row of a band (approx. bytes):
      conv output block (2 out rows, 2*Cout lanes, bf16, double-buffered): 16*w*c_out
      4 parity f32 accumulators:                                           16*w*c_out
      3 width-shifted bf16 input slabs:                                     6*w*c_in
      f32 assembly temporaries (~2x the conv tile):                        32*w*c_out
    The 8 MiB default keeps every generation inside its default scoped-VMEM limit
    (16 MiB v5e / 32 MiB v6e, v7x); raise budget_bytes (and _VMEM_LIMIT_BYTES) for
    larger bands on v5e/v6e (128 MiB physical VMEM).
    """
    per_row = w * (64 * c_out + 6 * c_in)
    cap = max(1, budget_bytes // max(per_row, 1))
    tile = 1
    for t in range(1, h + 1):
        if h % t == 0 and t <= cap:
            tile = t
    return tile


# ---------------- pass 1: in-kernel im2col, 4-phase GEMM (MXU), BN partial sums -----------
def _make_gemm_stats_kernel(tile_h, w, c_in, c_out):
    def kernel(x_ref, w_ref, conv_ref, sum_ref, sq_ref):
        # x_ref:    (H+2, W+2, Cin) bf16   full padded image, resident across the band axis
        # w_ref:    (16, Cin, Cout) bf16   per-(parity, tap) weights, idx = 8r + 4s + 2dh + dw
        # conv_ref: (2*tile_h, W, 2*Cout) bf16  interleaved: [2a+r, b, s*Cout + c]
        # sum_ref, sq_ref: (1, Cout) f32   per-batch-element BN partials (revisited over bands)
        i = pl.program_id(1)

        @pl.when(i == 0)
        def _():
            sum_ref[...] = jnp.zeros_like(sum_ref)
            sq_ref[...] = jnp.zeros_like(sq_ref)

        row0 = pl.multiple_of(i * tile_h, tile_h)
        band = x_ref[pl.ds(row0, tile_h + 2), :, :]            # (tile_h+2, W+2, Cin)
        # Three width-shifted slabs shared by every parity/tap: 3 sublane shifts per band
        # instead of 16 shifted im2col copies.
        xw = [band[:, j:j + w, :] for j in range(3)]

        s_tot = jnp.zeros((1, c_out), jnp.float32)
        q_tot = jnp.zeros((1, c_out), jnp.float32)
        rows = []
        for r in (0, 1):
            cols = []
            for s in (0, 1):
                acc = None
                for dh in (0, 1):
                    for dw in (0, 1):
                        xs = xw[s + dw][r + dh:r + dh + tile_h]        # (tile_h, W, Cin)
                        xs2 = xs.reshape(tile_h * w, c_in)
                        part = jnp.dot(xs2, w_ref[8 * r + 4 * s + 2 * dh + dw],
                                       preferred_element_type=jnp.float32)
                        acc = part if acc is None else acc + part
                # BN statistics from the f32 accumulator, before the bf16 downcast.
                s_tot = s_tot + jnp.sum(acc, axis=0, keepdims=True)
                q_tot = q_tot + jnp.sum(acc * acc, axis=0, keepdims=True)
                cols.append(acc.reshape(tile_h, w, c_out))
            rows.append(jnp.concatenate(cols, axis=-1))        # (tile_h, W, 2*Cout)
        y = jnp.stack(rows, axis=1)                            # (tile_h, 2, W, 2*Cout)
        conv_ref[...] = y.reshape(2 * tile_h, w, 2 * c_out).astype(conv_ref.dtype)

        sum_ref[...] += s_tot
        sq_ref[...] += q_tot

    return kernel


# ---------------- pass 2: fused BatchNorm affine + LeakyReLU (HBM-bound streaming) --------
def _bn_lrelu_kernel(conv_ref, scale_ref, bias_ref, o_ref):
    y = conv_ref[...].astype(jnp.float32) * scale_ref[...] + bias_ref[...]
    o_ref[...] = jnp.where(y >= 0, y, NEG_SLOPE * y)


def transposed_conv_layer(x_nchw, weight, gamma, beta, *, tile_h=None):
    """Forward of TransposedConvLayer.

    x_nchw: (N, Cin, H, W)
    weight: (Cin, Cout, 4, 4)   -- nn.ConvTranspose2d weight layout
    gamma, beta: (Cout,)        -- BatchNorm2d affine parameters
    returns: (N, Cout, 2H, 2W)  float32
    """
    n, c_in, h, w = x_nchw.shape
    c_out = weight.shape[1]
    h_out, w_out = STRIDE * h, STRIDE * w

    if tile_h is None:
        tile_h = _pick_tile_h(h, w, c_in, c_out)
    assert h % tile_h == 0
    num_bands = h // tile_h
    grid = (n, num_bands)

    # ---- glue: NCHW -> padded NHWC bf16 (small input-side transpose) ----
    # TODO(synk): if (H+2)*(W+2)*Cin bf16 ever exceeds VMEM, switch x to memory_space=pl.ANY
    # and DMA haloed row bands manually (make_async_copy) instead of a resident image block.
    x_nhwc = jnp.transpose(x_nchw.astype(jnp.bfloat16), (0, 2, 3, 1))
    x_pad = jnp.pad(x_nhwc, ((0, 0), (1, 1), (1, 1), (0, 0)))            # (N, H+2, W+2, Cin)

    # ---- glue: 4-phase weights.
    # out[n, 2a+r, 2b+s, co] = sum_{dh,dw,ci} x_pad[n, a+r+dh, b+s+dw, ci]
    #                                          * W[ci, co, 3-r-2dh, 3-s-2dw]
    wflip = weight[:, :, ::-1, ::-1]                          # [ci,co,kh',kw'] = W[ci,co,3-kh',3-kw']
    wg = wflip.reshape(c_in, c_out, 2, 2, 2, 2)               # (ci, co, dh, r, dw, s)
    wg = jnp.transpose(wg, (3, 5, 2, 4, 0, 1))                # (r, s, dh, dw, ci, co)
    wg = wg.reshape(16, c_in, c_out).astype(jnp.bfloat16)     # idx = 8r + 4s + 2dh + dw
    # TODO(synk): when Cin/Cout genuinely reach >=256, add a 256-aligned channel sub-tiling
    # (no zero padding) to better fill the 256x256 MXU on v6e/v7x.

    # ---- pass 1: per-band GEMM + per-image BN partial sums ----
    conv, sums, sqs = pl.pallas_call(
        _make_gemm_stats_kernel(tile_h, w, c_in, c_out),
        grid=grid,
        in_specs=[
            pl.BlockSpec((None, h + 2, w + 2, c_in), lambda b, i: (b, 0, 0, 0)),
            pl.BlockSpec((16, c_in, c_out), lambda b, i: (0, 0, 0)),
        ],
        out_specs=(
            pl.BlockSpec((None, 2 * tile_h, w, 2 * c_out), lambda b, i: (b, i, 0, 0)),
            pl.BlockSpec((None, 1, c_out), lambda b, i: (b, 0, 0)),
            pl.BlockSpec((None, 1, c_out), lambda b, i: (b, 0, 0)),
        ),
        out_shape=(
            jax.ShapeDtypeStruct((n, h_out, w, 2 * c_out), jnp.bfloat16),
            jax.ShapeDtypeStruct((n, 1, c_out), jnp.float32),
            jax.ShapeDtypeStruct((n, 1, c_out), jnp.float32),
        ),
        compiler_params=pltpu.CompilerParams(
            # batch axis parallel (v7x megacore-safe: stats partials are per-n blocks),
            # row-band axis arbitrary (revisited stats accumulator).
            dimension_semantics=("parallel", "arbitrary"),
            vmem_limit_bytes=_VMEM_LIMIT_BYTES),
    )(x_pad, wg)

    # ---- tiny stat finalization (XLA): fold BN into one per-channel scale/bias ----
    count = jnp.float32(n * h_out * w_out)
    mean = jnp.sum(sums, axis=(0, 1)) / count                          # (Cout,)
    # TODO(synk): E[x^2]-E[x]^2 in f32 can cancel for very large tensors / large |mean|;
    # switch to per-band centered partials with a Welford merge if exact train parity matters.
    var = jnp.maximum(jnp.sum(sqs, axis=(0, 1)) / count - mean * mean, 0.0)
    scale = gamma.astype(jnp.float32) * lax.rsqrt(var + BN_EPS)
    bias = beta.astype(jnp.float32) - mean * scale
    scale_i = jnp.tile(scale, 2).reshape(1, 2 * c_out)   # conv minor layout is s*Cout + c
    bias_i = jnp.tile(bias, 2).reshape(1, 2 * c_out)

    # ---- pass 2: normalize + affine + LeakyReLU (bf16 in, f32 out) ----
    out = pl.pallas_call(
        _bn_lrelu_kernel,
        grid=grid,
        in_specs=[
            pl.BlockSpec((None, 2 * tile_h, w, 2 * c_out), lambda b, i: (b, i, 0, 0)),
            pl.BlockSpec((1, 2 * c_out), lambda b, i: (0, 0)),
            pl.BlockSpec((1, 2 * c_out), lambda b, i: (0, 0)),
        ],
        out_specs=pl.BlockSpec((None, 2 * tile_h, w, 2 * c_out), lambda b, i: (b, i, 0, 0)),
        out_shape=jax.ShapeDtypeStruct((n, h_out, w, 2 * c_out), jnp.float32),
        compiler_params=pltpu.CompilerParams(
            dimension_semantics=("parallel", "parallel"),
            vmem_limit_bytes=_VMEM_LIMIT_BYTES),
    )(conv, scale_i, bias_i)

    # (N, 2H, W, 2*Cout) is byte-identical to NHWC (N, 2H, 2W, Cout): free reshape, then a
    # single NHWC->NCHW transpose to match the PyTorch output layout.
    # TODO(synk): return NHWC directly (drop this transpose) if the consumer accepts it.
    out = out.reshape(n, h_out, w_out, c_out)
    return jnp.transpose(out, (0, 3, 1, 2))


def _reference(x_nchw, weight, gamma, beta):
    """Pure-JAX f32 reference built directly from the ConvTranspose2d definition."""
    n, c_in, h, w = x_nchw.shape
    c_out = weight.shape[1]
    h_out, w_out = STRIDE * h, STRIDE * w
    full = jnp.zeros((n, c_out, STRIDE * (h - 1) + KSIZE, STRIDE * (w - 1) + KSIZE),
                     jnp.float32)
    for kh in range(KSIZE):
        for kw in range(KSIZE):
            contrib = jnp.einsum('nchw,cd->ndhw', x_nchw, weight[:, :, kh, kw],
                                 precision=lax.Precision.HIGHEST)        # (N,Cout,H,W)
            full = full.at[:, :, kh:kh + STRIDE * h:STRIDE,
                                 kw:kw + STRIDE * w:STRIDE].add(contrib)
    conv = full[:, :, PAD:PAD + h_out, PAD:PAD + w_out]
    mean = jnp.mean(conv, axis=(0, 2, 3), keepdims=True)
    var = jnp.mean((conv - mean) ** 2, axis=(0, 2, 3), keepdims=True)
    y = (conv - mean) * lax.rsqrt(var + BN_EPS)
    y = y * gamma.reshape(1, -1, 1, 1) + beta.reshape(1, -1, 1, 1)
    return jnp.where(y >= 0, y, NEG_SLOPE * y)


if __name__ == "__main__":
    key = jax.random.PRNGKey(0)
    kx, kw_, kg, kb = jax.random.split(key, 4)
    N, C_IN, C_OUT, H, W = 2, 4, 8, 16, 16

    x = jax.random.normal(kx, (N, C_IN, H, W), jnp.float32)
    # nn.ConvTranspose2d weight shape: (in_channels, out_channels, kH, kW)
    weight = 0.1 * jax.random.normal(kw_, (C_IN, C_OUT, KSIZE, KSIZE), jnp.float32)
    # BatchNorm2d affine parameters (perturbed from the default 1/0 init to exercise the path)
    gamma = 1.0 + 0.1 * jax.random.normal(kg, (C_OUT,), jnp.float32)
    beta = 0.1 * jax.random.normal(kb, (C_OUT,), jnp.float32)
    # TODO(synk): BatchNorm2d running_mean/running_var momentum update is a training-time
    # side effect and does not affect this forward output, so it is not modeled.

    fwd = jax.jit(transposed_conv_layer)
    out = jax.block_until_ready(fwd(x, weight, gamma, beta))
    ref = jax.block_until_ready(_reference(x, weight, gamma, beta))

    assert out.shape == (N, C_OUT, STRIDE * H, STRIDE * W), out.shape
    max_err = float(jnp.max(jnp.abs(out - ref)))
    # bf16 MXU inputs + bf16 conv intermediate -> quantization-level error vs f32 reference.
    assert jnp.allclose(out, ref, atol=5e-2, rtol=5e-2), f"max abs err = {max_err}"
    print("KERNEL_OK")
</pallas_src>

<mosaic_0001>
module attributes {stable_mosaic.version = 11 : i64} {
  func.func @kernel(%arg0: i32, %arg1: i32, %arg2: memref<1x18x18x4xbf16, #tpu.memory_space<vmem>>, %arg3: memref<16x4x8xbf16, #tpu.memory_space<vmem>>, %arg4: memref<1x32x16x16xbf16, #tpu.memory_space<vmem>>, %arg5: memref<1x1x8xf32, #tpu.memory_space<vmem>>, %arg6: memref<1x1x8xf32, #tpu.memory_space<vmem>>) attributes {dimension_semantics = [#tpu.dimension_semantics<parallel>, #tpu.dimension_semantics<arbitrary>], iteration_bounds = array<i64: 2, 1>, scalar_prefetch = 0 : i64, scratch_operands = 0 : i64, tpu.core_type = #tpu.core_type<tc>, window_params = [{transform_indices = @transform_0, window_bounds = array<i64: 1, 18, 18, 4>}, {pipeline_mode = #tpu.pipeline_mode<synchronous>, transform_indices = @transform_1, window_bounds = array<i64: 16, 4, 8>}, {transform_indices = @transform_2, window_bounds = array<i64: 1, 32, 16, 16>}, {transform_indices = @transform_3, window_bounds = array<i64: 1, 1, 8>}, {transform_indices = @transform_4, window_bounds = array<i64: 1, 1, 8>}]} {
    %c0_i32 = arith.constant 0 : i32
    %0 = arith.cmpi eq, %arg1, %c0_i32 : i32
    %1 = arith.extui %0 : i1 to i32
    %c0_i32_0 = arith.constant 0 : i32
    %2 = arith.cmpi ne, %1, %c0_i32_0 : i32
    scf.if %2 {
      %cst_77 = arith.constant 0.000000e+00 : f32
      %159 = vector.broadcast %cst_77 : f32 to vector<1x8xf32>
      %c0_78 = arith.constant 0 : index
      %c0_79 = arith.constant 0 : index
      %c0_80 = arith.constant 0 : index
      %160 = vector.load %arg5[%c0_78, %c0_79, %c0_80] : memref<1x1x8xf32, #tpu.memory_space<vmem>>, vector<1x1x8xf32>
      %161 = vector.shape_cast %160 : vector<1x1x8xf32> to vector<1x8xf32>
      %162 = vector.shape_cast %159 : vector<1x8xf32> to vector<1x1x8xf32>
      tpu.vector_store %arg5[%c0_78, %c0_79, %c0_80], %162 {strides = array<i32>} : memref<1x1x8xf32, #tpu.memory_space<vmem>>, vector<1x1x8xf32>,
      %cst_81 = arith.constant 0.000000e+00 : f32
      %163 = vector.broadcast %cst_81 : f32 to vector<1x8xf32>
      %c0_82 = arith.constant 0 : index
      %c0_83 = arith.constant 0 : index
      %c0_84 = arith.constant 0 : index
      %164 = vector.load %arg6[%c0_82, %c0_83, %c0_84] : memref<1x1x8xf32, #tpu.memory_space<vmem>>, vector<1x1x8xf32>
      %165 = vector.shape_cast %164 : vector<1x1x8xf32> to vector<1x8xf32>
      %166 = vector.shape_cast %163 : vector<1x8xf32> to vector<1x1x8xf32>
      tpu.vector_store %arg6[%c0_82, %c0_83, %c0_84], %166 {strides = array<i32>} : memref<1x1x8xf32, #tpu.memory_space<vmem>>, vector<1x1x8xf32>,
    } else {
    }
    %c16_i32 = arith.constant 16 : i32
    %3 = arith.muli %arg1, %c16_i32 : i32
    %4 = tpu.assume_multiple %3, 16 : i32
    %c0 = arith.constant 0 : index
    %5 = arith.index_cast %4 : i32 to index
    %c0_1 = arith.constant 0 : index
    %c0_2 = arith.constant 0 : index
    %6 = vector.load %arg2[%c0, %5, %c0_1, %c0_2] : memref<1x18x18x4xbf16, #tpu.memory_space<vmem>>, vector<1x18x18x4xbf16>
    %7 = vector.shape_cast %6 : vector<1x18x18x4xbf16> to vector<18x18x4xbf16>
    %8 = vector.extract_strided_slice %7 {offsets = [0, 0, 0], sizes = [18, 16, 4], strides = [1, 1, 1]} : vector<18x18x4xbf16> to vector<18x16x4xbf16>
    %9 = vector.extract_strided_slice %7 {offsets = [0, 1, 0], sizes = [18, 16, 4], strides = [1, 1, 1]} : vector<18x18x4xbf16> to vector<18x16x4xbf16>
    %10 = vector.extract_strided_slice %7 {offsets = [0, 2, 0], sizes = [18, 16, 4], strides = [1, 1, 1]} : vector<18x18x4xbf16> to vector<18x16x4xbf16>
    %cst = arith.constant 0.000000e+00 : f32
    %11 = vector.broadcast %cst : f32 to vector<1x8xf32>
    %cst_3 = arith.constant 0.000000e+00 : f32
    %12 = vector.broadcast %cst_3 : f32 to vector<1x8xf32>
    %13 = vector.extract_strided_slice %8 {offsets = [0, 0, 0], sizes = [16, 16, 4], strides = [1, 1, 1]} : vector<18x16x4xbf16> to vector<16x16x4xbf16>
    %14 = vector.shape_cast %13 : vector<16x16x4xbf16> to vector<256x4xbf16>
    %c0_4 = arith.constant 0 : index
    %c0_5 = arith.constant 0 : index
    %c0_6 = arith.constant 0 : index
    %15 = vector.load %arg3[%c0_4, %c0_5, %c0_6] : memref<16x4x8xbf16, #tpu.memory_space<vmem>>, vector<1x4x8xbf16>
    %16 = vector.shape_cast %15 : vector<1x4x8xbf16> to vector<4x8xbf16>
    %cst_7 = arith.constant dense<0.000000e+00> : vector<256x8xf32>
    %17 = tpu.matmul %14, %16, %cst_7 {dimension_numbers = #tpu.dot_dimension_numbers<[1], [0], [0], [1], [0, 0, 1, 1], [], []>} : vector<256x4xbf16>, vector<4x8xbf16>, vector<256x8xf32> -> vector<256x8xf32>
    %18 = vector.extract_strided_slice %9 {offsets = [0, 0, 0], sizes = [16, 16, 4], strides = [1, 1, 1]} : vector<18x16x4xbf16> to vector<16x16x4xbf16>
    %19 = vector.shape_cast %18 : vector<16x16x4xbf16> to vector<256x4xbf16>
    %c1 = arith.constant 1 : index
    %c0_8 = arith.constant 0 : index
    %c0_9 = arith.constant 0 : index
    %20 = vector.load %arg3[%c1, %c0_8, %c0_9] : memref<16x4x8xbf16, #tpu.memory_space<vmem>>, vector<1x4x8xbf16>
    %21 = vector.shape_cast %20 : vector<1x4x8xbf16> to vector<4x8xbf16>
    %cst_10 = arith.constant dense<0.000000e+00> : vector<256x8xf32>
    %22 = tpu.matmul %19, %21, %cst_10 {dimension_numbers = #tpu.dot_dimension_numbers<[1], [0], [0], [1], [0, 0, 1, 1], [], []>} : vector<256x4xbf16>, vector<4x8xbf16>, vector<256x8xf32> -> vector<256x8xf32>
    %23 = arith.addf %17, %22 : vector<256x8xf32>
    %24 = vector.extract_strided_slice %8 {offsets = [1, 0, 0], sizes = [16, 16, 4], strides = [1, 1, 1]} : vector<18x16x4xbf16> to vector<16x16x4xbf16>
    %25 = vector.shape_cast %24 : vector<16x16x4xbf16> to vector<256x4xbf16>
    %c2 = arith.constant 2 : index
    %c0_11 = arith.constant 0 : index
    %c0_12 = arith.constant 0 : index
    %26 = vector.load %arg3[%c2, %c0_11, %c0_12] : memref<16x4x8xbf16, #tpu.memory_space<vmem>>, vector<1x4x8xbf16>
    %27 = vector.shape_cast %26 : vector<1x4x8xbf16> to vector<4x8xbf16>
    %cst_13 = arith.constant dense<0.000000e+00> : vector<256x8xf32>
    %28 = tpu.matmul %25, %27, %cst_13 {dimension_numbers = #tpu.dot_dimension_numbers<[1], [0], [0], [1], [0, 0, 1, 1], [], []>} : vector<256x4xbf16>, vector<4x8xbf16>, vector<256x8xf32> -> vector<256x8xf32>
    %29 = arith.addf %23, %28 : vector<256x8xf32>
    %30 = vector.extract_strided_slice %9 {offsets = [1, 0, 0], sizes = [16, 16, 4], strides = [1, 1, 1]} : vector<18x16x4xbf16> to vector<16x16x4xbf16>
    %31 = vector.shape_cast %30 : vector<16x16x4xbf16> to vector<256x4xbf16>
    %c3 = arith.constant 3 : index
    %c0_14 = arith.constant 0 : index
    %c0_15 = arith.constant 0 : index
    %32 = vector.load %arg3[%c3, %c0_14, %c0_15] : memref<16x4x8xbf16, #tpu.memory_space<vmem>>, vector<1x4x8xbf16>
    %33 = vector.shape_cast %32 : vector<1x4x8xbf16> to vector<4x8xbf16>
    %cst_16 = arith.constant dense<0.000000e+00> : vector<256x8xf32>
    %34 = tpu.matmul %31, %33, %cst_16 {dimension_numbers = #tpu.dot_dimension_numbers<[1], [0], [0], [1], [0, 0, 1, 1], [], []>} : vector<256x4xbf16>, vector<4x8xbf16>, vector<256x8xf32> -> vector<256x8xf32>
    %35 = arith.addf %29, %34 : vector<256x8xf32>
    %cst_17 = arith.constant dense<0.000000e+00> : vector<8xf32>
    %36 = vector.multi_reduction <add>, %35, %cst_17 [0] : vector<256x8xf32> to vector<8xf32>
    %37 = vector.shape_cast %36 : vector<8xf32> to vector<1x8xf32>
    %38 = arith.addf %11, %37 : vector<1x8xf32>
    %39 = arith.mulf %35, %35 : vector<256x8xf32>
    %cst_18 = arith.constant dense<0.000000e+00> : vector<8xf32>
    %40 = vector.multi_reduction <add>, %39, %cst_18 [0] : vector<256x8xf32> to vector<8xf32>
    %41 = vector.shape_cast %40 : vector<8xf32> to vector<1x8xf32>
    %42 = arith.addf %12, %41 : vector<1x8xf32>
    %43 = vector.shape_cast %35 : vector<256x8xf32> to vector<16x16x8xf32>
    %44 = vector.extract_strided_slice %9 {offsets = [0, 0, 0], sizes = [16, 16, 4], strides = [1, 1, 1]} : vector<18x16x4xbf16> to vector<16x16x4xbf16>
    %45 = vector.shape_cast %44 : vector<16x16x4xbf16> to vector<256x4xbf16>
    %c4 = arith.constant 4 : index
    %c0_19 = arith.constant 0 : index
    %c0_20 = arith.constant 0 : index
    %46 = vector.load %arg3[%c4, %c0_19, %c0_20] : memref<16x4x8xbf16, #tpu.memory_space<vmem>>, vector<1x4x8xbf16>
    %47 = vector.shape_cast %46 : vector<1x4x8xbf16> to vector<4x8xbf16>
    %cst_21 = arith.constant dense<0.000000e+00> : vector<256x8xf32>
    %48 = tpu.matmul %45, %47, %cst_21 {dimension_numbers = #tpu.dot_dimension_numbers<[1], [0], [0], [1], [0, 0, 1, 1], [], []>} : vector<256x4xbf16>, vector<4x8xbf16>, vector<256x8xf32> -> vector<256x8xf32>
    %49 = vector.extract_strided_slice %10 {offsets = [0, 0, 0], sizes = [16, 16, 4], strides = [1, 1, 1]} : vector<18x16x4xbf16> to vector<16x16x4xbf16>
    %50 = vector.shape_cast %49 : vector<16x16x4xbf16> to vector<256x4xbf16>
    %c5 = arith.constant 5 : index
    %c0_22 = arith.constant 0 : index
    %c0_23 = arith.constant 0 : index
    %51 = vector.load %arg3[%c5, %c0_22, %c0_23] : memref<16x4x8xbf16, #tpu.memory_space<vmem>>, vector<1x4x8xbf16>
    %52 = vector.shape_cast %51 : vector<1x4x8xbf16> to vector<4x8xbf16>
    %cst_24 = arith.constant dense<0.000000e+00> : vector<256x8xf32>
    %53 = tpu.matmul %50, %52, %cst_24 {dimension_numbers = #tpu.dot_dimension_numbers<[1], [0], [0], [1], [0, 0, 1, 1], [], []>} : vector<256x4xbf16>, vector<4x8xbf16>, vector<256x8xf32> -> vector<256x8xf32>
    %54 = arith.addf %48, %53 : vector<256x8xf32>
    %55 = vector.extract_strided_slice %9 {offsets = [1, 0, 0], sizes = [16, 16, 4], strides = [1, 1, 1]} : vector<18x16x4xbf16> to vector<16x16x4xbf16>
    %56 = vector.shape_cast %55 : vector<16x16x4xbf16> to vector<256x4xbf16>
    %c6 = arith.constant 6 : index
    %c0_25 = arith.constant 0 : index
    %c0_26 = arith.constant 0 : index
    %57 = vector.load %arg3[%c6, %c0_25, %c0_26] : memref<16x4x8xbf16, #tpu.memory_space<vmem>>, vector<1x4x8xbf16>
    %58 = vector.shape_cast %57 : vector<1x4x8xbf16> to vector<4x8xbf16>
    %cst_27 = arith.constant dense<0.000000e+00> : vector<256x8xf32>
    %59 = tpu.matmul %56, %58, %cst_27 {dimension_numbers = #tpu.dot_dimension_numbers<[1], [0], [0], [1], [0, 0, 1, 1], [], []>} : vector<256x4xbf16>, vector<4x8xbf16>, vector<256x8xf32> -> vector<256x8xf32>
    %60 = arith.addf %54, %59 : vector<256x8xf32>
    %61 = vector.extract_strided_slice %10 {offsets = [1, 0, 0], sizes = [16, 16, 4], strides = [1, 1, 1]} : vector<18x16x4xbf16> to vector<16x16x4xbf16>
    %62 = vector.shape_cast %61 : vector<16x16x4xbf16> to vector<256x4xbf16>
    %c7 = arith.constant 7 : index
    %c0_28 = arith.constant 0 : index
    %c0_29 = arith.constant 0 : index
    %63 = vector.load %arg3[%c7, %c0_28, %c0_29] : memref<16x4x8xbf16, #tpu.memory_space<vmem>>, vector<1x4x8xbf16>
    %64 = vector.shape_cast %63 : vector<1x4x8xbf16> to vector<4x8xbf16>
    %cst_30 = arith.constant dense<0.000000e+00> : vector<256x8xf32>
    %65 = tpu.matmul %62, %64, %cst_30 {dimension_numbers = #tpu.dot_dimension_numbers<[1], [0], [0], [1], [0, 0, 1, 1], [], []>} : vector<256x4xbf16>, vector<4x8xbf16>, vector<256x8xf32> -> vector<256x8xf32>
    %66 = arith.addf %60, %65 : vector<256x8xf32>
    %cst_31 = arith.constant dense<0.000000e+00> : vector<8xf32>
    %67 = vector.multi_reduction <add>, %66, %cst_31 [0] : vector<256x8xf32> to vector<8xf32>
    %68 = vector.shape_cast %67 : vector<8xf32> to vector<1x8xf32>
    %69 = arith.addf %38, %68 : vector<1x8xf32>
    %70 = arith.mulf %66, %66 : vector<256x8xf32>
    %cst_32 = arith.constant dense<0.000000e+00> : vector<8xf32>
    %71 = vector.multi_reduction <add>, %70, %cst_32 [0] : vector<256x8xf32> to vector<8xf32>
    %72 = vector.shape_cast %71 : vector<8xf32> to vector<1x8xf32>
    %73 = arith.addf %42, %72 : vector<1x8xf32>
    %74 = vector.shape_cast %66 : vector<256x8xf32> to vector<16x16x8xf32>
    %75 = tpu.concatenate %43, %74 in 2 : vector<16x16x8xf32>, vector<16x16x8xf32> -> vector<16x16x16xf32>
    %76 = vector.extract_strided_slice %8 {offsets = [1, 0, 0], sizes = [16, 16, 4], strides = [1, 1, 1]} : vector<18x16x4xbf16> to vector<16x16x4xbf16>
    %77 = vector.shape_cast %76 : vector<16x16x4xbf16> to vector<256x4xbf16>
    %c8 = arith.constant 8 : index
    %c0_33 = arith.constant 0 : index
    %c0_34 = arith.constant 0 : index
    %78 = vector.load %arg3[%c8, %c0_33, %c0_34] : memref<16x4x8xbf16, #tpu.memory_space<vmem>>, vector<1x4x8xbf16>
    %79 = vector.shape_cast %78 : vector<1x4x8xbf16> to vector<4x8xbf16>
    %cst_35 = arith.constant dense<0.000000e+00> : vector<256x8xf32>
    %80 = tpu.matmul %77, %79, %cst_35 {dimension_numbers = #tpu.dot_dimension_numbers<[1], [0], [0], [1], [0, 0, 1, 1], [], []>} : vector<256x4xbf16>, vector<4x8xbf16>, vector<256x8xf32> -> vector<256x8xf32>
    %81 = vector.extract_strided_slice %9 {offsets = [1, 0, 0], sizes = [16, 16, 4], strides = [1, 1, 1]} : vector<18x16x4xbf16> to vector<16x16x4xbf16>
    %82 = vector.shape_cast %81 : vector<16x16x4xbf16> to vector<256x4xbf16>
    %c9 = arith.constant 9 : index
    %c0_36 = arith.constant 0 : index
    %c0_37 = arith.constant 0 : index
    %83 = vector.load %arg3[%c9, %c0_36, %c0_37] : memref<16x4x8xbf16, #tpu.memory_space<vmem>>, vector<1x4x8xbf16>
    %84 = vector.shape_cast %83 : vector<1x4x8xbf16> to vector<4x8xbf16>
    %cst_38 = arith.constant dense<0.000000e+00> : vector<256x8xf32>
    %85 = tpu.matmul %82, %84, %cst_38 {dimension_numbers = #tpu.dot_dimension_numbers<[1], [0], [0], [1], [0, 0, 1, 1], [], []>} : vector<256x4xbf16>, vector<4x8xbf16>, vector<256x8xf32> -> vector<256x8xf32>
    %86 = arith.addf %80, %85 : vector<256x8xf32>
    %87 = vector.extract_strided_slice %8 {offsets = [2, 0, 0], sizes = [16, 16, 4], strides = [1, 1, 1]} : vector<18x16x4xbf16> to vector<16x16x4xbf16>
    %88 = vector.shape_cast %87 : vector<16x16x4xbf16> to vector<256x4xbf16>
    %c10 = arith.constant 10 : index
    %c0_39 = arith.constant 0 : index
    %c0_40 = arith.constant 0 : index
    %89 = vector.load %arg3[%c10, %c0_39, %c0_40] : memref<16x4x8xbf16, #tpu.memory_space<vmem>>, vector<1x4x8xbf16>
    %90 = vector.shape_cast %89 : vector<1x4x8xbf16> to vector<4x8xbf16>
    %cst_41 = arith.constant dense<0.000000e+00> : vector<256x8xf32>
    %91 = tpu.matmul %88, %90, %cst_41 {dimension_numbers = #tpu.dot_dimension_numbers<[1], [0], [0], [1], [0, 0, 1, 1], [], []>} : vector<256x4xbf16>, vector<4x8xbf16>, vector<256x8xf32> -> vector<256x8xf32>
    %92 = arith.addf %86, %91 : vector<256x8xf32>
    %93 = vector.extract_strided_slice %9 {offsets = [2, 0, 0], sizes = [16, 16, 4], strides = [1, 1, 1]} : vector<18x16x4xbf16> to vector<16x16x4xbf16>
    %94 = vector.shape_cast %93 : vector<16x16x4xbf16> to vector<256x4xbf16>
    %c11 = arith.constant 11 : index
    %c0_42 = arith.constant 0 : index
    %c0_43 = arith.constant 0 : index
    %95 = vector.load %arg3[%c11, %c0_42, %c0_43] : memref<16x4x8xbf16, #tpu.memory_space<vmem>>, vector<1x4x8xbf16>
    %96 = vector.shape_cast %95 : vector<1x4x8xbf16> to vector<4x8xbf16>
    %cst_44 = arith.constant dense<0.000000e+00> : vector<256x8xf32>
    %97 = tpu.matmul %94, %96, %cst_44 {dimension_numbers = #tpu.dot_dimension_numbers<[1], [0], [0], [1], [0, 0, 1, 1], [], []>} : vector<256x4xbf16>, vector<4x8xbf16>, vector<256x8xf32> -> vector<256x8xf32>
    %98 = arith.addf %92, %97 : vector<256x8xf32>
    %cst_45 = arith.constant dense<0.000000e+00> : vector<8xf32>
    %99 = vector.multi_reduction <add>, %98, %cst_45 [0] : vector<256x8xf32> to vector<8xf32>
    %100 = vector.shape_cast %99 : vector<8xf32> to vector<1x8xf32>
    %101 = arith.addf %69, %100 : vector<1x8xf32>
    %102 = arith.mulf %98, %98 : vector<256x8xf32>
    %cst_46 = arith.constant dense<0.000000e+00> : vector<8xf32>
    %103 = vector.multi_reduction <add>, %102, %cst_46 [0] : vector<256x8xf32> to vector<8xf32>
    %104 = vector.shape_cast %103 : vector<8xf32> to vector<1x8xf32>
    %105 = arith.addf %73, %104 : vector<1x8xf32>
    %106 = vector.shape_cast %98 : vector<256x8xf32> to vector<16x16x8xf32>
    %107 = vector.extract_strided_slice %9 {offsets = [1, 0, 0], sizes = [16, 16, 4], strides = [1, 1, 1]} : vector<18x16x4xbf16> to vector<16x16x4xbf16>
    %108 = vector.shape_cast %107 : vector<16x16x4xbf16> to vector<256x4xbf16>
    %c12 = arith.constant 12 : index
    %c0_47 = arith.constant 0 : index
    %c0_48 = arith.constant 0 : index
    %109 = vector.load %arg3[%c12, %c0_47, %c0_48] : memref<16x4x8xbf16, #tpu.memory_space<vmem>>, vector<1x4x8xbf16>
    %110 = vector.shape_cast %109 : vector<1x4x8xbf16> to vector<4x8xbf16>
    %cst_49 = arith.constant dense<0.000000e+00> : vector<256x8xf32>
    %111 = tpu.matmul %108, %110, %cst_49 {dimension_numbers = #tpu.dot_dimension_numbers<[1], [0], [0], [1], [0, 0, 1, 1], [], []>} : vector<256x4xbf16>, vector<4x8xbf16>, vector<256x8xf32> -> vector<256x8xf32>
    %112 = vector.extract_strided_slice %10 {offsets = [1, 0, 0], sizes = [16, 16, 4], strides = [1, 1, 1]} : vector<18x16x4xbf16> to vector<16x16x4xbf16>
    %113 = vector.shape_cast %112 : vector<16x16x4xbf16> to vector<256x4xbf16>
    %c13 = arith.constant 13 : index
    %c0_50 = arith.constant 0 : index
    %c0_51 = arith.constant 0 : index
    %114 = vector.load %arg3[%c13, %c0_50, %c0_51] : memref<16x4x8xbf16, #tpu.memory_space<vmem>>, vector<1x4x8xbf16>
    %115 = vector.shape_cast %114 : vector<1x4x8xbf16> to vector<4x8xbf16>
    %cst_52 = arith.constant dense<0.000000e+00> : vector<256x8xf32>
    %116 = tpu.matmul %113, %115, %cst_52 {dimension_numbers = #tpu.dot_dimension_numbers<[1], [0], [0], [1], [0, 0, 1, 1], [], []>} : vector<256x4xbf16>, vector<4x8xbf16>, vector<256x8xf32> -> vector<256x8xf32>
    %117 = arith.addf %111, %116 : vector<256x8xf32>
    %118 = vector.extract_strided_slice %9 {offsets = [2, 0, 0], sizes = [16, 16, 4], strides = [1, 1, 1]} : vector<18x16x4xbf16> to vector<16x16x4xbf16>
    %119 = vector.shape_cast %118 : vector<16x16x4xbf16> to vector<256x4xbf16>
    %c14 = arith.constant 14 : index
    %c0_53 = arith.constant 0 : index
    %c0_54 = arith.constant 0 : index
    %120 = vector.load %arg3[%c14, %c0_53, %c0_54] : memref<16x4x8xbf16, #tpu.memory_space<vmem>>, vector<1x4x8xbf16>
    %121 = vector.shape_cast %120 : vector<1x4x8xbf16> to vector<4x8xbf16>
    %cst_55 = arith.constant dense<0.000000e+00> : vector<256x8xf32>
    %122 = tpu.matmul %119, %121, %cst_55 {dimension_numbers = #tpu.dot_dimension_numbers<[1], [0], [0], [1], [0, 0, 1, 1], [], []>} : vector<256x4xbf16>, vector<4x8xbf16>, vector<256x8xf32> -> vector<256x8xf32>
    %123 = arith.addf %117, %122 : vector<256x8xf32>
    %124 = vector.extract_strided_slice %10 {offsets = [2, 0, 0], sizes = [16, 16, 4], strides = [1, 1, 1]} : vector<18x16x4xbf16> to vector<16x16x4xbf16>
    %125 = vector.shape_cast %124 : vector<16x16x4xbf16> to vector<256x4xbf16>
    %c15 = arith.constant 15 : index
    %c0_56 = arith.constant 0 : index
    %c0_57 = arith.constant 0 : index
    %126 = vector.load %arg3[%c15, %c0_56, %c0_57] : memref<16x4x8xbf16, #tpu.memory_space<vmem>>, vector<1x4x8xbf16>
    %127 = vector.shape_cast %126 : vector<1x4x8xbf16> to vector<4x8xbf16>
    %cst_58 = arith.constant dense<0.000000e+00> : vector<256x8xf32>
    %128 = tpu.matmul %125, %127, %cst_58 {dimension_numbers = #tpu.dot_dimension_numbers<[1], [0], [0], [1], [0, 0, 1, 1], [], []>} : vector<256x4xbf16>, vector<4x8xbf16>, vector<256x8xf32> -> vector<256x8xf32>
    %129 = arith.addf %123, %128 : vector<256x8xf32>
    %cst_59 = arith.constant dense<0.000000e+00> : vector<8xf32>
    %130 = vector.multi_reduction <add>, %129, %cst_59 [0] : vector<256x8xf32> to vector<8xf32>
    %131 = vector.shape_cast %130 : vector<8xf32> to vector<1x8xf32>
    %132 = arith.addf %101, %131 : vector<1x8xf32>
    %133 = arith.mulf %129, %129 : vector<256x8xf32>
    %cst_60 = arith.constant dense<0.000000e+00> : vector<8xf32>
    %134 = vector.multi_reduction <add>, %133, %cst_60 [0] : vector<256x8xf32> to vector<8xf32>
    %135 = vector.shape_cast %134 : vector<8xf32> to vector<1x8xf32>
    %136 = arith.addf %105, %135 : vector<1x8xf32>
    %137 = vector.shape_cast %129 : vector<256x8xf32> to vector<16x16x8xf32>
    %138 = tpu.concatenate %106, %137 in 2 : vector<16x16x8xf32>, vector<16x16x8xf32> -> vector<16x16x16xf32>
    %139 = vector.shape_cast %75 : vector<16x16x16xf32> to vector<16x1x16x16xf32>
    %140 = vector.shape_cast %138 : vector<16x16x16xf32> to vector<16x1x16x16xf32>
    %141 = tpu.concatenate %139, %140 in 1 : vector<16x1x16x16xf32>, vector<16x1x16x16xf32> -> vector<16x2x16x16xf32>
    %142 = vector.shape_cast %141 : vector<16x2x16x16xf32> to vector<32x16x16xf32>
    %143 = arith.truncf %142 : vector<32x16x16xf32> to vector<32x16x16xbf16>
    %c0_61 = arith.constant 0 : index
    %c0_62 = arith.constant 0 : index
    %c0_63 = arith.constant 0 : index
    %c0_64 = arith.constant 0 : index
    %144 = vector.load %arg4[%c0_61, %c0_62, %c0_63, %c0_64] : memref<1x32x16x16xbf16, #tpu.memory_space<vmem>>, vector<1x32x16x16xbf16>
    %145 = vector.shape_cast %144 : vector<1x32x16x16xbf16> to vector<32x16x16xbf16>
    %146 = vector.shape_cast %143 : vector<32x16x16xbf16> to vector<1x32x16x16xbf16>
    tpu.vector_store %arg4[%c0_61, %c0_62, %c0_63, %c0_64], %146 {strides = array<i32>} : memref<1x32x16x16xbf16, #tpu.memory_space<vmem>>, vector<1x32x16x16xbf16>,
    %c0_65 = arith.constant 0 : index
    %c0_66 = arith.constant 0 : index
    %c0_67 = arith.constant 0 : index
    %147 = vector.load %arg5[%c0_65, %c0_66, %c0_67] : memref<1x1x8xf32, #tpu.memory_space<vmem>>, vector<1x1x8xf32>
    %148 = vector.shape_cast %147 : vector<1x1x8xf32> to vector<1x8xf32>
    %149 = arith.addf %148, %132 : vector<1x8xf32>
    %c0_68 = arith.constant 0 : index
    %c0_69 = arith.constant 0 : index
    %c0_70 = arith.constant 0 : index
    %150 = vector.load %arg5[%c0_68, %c0_69, %c0_70] : memref<1x1x8xf32, #tpu.memory_space<vmem>>, vector<1x1x8xf32>
    %151 = vector.shape_cast %150 : vector<1x1x8xf32> to vector<1x8xf32>
    %152 = vector.shape_cast %149 : vector<1x8xf32> to vector<1x1x8xf32>
    tpu.vector_store %arg5[%c0_68, %c0_69, %c0_70], %152 {strides = array<i32>} : memref<1x1x8xf32, #tpu.memory_space<vmem>>, vector<1x1x8xf32>,
    %c0_71 = arith.constant 0 : index
    %c0_72 = arith.constant 0 : index
    %c0_73 = arith.constant 0 : index
    %153 = vector.load %arg6[%c0_71, %c0_72, %c0_73] : memref<1x1x8xf32, #tpu.memory_space<vmem>>, vector<1x1x8xf32>
    %154 = vector.shape_cast %153 : vector<1x1x8xf32> to vector<1x8xf32>
    %155 = arith.addf %154, %136 : vector<1x8xf32>
    %c0_74 = arith.constant 0 : index
    %c0_75 = arith.constant 0 : index
    %c0_76 = arith.constant 0 : index
    %156 = vector.load %arg6[%c0_74, %c0_75, %c0_76] : memref<1x1x8xf32, #tpu.memory_space<vmem>>, vector<1x1x8xf32>
    %157 = vector.shape_cast %156 : vector<1x1x8xf32> to vector<1x8xf32>
    %158 = vector.shape_cast %155 : vector<1x8xf32> to vector<1x1x8xf32>
    tpu.vector_store %arg6[%c0_74, %c0_75, %c0_76], %158 {strides = array<i32>} : memref<1x1x8xf32, #tpu.memory_space<vmem>>, vector<1x1x8xf32>,
    return
  }
  func.func @transform_0(%arg0: i32, %arg1: i32) -> (i32, i32, i32, i32) {
    %c0_i32 = arith.constant 0 : i32
    %c0_i32_0 = arith.constant 0 : i32
    %c0_i32_1 = arith.constant 0 : i32
    %c0_i32_2 = arith.constant 0 : i32
    return %arg0, %c0_i32, %c0_i32_0, %c0_i32_1 : i32, i32, i32, i32
  }
  func.func @transform_1(%arg0: i32, %arg1: i32) -> (i32, i32, i32) {
    %c0_i32 = arith.constant 0 : i32
    %c0_i32_0 = arith.constant 0 : i32
    %c0_i32_1 = arith.constant 0 : i32
    %c0_i32_2 = arith.constant 0 : i32
    return %c0_i32, %c0_i32_0, %c0_i32_1 : i32, i32, i32
  }
  func.func @transform_2(%arg0: i32, %arg1: i32) -> (i32, i32, i32, i32) {
    %c0_i32 = arith.constant 0 : i32
    %c0_i32_0 = arith.constant 0 : i32
    %c0_i32_1 = arith.constant 0 : i32
    return %arg0, %arg1, %c0_i32, %c0_i32_0 : i32, i32, i32, i32
  }
  func.func @transform_3(%arg0: i32, %arg1: i32) -> (i32, i32, i32) {
    %c0_i32 = arith.constant 0 : i32
    %c0_i32_0 = arith.constant 0 : i32
    %c0_i32_1 = arith.constant 0 : i32
    return %arg0, %c0_i32, %c0_i32_0 : i32, i32, i32
  }
  func.func @transform_4(%arg0: i32, %arg1: i32) -> (i32, i32, i32) {
    %c0_i32 = arith.constant 0 : i32
    %c0_i32_0 = arith.constant 0 : i32
    %c0_i32_1 = arith.constant 0 : i32
    return %arg0, %c0_i32, %c0_i32_0 : i32, i32, i32
  }
}

module attributes {stable_mosaic.version = 11 : i64} {
  func.func @_bn_lrelu_kernel(%arg0: i32, %arg1: i32, %arg2: memref<1x32x16x16xbf16, #tpu.memory_space<vmem>>, %arg3: memref<1x16xf32, #tpu.memory_space<vmem>>, %arg4: memref<1x16xf32, #tpu.memory_space<vmem>>, %arg5: memref<1x32x16x16xf32, #tpu.memory_space<vmem>>) attributes {dimension_semantics = [#tpu.dimension_semantics<parallel>, #tpu.dimension_semantics<parallel>], iteration_bounds = array<i64: 2, 1>, scalar_prefetch = 0 : i64, scratch_operands = 0 : i64, tpu.core_type = #tpu.core_type<tc>, window_params = [{transform_indices = @transform_0, window_bounds = array<i64: 1, 32, 16, 16>}, {pipeline_mode = #tpu.pipeline_mode<synchronous>, transform_indices = @transform_1, window_bounds = array<i64: 1, 16>}, {pipeline_mode = #tpu.pipeline_mode<synchronous>, transform_indices = @transform_2, window_bounds = array<i64: 1, 16>}, {transform_indices = @transform_3, window_bounds = array<i64: 1, 32, 16, 16>}]} {
    %c0 = arith.constant 0 : index
    %c0_0 = arith.constant 0 : index
    %c0_1 = arith.constant 0 : index
    %c0_2 = arith.constant 0 : index
    %0 = vector.load %arg2[%c0, %c0_0, %c0_1, %c0_2] : memref<1x32x16x16xbf16, #tpu.memory_space<vmem>>, vector<1x32x16x16xbf16>
    %1 = vector.shape_cast %0 : vector<1x32x16x16xbf16> to vector<32x16x16xbf16>
    %2 = arith.extf %1 : vector<32x16x16xbf16> to vector<32x16x16xf32>
    %c0_3 = arith.constant 0 : index
    %c0_4 = arith.constant 0 : index
    %3 = vector.load %arg3[%c0_3, %c0_4] : memref<1x16xf32, #tpu.memory_space<vmem>>, vector<1x16xf32>
    %4 = vector.shape_cast %3 : vector<1x16xf32> to vector<1x1x16xf32>
    %5 = vector.broadcast %4 : vector<1x1x16xf32> to vector<32x16x16xf32>
    %6 = arith.mulf %2, %5 : vector<32x16x16xf32>
    %c0_5 = arith.constant 0 : index
    %c0_6 = arith.constant 0 : index
    %7 = vector.load %arg4[%c0_5, %c0_6] : memref<1x16xf32, #tpu.memory_space<vmem>>, vector<1x16xf32>
    %8 = vector.shape_cast %7 : vector<1x16xf32> to vector<1x1x16xf32>
    %9 = vector.broadcast %8 : vector<1x1x16xf32> to vector<32x16x16xf32>
    %10 = arith.addf %6, %9 : vector<32x16x16xf32>
    %cst = arith.constant 0.000000e+00 : f32
    %11 = vector.broadcast %cst : f32 to vector<32x16x16xf32>
    %12 = arith.cmpf oge, %10, %11 : vector<32x16x16xf32>
    %cst_7 = arith.constant 0.00999999977 : f32
    %13 = vector.broadcast %cst_7 : f32 to vector<32x16x16xf32>
    %14 = arith.mulf %13, %10 : vector<32x16x16xf32>
    %15 = arith.select %12, %10, %14 : vector<32x16x16xi1>, vector<32x16x16xf32>
    %c0_8 = arith.constant 0 : index
    %c0_9 = arith.constant 0 : index
    %c0_10 = arith.constant 0 : index
    %c0_11 = arith.constant 0 : index
    %16 = vector.load %arg5[%c0_8, %c0_9, %c0_10, %c0_11] : memref<1x32x16x16xf32, #tpu.memory_space<vmem>>, vector<1x32x16x16xf32>
    %17 = vector.shape_cast %16 : vector<1x32x16x16xf32> to vector<32x16x16xf32>
    %18 = vector.shape_cast %15 : vector<32x16x16xf32> to vector<1x32x16x16xf32>
    tpu.vector_store %arg5[%c0_8, %c0_9, %c0_10, %c0_11], %18 {strides = array<i32>} : memref<1x32x16x16xf32, #tpu.memory_space<vmem>>, vector<1x32x16x16xf32>,
    return
  }
  func.func @transform_0(%arg0: i32, %arg1: i32) -> (i32, i32, i32, i32) {
    %c0_i32 = arith.constant 0 : i32
    %c0_i32_0 = arith.constant 0 : i32
    %c0_i32_1 = arith.constant 0 : i32
    return %arg0, %arg1, %c0_i32, %c0_i32_0 : i32, i32, i32, i32
  }
  func.func @transform_1(%arg0: i32, %arg1: i32) -> (i32, i32) {
    %c0_i32 = arith.constant 0 : i32
    %c0_i32_0 = arith.constant 0 : i32
    %c0_i32_1 = arith.constant 0 : i32
    return %c0_i32, %c0_i32_0 : i32, i32
  }
  func.func @transform_2(%arg0: i32, %arg1: i32) -> (i32, i32) {
    %c0_i32 = arith.constant 0 : i32
    %c0_i32_0 = arith.constant 0 : i32
    %c0_i32_1 = arith.constant 0 : i32
    return %c0_i32, %c0_i32_0 : i32, i32
  }
  func.func @transform_3(%arg0: i32, %arg1: i32) -> (i32, i32, i32, i32) {
    %c0_i32 = arith.constant 0 : i32
    %c0_i32_0 = arith.constant 0 : i32
    %c0_i32_1 = arith.constant 0 : i32
    return %arg0, %arg1, %c0_i32, %c0_i32_0 : i32, i32, i32, i32
  }
}

</mosaic_0001>

<bundles_post_ra>
// kernel: tile.18
= control target key start
LH: loop header
LB: loop body
LE: loop exit
PB: predicated region body
PF: predicated region fallthrough
CT: control target
= control target key end

     0   :  { %s22_s0 = inlined_call_operand.vmem [shape: f32[8], index: 0, kind: input, shape index: {}]   ;;  %s23_s1 = inlined_call_operand.vmem [shape: f32[2,8], index: 1, kind: output, shape index: {}]  }
   0x1   :  { %v4_v0 = vld [vmem:[%s22_s0] ss:$0 sm:$0xff] }
   0x2   :  { %5 = vst [vmem:[%s23_s1] sm:$0x3] %v4_v0 }

// kernel: tile.19
= control target key start
LH: loop header
LB: loop body
LE: loop exit
PB: predicated region body
PF: predicated region fallthrough
CT: control target
= control target key end

     0   :  { %vm8_vm0 = vcmask 64512   ;;  %vm14_vm1 = vcmask 130112   ;;  %s42_s0 = inlined_call_operand.vmem [shape: f32[2,8], index: 0, kind: input, shape index: {}]   ;;  %s43_s1 = inlined_call_operand.vmem [shape: f32[1,16], index: 1, kind: output, shape index: {}]  }
   0x1   :  { %v5_v0 = vld [vmem:[%s42_s0] sm:$0x3]  ;;  %s25_s0 = smov 8  }
   0x2   :  { %6 = vst [vmem:[#allocation1] sm:$0x3] %v5_v0 }
   0x9   :  { %v11_v1 = vld [vmem:[#allocation1 + $0x1] sm:$0x1]   ;;  %v7_v2 = vld [vmem:[#allocation1] sm:$0x1]  }
   0xa   :  { %12 = vrot.lane.b32.xlu0 %v11_v1, %s25_s0  ;;  %9 = vst.msk [vmem:[#allocation0] sm:$0x1] %vm8_vm0, %v7_v2  }
  0x7c   :  { %v13_v3 = vpop.permute.xlu0 %12  }
  0x7d   :  { %15 = vst.msk [vmem:[#allocation0] sm:$0x1] %vm14_vm1, %v13_v3  }
  0x84   :  { %v20_v4 = vld [vmem:[#allocation0] sm:$0x1] }
  0x85   :  { %23 = vst [vmem:[%s43_s1] sm:$0x1] %v20_v4 }

// kernel: transposed_conv_layer.3
= control target key start
LH: loop header
LB: loop body
LE: loop exit
PB: predicated region body
PF: predicated region fallthrough
CT: control target
= control target key end

     0   :  { %s1080_s12 = smov 0   ;;  %s1082_s13 = smov 0   ;;  %s1419_s0 = inlined_call_operand.vmem [shape: bf16[2,32,16,16], index: 0, kind: input, shape index: {}]   ;;  %s1420_s1 = inlined_call_operand.vmem [shape: f32[1,16], index: 1, kind: input, shape index: {}]   ;;  %s1421_s2 = inlined_call_operand.vmem [shape: f32[1,16], index: 2, kind: input, shape index: {}]   ;;  %s1422_s3 = inlined_call_operand.vmem [shape: f32[2,32,16,16], index: 3, kind: output, shape index: {}]  }
   0x1   :  { %s1084_s14 = smov 0  }
   0x2 LB: > { %s25_s15 = sadd.s32 1, %s1054_s13  ;;  %p842_p0 = scmp.ge.s32.totalorder %s1058_s14, 1  ;;  %s1058_s14 = sphi %s1084_s14, %s13_s14   ;;  %s1054_s13 = sphi %s1082_s13, %s1424_s13   ;;  %s1050_s12 = sphi %s1080_s12, %s1423_s12  }
   0x3   : > { %p27_p1 = scmp.ge.s32.totalorder %s25_s15, 2  ;;  %p159_p2 = scmp.lt.s32.totalorder %s1058_s14, 3 }
   0x5   : > { %s1426_s15 = smov (%p27_p1, %s25_s15), 0  ;;  %p160_p3 = pnand %p842_p0, %p159_p2 }
   0x6   : > { %p194_p4 = scmp.lt.s32.totalorder (!%p160_p3), %s1050_s12, 1 }
   0x7   : > { %163 = sbr.rel (%p160_p3) target bundleno = 116 (0x74), region = 32 }
   0xc   : > { %s1428_s12 = smov (!%p194_p4, %s1050_s12), 1  ;;  %v1109_v0 = vld [vmem:[%s1420_s1] ss:$0 sm:$0xff]  ;;  %vm677_vm0 = vcmask 130048  }
   0xd   : > { %s851_s16 = sshll.u32 %s1428_s12, 8  ;;  %v1118_v9 = vld [vmem:[%s1421_s2] ss:$0 sm:$0xff]  ;;  %s852_s24 = sshll.u32 %s1428_s12, 9 }
   0xe   : > { %s1104_s19 = scalar_lea.vmem %s1419_s0, %s851_s16  ;;  %s1140_s27 = scalar_lea.vmem %s1422_s3, %s852_s24 }
   0xf   : > { %v854_v1 = vld [vmem:[%s1104_s19] sm:$0xff]   ;;  %v981_v2 = vld [vmem:[%s1104_s19 + $0x8] sm:$0xff]   ;;  %v982_v3 = vld [vmem:[%s1104_s19 + $0x10] sm:$0xff]  }
  0x10   : > { %v855_v4 = vunpack.c.l.bf16 %v854_v1  ;;  %v856_v5 = vunpack.c.h.bf16 %v854_v1  ;;  %v859_v6 = vunpack.c.l.bf16 %v981_v2  ;;  %v860_v7 = vunpack.c.h.bf16 %v981_v2  ;;  %v983_v8 = vld [vmem:[%s1104_s19 + $0x18] sm:$0xff]   ;;  %v984_v37 = vld [vmem:[%s1104_s19 + $0x20] sm:$0xff]   ;;  %v985_v41 = vld [vmem:[%s1104_s19 + $0x28] sm:$0xff]  }
  0x11   : > { %v863_v10 = vunpack.c.l.bf16 %v982_v3  ;;  %v864_v11 = vunpack.c.h.bf16 %v982_v3  ;;  %v867_v12 = vunpack.c.l.bf16 %v983_v8  ;;  %v868_v13 = vunpack.c.h.bf16 %v983_v8  ;;  %v986_v42 = vld [vmem:[%s1104_s19 + $0x30] sm:$0xff]   ;;  %v987_v49 = vld [vmem:[%s1104_s19 + $0x38] sm:$0xff]  }
  0x12   : > { %v350_v14 = vmul.f32 %v855_v4, %v1109_v0  ;;  %v351_v15 = vmul.f32 %v856_v5, %v1109_v0  ;;  %v352_v16 = vmul.f32 %v859_v6, %v1109_v0  ;;  %v353_v17 = vmul.f32 %v860_v7, %v1109_v0  ;;  %v988_v7 = vld [vmem:[%s1104_s19 + $0x40] sm:$0xff]  }
  0x13   : > { %v354_v18 = vmul.f32 %v863_v10, %v1109_v0  ;;  %v355_v19 = vmul.f32 %v864_v11, %v1109_v0  ;;  %v356_v20 = vmul.f32 %v867_v12, %v1109_v0  ;;  %v357_v21 = vmul.f32 %v868_v13, %v1109_v0 }
  0x14   : > { %v421_v22 = vadd.f32 %v1118_v9, %v350_v14  ;;  %v422_v23 = vadd.f32 %v1118_v9, %v351_v15  ;;  %v423_v24 = vadd.f32 %v1118_v9, %v352_v16  ;;  %v424_v25 = vadd.f32 %v1118_v9, %v353_v17 }
  0x15   : > { %v425_v26 = vadd.f32 %v1118_v9, %v354_v18  ;;  %v426_v27 = vadd.f32 %v1118_v9, %v355_v19  ;;  %v427_v28 = vadd.f32 %v1118_v9, %v356_v20  ;;  %v428_v29 = vadd.f32 %v1118_v9, %v357_v21  ;;  %v989_v20 = vld [vmem:[%s1104_s19 + $0x48] sm:$0xff]  }
  0x16   : > { %vm485_vm1 = vcmp.ge.f32.partialorder %v421_v22, 0.0  ;;  %v549_v30 = vmul.f32 0.01, %v421_v22  ;;  %vm486_vm2 = vcmp.ge.f32.partialorder %v422_v23, 0.0  ;;  %v550_v31 = vmul.f32 0.01, %v422_v23 }
  0x17   : > { %vm487_vm3 = vcmp.ge.f32.partialorder %v423_v24, 0.0  ;;  %v551_v32 = vmul.f32 0.01, %v423_v24  ;;  %vm488_vm4 = vcmp.ge.f32.partialorder %v424_v25, 0.0  ;;  %v552_v33 = vmul.f32 0.01, %v424_v25 }
  0x18   : > { %v613_v34 = vsel %vm485_vm1, %v421_v22, %v549_v30  ;;  %v614_v35 = vsel %vm486_vm2, %v422_v23, %v550_v31  ;;  %vm489_vm5 = vcmp.ge.f32.partialorder %v425_v26, 0.0  ;;  %v553_v36 = vmul.f32 0.01, %v425_v26 }
  0x19   : > { %678 = vst.msk [vmem:[%s1140_s27] sm:$0xff] %vm677_vm0, %v613_v34  ;;  %679 = vst.msk [vmem:[%s1140_s27 + $0x8] sm:$0xff] %vm677_vm0, %v614_v35  ;;  %v615_v38 = vsel %vm487_vm3, %v423_v24, %v551_v32  ;;  %v616_v39 = vsel %vm488_vm4, %v424_v25, %v552_v33  ;;  %vm490_vm6 = vcmp.ge.f32.partialorder %v426_v27, 0.0  ;;  %v554_v40 = vmul.f32 0.01, %v426_v27  ;;  %v990_v25 = vld [vmem:[%s1104_s19 + $0x50] sm:$0xff]  }
  0x1a   : > { %680 = vst.msk [vmem:[%s1140_s27 + $0x10] sm:$0xff] %vm677_vm0, %v615_v38  ;;  %681 = vst.msk [vmem:[%s1140_s27 + $0x18] sm:$0xff] %vm677_vm0, %v616_v39  ;;  %v617_v43 = vsel %vm489_vm5, %v425_v26, %v553_v36  ;;  %vm491_vm7 = vcmp.ge.f32.partialorder %v427_v28, 0.0  ;;  %v555_v44 = vmul.f32 0.01, %v427_v28  ;;  %vm492_vm8 = vcmp.ge.f32.partialorder %v428_v29, 0.0 }
  0x1b   : > { %682 = vst.msk [vmem:[%s1140_s27 + $0x20] sm:$0xff] %vm677_vm0, %v617_v43  ;;  %v618_v45 = vsel %vm490_vm6, %v426_v27, %v554_v40  ;;  %v556_v46 = vmul.f32 0.01, %v428_v29  ;;  %v871_v47 = vunpack.c.l.bf16 %v984_v37  ;;  %v872_v48 = vunpack.c.h.bf16 %v984_v37  ;;  %v991_v43 = vld [vmem:[%s1104_s19 + $0x58] sm:$0xff]  }
  0x1c   : > { %683 = vst.msk [vmem:[%s1140_s27 + $0x28] sm:$0xff] %vm677_vm0, %v618_v45  ;;  %v619_v50 = vsel %vm491_vm7, %v427_v28, %v555_v44  ;;  %v875_v51 = vunpack.c.l.bf16 %v985_v41  ;;  %v876_v52 = vunpack.c.h.bf16 %v985_v41  ;;  %v879_v53 = vunpack.c.l.bf16 %v986_v42 }
  0x1d   : > { %684 = vst.msk [vmem:[%s1140_s27 + $0x30] sm:$0xff] %vm677_vm0, %v619_v50  ;;  %v620_v54 = vsel %vm492_vm8, %v428_v29, %v556_v46  ;;  %v358_v55 = vmul.f32 %v871_v47, %v1109_v0  ;;  %v359_v56 = vmul.f32 %v872_v48, %v1109_v0  ;;  %v880_v57 = vunpack.c.h.bf16 %v986_v42 }
  0x1e   : > { %685 = vst.msk [vmem:[%s1140_s27 + $0x38] sm:$0xff] %vm677_vm0, %v620_v54  ;;  %v360_v58 = vmul.f32 %v875_v51, %v1109_v0  ;;  %v361_v59 = vmul.f32 %v876_v52, %v1109_v0  ;;  %v362_v60 = vmul.f32 %v879_v53, %v1109_v0  ;;  %v883_v61 = vunpack.c.l.bf16 %v987_v49  ;;  %v992_v54 = vld [vmem:[%s1104_s19 + $0x60] sm:$0xff]  }
  0x1f   : > { %v429_v62 = vadd.f32 %v1118_v9, %v358_v55  ;;  %v430_v63 = vadd.f32 %v1118_v9, %v359_v56  ;;  %v363_v1 = vmul.f32 %v880_v57, %v1109_v0  ;;  %v884_v2 = vunpack.c.h.bf16 %v987_v49 }
  0x20   : > { %v431_v3 = vadd.f32 %v1118_v9, %v360_v58  ;;  %v432_v4 = vadd.f32 %v1118_v9, %v361_v59  ;;  %v433_v5 = vadd.f32 %v1118_v9, %v362_v60  ;;  %v364_v6 = vmul.f32 %v883_v61, %v1109_v0 }
  0x21   : > { %vm493_vm9 = vcmp.ge.f32.partialorder %v429_v62, 0.0  ;;  %v557_v8 = vmul.f32 0.01, %v429_v62  ;;  %vm494_vm10 = vcmp.ge.f32.partialorder %v430_v63, 0.0  ;;  %v558_v10 = vmul.f32 0.01, %v430_v63 }
  0x22   : > { %vm495_vm11 = vcmp.ge.f32.partialorder %v431_v3, 0.0  ;;  %v559_v11 = vmul.f32 0.01, %v431_v3  ;;  %vm496_vm12 = vcmp.ge.f32.partialorder %v432_v4, 0.0  ;;  %v560_v12 = vmul.f32 0.01, %v432_v4 }
  0x23   : > { %v621_v13 = vsel %vm493_vm9, %v429_v62, %v557_v8  ;;  %v622_v14 = vsel %vm494_vm10, %v430_v63, %v558_v10  ;;  %vm497_vm13 = vcmp.ge.f32.partialorder %v433_v5, 0.0  ;;  %v561_v15 = vmul.f32 0.01, %v433_v5 }
  0x24   : > { %686 = vst.msk [vmem:[%s1140_s27 + $0x40] sm:$0xff] %vm677_vm0, %v621_v13  ;;  %687 = vst.msk [vmem:[%s1140_s27 + $0x48] sm:$0xff] %vm677_vm0, %v622_v14  ;;  %v623_v16 = vsel %vm495_vm11, %v431_v3, %v559_v11  ;;  %v624_v17 = vsel %vm496_vm12, %v432_v4, %v560_v12  ;;  %v434_v18 = vadd.f32 %v1118_v9, %v363_v1  ;;  %v887_v23 = vunpack.c.l.bf16 %v988_v7  ;;  %v993_v1 = vld [vmem:[%s1104_s19 + $0x68] sm:$0xff]  }
  0x25   : > { %v435_v19 = vadd.f32 %v1118_v9, %v364_v6  ;;  %688 = vst.msk [vmem:[%s1140_s27 + $0x50] sm:$0xff] %vm677_vm0, %v623_v16  ;;  %689 = vst.msk [vmem:[%s1140_s27 + $0x58] sm:$0xff] %vm677_vm0, %v624_v17  ;;  %v625_v21 = vsel %vm497_vm13, %v433_v5, %v561_v15  ;;  %v365_v22 = vmul.f32 %v884_v2, %v1109_v0  ;;  %v888_v24 = vunpack.c.h.bf16 %v988_v7  ;;  %v994_v2 = vld [vmem:[%s1104_s19 + $0x70] sm:$0xff]  }
  0x26   : > { %690 = vst.msk [vmem:[%s1140_s27 + $0x60] sm:$0xff] %vm677_vm0, %v625_v21  ;;  %vm498_vm14 = vcmp.ge.f32.partialorder %v434_v18, 0.0  ;;  %v562_v26 = vmul.f32 0.01, %v434_v18  ;;  %v366_v29 = vmul.f32 %v887_v23, %v1109_v0  ;;  %v891_v31 = vunpack.c.l.bf16 %v989_v20  ;;  %v995_v21 = vld [vmem:[%s1104_s19 + $0x78] sm:$0xff]  }
  0x27   : > { %vm499_vm15 = vcmp.ge.f32.partialorder %v435_v19, 0.0  ;;  %v563_v27 = vmul.f32 0.01, %v435_v19  ;;  %v436_v28 = vadd.f32 %v1118_v9, %v365_v22  ;;  %v367_v30 = vmul.f32 %v888_v24, %v1109_v0 }
  0x28   : > { %v626_v32 = vsel %vm498_vm14, %v434_v18, %v562_v26  ;;  %v892_v34 = vunpack.c.h.bf16 %v989_v20  ;;  %v895_v35 = vunpack.c.l.bf16 %v990_v25  ;;  %v437_v37 = vadd.f32 %v1118_v9, %v366_v29 }
  0x29   : > { %v627_v33 = vsel %vm499_vm15, %v435_v19, %v563_v27  ;;  %691 = vst.msk [vmem:[%s1140_s27 + $0x68] sm:$0xff] %vm677_vm0, %v626_v32  ;;  %vm500_vm1 = vcmp.ge.f32.partialorder %v436_v28, 0.0  ;;  %v564_v36 = vmul.f32 0.01, %v436_v28  ;;  %v438_v38 = vadd.f32 %v1118_v9, %v367_v30 }
  0x2a   : > { %692 = vst.msk [vmem:[%s1140_s27 + $0x70] sm:$0xff] %vm677_vm0, %v627_v33  ;;  %v368_v39 = vmul.f32 %v891_v31, %v1109_v0  ;;  %v369_v40 = vmul.f32 %v892_v34, %v1109_v0  ;;  %v370_v41 = vmul.f32 %v895_v35, %v1109_v0  ;;  %v896_v42 = vunpack.c.h.bf16 %v990_v25  ;;  %v996_v35 = vld [vmem:[%s1104_s19 + $0x80] sm:$0xff]  }
  0x2b   : > { %v628_v44 = vsel %vm500_vm1, %v436_v28, %v564_v36  ;;  %vm501_vm2 = vcmp.ge.f32.partialorder %v437_v37, 0.0  ;;  %v565_v45 = vmul.f32 0.01, %v437_v37  ;;  %vm502_vm3 = vcmp.ge.f32.partialorder %v438_v38, 0.0 }
  0x2c   : > { %693 = vst.msk [vmem:[%s1140_s27 + $0x78] sm:$0xff] %vm677_vm0, %v628_v44  ;;  %v566_v46 = vmul.f32 0.01, %v438_v38  ;;  %v439_v47 = vadd.f32 %v1118_v9, %v368_v39  ;;  %v440_v48 = vadd.f32 %v1118_v9, %v369_v40  ;;  %v441_v49 = vadd.f32 %v1118_v9, %v370_v41 }
  0x2d   : > { %v629_v50 = vsel %vm501_vm2, %v437_v37, %v565_v45  ;;  %v371_v51 = vmul.f32 %v896_v42, %v1109_v0  ;;  %v899_v52 = vunpack.c.l.bf16 %v991_v43  ;;  %v900_v53 = vunpack.c.h.bf16 %v991_v43  ;;  %v997_v42 = vld [vmem:[%s1104_s19 + $0x88] sm:$0xff]  }
  0x2e   : > { %694 = vst.msk [vmem:[%s1140_s27 + $0x80] sm:$0xff] %vm677_vm0, %v629_v50  ;;  %v630_v55 = vsel %vm502_vm3, %v438_v38, %v566_v46  ;;  %vm503_vm4 = vcmp.ge.f32.partialorder %v439_v47, 0.0  ;;  %v567_v56 = vmul.f32 0.01, %v439_v47  ;;  %vm504_vm5 = vcmp.ge.f32.partialorder %v440_v48, 0.0 }
  0x2f   : > { %695 = vst.msk [vmem:[%s1140_s27 + $0x88] sm:$0xff] %vm677_vm0, %v630_v55  ;;  %v568_v57 = vmul.f32 0.01, %v440_v48  ;;  %vm505_vm6 = vcmp.ge.f32.partialorder %v441_v49, 0.0  ;;  %v569_v58 = vmul.f32 0.01, %v441_v49  ;;  %v442_v59 = vadd.f32 %v1118_v9, %v371_v51 }
  0x30   : > { %v631_v60 = vsel %vm503_vm4, %v439_v47, %v567_v56  ;;  %v372_v61 = vmul.f32 %v899_v52, %v1109_v0  ;;  %v373_v62 = vmul.f32 %v900_v53, %v1109_v0  ;;  %v903_v63 = vunpack.c.l.bf16 %v992_v54 }
  0x31   : > { %696 = vst.msk [vmem:[%s1140_s27 + $0x90] sm:$0xff] %vm677_vm0, %v631_v60  ;;  %v632_v3 = vsel %vm504_vm5, %v440_v48, %v568_v57  ;;  %v633_v4 = vsel %vm505_vm6, %v441_v49, %v569_v58  ;;  %vm506_vm7 = vcmp.ge.f32.partialorder %v442_v59, 0.0  ;;  %v570_v5 = vmul.f32 0.01, %v442_v59 }
  0x32   : > { %697 = vst.msk [vmem:[%s1140_s27 + $0x98] sm:$0xff] %vm677_vm0, %v632_v3  ;;  %698 = vst.msk [vmem:[%s1140_s27 + $0xa0] sm:$0xff] %vm677_vm0, %v633_v4  ;;  %v443_v6 = vadd.f32 %v1118_v9, %v372_v61  ;;  %v444_v7 = vadd.f32 %v1118_v9, %v373_v62  ;;  %v374_v8 = vmul.f32 %v903_v63, %v1109_v0  ;;  %v904_v10 = vunpack.c.h.bf16 %v992_v54  ;;  %v998_v54 = vld [vmem:[%s1104_s19 + $0x90] sm:$0xff]   ;;  %v999_v3 = vld [vmem:[%s1104_s19 + $0x98] sm:$0xff]  }
  0x33   : > { %v634_v11 = vsel %vm506_vm7, %v442_v59, %v570_v5  ;;  %v907_v12 = vunpack.c.l.bf16 %v993_v1  ;;  %v908_v13 = vunpack.c.h.bf16 %v993_v1  ;;  %v911_v14 = vunpack.c.l.bf16 %v994_v2 }
  0x34   : > { %699 = vst.msk [vmem:[%s1140_s27 + $0xa8] sm:$0xff] %vm677_vm0, %v634_v11  ;;  %vm507_vm8 = vcmp.ge.f32.partialorder %v443_v6, 0.0  ;;  %v571_v15 = vmul.f32 0.01, %v443_v6  ;;  %vm508_vm9 = vcmp.ge.f32.partialorder %v444_v7, 0.0  ;;  %v445_v17 = vadd.f32 %v1118_v9, %v374_v8 }
  0x35   : > { %v572_v16 = vmul.f32 0.01, %v444_v7  ;;  %v375_v18 = vmul.f32 %v904_v10, %v1109_v0  ;;  %v376_v19 = vmul.f32 %v907_v12, %v1109_v0  ;;  %v377_v20 = vmul.f32 %v908_v13, %v1109_v0 }
  0x36   : > { %v635_v22 = vsel %vm507_vm8, %v443_v6, %v571_v15  ;;  %v378_v24 = vmul.f32 %v911_v14, %v1109_v0  ;;  %v912_v25 = vunpack.c.h.bf16 %v994_v2  ;;  %vm509_vm10 = vcmp.ge.f32.partialorder %v445_v17, 0.0 }
  0x37   : > { %v636_v23 = vsel %vm508_vm9, %v444_v7, %v572_v16  ;;  %700 = vst.msk [vmem:[%s1140_s27 + $0xb0] sm:$0xff] %vm677_vm0, %v635_v22  ;;  %v573_v26 = vmul.f32 0.01, %v445_v17  ;;  %v446_v27 = vadd.f32 %v1118_v9, %v375_v18  ;;  %v447_v28 = vadd.f32 %v1118_v9, %v376_v19 }
  0x38   : > { %701 = vst.msk [vmem:[%s1140_s27 + $0xb8] sm:$0xff] %vm677_vm0, %v636_v23  ;;  %v448_v29 = vadd.f32 %v1118_v9, %v377_v20  ;;  %v449_v30 = vadd.f32 %v1118_v9, %v378_v24  ;;  %v379_v31 = vmul.f32 %v912_v25, %v1109_v0  ;;  %v915_v32 = vunpack.c.l.bf16 %v995_v21  ;;  %v1000_v20 = vld [vmem:[%s1104_s19 + $0xa0] sm:$0xff]   ;;  %v1001_v25 = vld [vmem:[%s1104_s19 + $0xa8] sm:$0xff]  }
  0x39   : > { %v637_v33 = vsel %vm509_vm10, %v445_v17, %v573_v26  ;;  %vm510_vm11 = vcmp.ge.f32.partialorder %v446_v27, 0.0  ;;  %v574_v34 = vmul.f32 0.01, %v446_v27  ;;  %vm511_vm12 = vcmp.ge.f32.partialorder %v447_v28, 0.0 }
  0x3a   : > { %702 = vst.msk [vmem:[%s1140_s27 + $0xc0] sm:$0xff] %vm677_vm0, %v637_v33  ;;  %v575_v36 = vmul.f32 0.01, %v447_v28  ;;  %vm512_vm13 = vcmp.ge.f32.partialorder %v448_v29, 0.0  ;;  %v576_v37 = vmul.f32 0.01, %v448_v29  ;;  %v450_v40 = vadd.f32 %v1118_v9, %v379_v31 }
  0x3b   : > { %vm513_vm14 = vcmp.ge.f32.partialorder %v449_v30, 0.0  ;;  %v638_v38 = vsel %vm510_vm11, %v446_v27, %v574_v34  ;;  %v577_v39 = vmul.f32 0.01, %v449_v30  ;;  %v380_v41 = vmul.f32 %v915_v32, %v1109_v0 }
  0x3c   : > { %703 = vst.msk [vmem:[%s1140_s27 + $0xc8] sm:$0xff] %vm677_vm0, %v638_v38  ;;  %v639_v43 = vsel %vm511_vm12, %v447_v28, %v575_v36  ;;  %v640_v44 = vsel %vm512_vm13, %v448_v29, %v576_v37  ;;  %v916_v45 = vunpack.c.h.bf16 %v995_v21  ;;  %v919_v46 = vunpack.c.l.bf16 %v996_v35  ;;  %v1002_v36 = vld [vmem:[%s1104_s19 + $0xb0] sm:$0xff]  }
  0x3d   : > { %704 = vst.msk [vmem:[%s1140_s27 + $0xd0] sm:$0xff] %vm677_vm0, %v639_v43  ;;  %705 = vst.msk [vmem:[%s1140_s27 + $0xd8] sm:$0xff] %vm677_vm0, %v640_v44  ;;  %v641_v47 = vsel %vm513_vm14, %v449_v30, %v577_v39  ;;  %vm514_vm15 = vcmp.ge.f32.partialorder %v450_v40, 0.0  ;;  %v578_v48 = vmul.f32 0.01, %v450_v40  ;;  %v451_v49 = vadd.f32 %v1118_v9, %v380_v41  ;;  %v1003_v44 = vld [vmem:[%s1104_s19 + $0xb8] sm:$0xff]  }
  0x3e   : > { %706 = vst.msk [vmem:[%s1140_s27 + $0xe0] sm:$0xff] %vm677_vm0, %v641_v47  ;;  %v381_v50 = vmul.f32 %v916_v45, %v1109_v0  ;;  %v382_v51 = vmul.f32 %v919_v46, %v1109_v0  ;;  %v920_v52 = vunpack.c.h.bf16 %v996_v35  ;;  %v923_v53 = vunpack.c.l.bf16 %v997_v42 }
  0x3f   : > { %v642_v55 = vsel %vm514_vm15, %v450_v40, %v578_v48  ;;  %vm515_vm1 = vcmp.ge.f32.partialorder %v451_v49, 0.0  ;;  %v579_v56 = vmul.f32 0.01, %v451_v49  ;;  %v924_v57 = vunpack.c.h.bf16 %v997_v42 }
  0x40   : > { %707 = vst.msk [vmem:[%s1140_s27 + $0xe8] sm:$0xff] %vm677_vm0, %v642_v55  ;;  %v452_v58 = vadd.f32 %v1118_v9, %v381_v50  ;;  %v453_v59 = vadd.f32 %v1118_v9, %v382_v51  ;;  %v383_v60 = vmul.f32 %v920_v52, %v1109_v0  ;;  %v384_v61 = vmul.f32 %v923_v53, %v1109_v0 }
  0x41   : > { %v643_v62 = vsel %vm515_vm1, %v451_v49, %v579_v56  ;;  %v385_v63 = vmul.f32 %v924_v57, %v1109_v0  ;;  %v927_v1 = vunpack.c.l.bf16 %v998_v54  ;;  %v928_v2 = vunpack.c.h.bf16 %v998_v54  ;;  %v1004_v56 = vld [vmem:[%s1104_s19 + $0xc0] sm:$0xff]  }
  0x42   : > { %708 = vst.msk [vmem:[%s1140_s27 + $0xf0] sm:$0xff] %vm677_vm0, %v643_v62  ;;  %vm516_vm2 = vcmp.ge.f32.partialorder %v452_v58, 0.0  ;;  %v580_v4 = vmul.f32 0.01, %v452_v58  ;;  %vm517_vm3 = vcmp.ge.f32.partialorder %v453_v59, 0.0  ;;  %v454_v6 = vadd.f32 %v1118_v9, %v383_v60 }
  0x43   : > { %v581_v5 = vmul.f32 0.01, %v453_v59  ;;  %v455_v7 = vadd.f32 %v1118_v9, %v384_v61  ;;  %v456_v8 = vadd.f32 %v1118_v9, %v385_v63  ;;  %v386_v10 = vmul.f32 %v927_v1, %v1109_v0 }
  0x44   : > { %v644_v11 = vsel %vm516_vm2, %v452_v58, %v580_v4  ;;  %v387_v13 = vmul.f32 %v928_v2, %v1109_v0  ;;  %v931_v14 = vunpack.c.l.bf16 %v999_v3  ;;  %vm518_vm4 = vcmp.ge.f32.partialorder %v454_v6, 0.0  ;;  %v1005_v2 = vld [vmem:[%s1104_s19 + $0xc8] sm:$0xff]  }
  0x45   : > { %v645_v12 = vsel %vm517_vm3, %v453_v59, %v581_v5  ;;  %709 = vst.msk [vmem:[%s1140_s27 + $0xf8] sm:$0xff] %vm677_vm0, %v644_v11  ;;  %v582_v15 = vmul.f32 0.01, %v454_v6  ;;  %vm519_vm5 = vcmp.ge.f32.partialorder %v455_v7, 0.0  ;;  %v583_v16 = vmul.f32 0.01, %v455_v7 }
  0x46   : > { %710 = vst.msk [vmem:[%s1140_s27 + $0x100] sm:$0xff] %vm677_vm0, %v645_v12  ;;  %vm520_vm6 = vcmp.ge.f32.partialorder %v456_v8, 0.0  ;;  %v584_v17 = vmul.f32 0.01, %v456_v8  ;;  %v457_v18 = vadd.f32 %v1118_v9, %v386_v10  ;;  %v458_v19 = vadd.f32 %v1118_v9, %v387_v13 }
  0x47   : > { %v646_v21 = vsel %vm518_vm4, %v454_v6, %v582_v15  ;;  %v647_v22 = vsel %vm519_vm5, %v455_v7, %v583_v16  ;;  %v388_v23 = vmul.f32 %v931_v14, %v1109_v0  ;;  %v932_v24 = vunpack.c.h.bf16 %v999_v3 }
  0x48   : > { %711 = vst.msk [vmem:[%s1140_s27 + $0x108] sm:$0xff] %vm677_vm0, %v646_v21  ;;  %712 = vst.msk [vmem:[%s1140_s27 + $0x110] sm:$0xff] %vm677_vm0, %v647_v22  ;;  %v648_v26 = vsel %vm520_vm6, %v456_v8, %v584_v17  ;;  %vm521_vm7 = vcmp.ge.f32.partialorder %v457_v18, 0.0  ;;  %v585_v27 = vmul.f32 0.01, %v457_v18  ;;  %vm522_vm8 = vcmp.ge.f32.partialorder %v458_v19, 0.0 }
  0x49   : > { %713 = vst.msk [vmem:[%s1140_s27 + $0x118] sm:$0xff] %vm677_vm0, %v648_v26  ;;  %v586_v28 = vmul.f32 0.01, %v458_v19  ;;  %v459_v29 = vadd.f32 %v1118_v9, %v388_v23  ;;  %v389_v30 = vmul.f32 %v932_v24, %v1109_v0  ;;  %v935_v31 = vunpack.c.l.bf16 %v1000_v20 }
  0x4a   : > { %v649_v32 = vsel %vm521_vm7, %v457_v18, %v585_v27  ;;  %v936_v33 = vunpack.c.h.bf16 %v1000_v20  ;;  %v939_v34 = vunpack.c.l.bf16 %v1001_v25  ;;  %v940_v35 = vunpack.c.h.bf16 %v1001_v25  ;;  %v1006_v25 = vld [vmem:[%s1104_s19 + $0xd0] sm:$0xff]  }
  0x4b   : > { %714 = vst.msk [vmem:[%s1140_s27 + $0x120] sm:$0xff] %vm677_vm0, %v649_v32  ;;  %v650_v37 = vsel %vm522_vm8, %v458_v19, %v586_v28  ;;  %vm523_vm9 = vcmp.ge.f32.partialorder %v459_v29, 0.0  ;;  %v587_v38 = vmul.f32 0.01, %v459_v29  ;;  %v460_v39 = vadd.f32 %v1118_v9, %v389_v30  ;;  %v1007_v32 = vld [vmem:[%s1104_s19 + $0xd8] sm:$0xff]  }
  0x4c   : > { %715 = vst.msk [vmem:[%s1140_s27 + $0x128] sm:$0xff] %vm677_vm0, %v650_v37  ;;  %v390_v40 = vmul.f32 %v935_v31, %v1109_v0  ;;  %v391_v41 = vmul.f32 %v936_v33, %v1109_v0  ;;  %v392_v42 = vmul.f32 %v939_v34, %v1109_v0  ;;  %v393_v43 = vmul.f32 %v940_v35, %v1109_v0 }
  0x4d   : > { %v651_v45 = vsel %vm523_vm9, %v459_v29, %v587_v38  ;;  %vm524_vm10 = vcmp.ge.f32.partialorder %v460_v39, 0.0  ;;  %v588_v46 = vmul.f32 0.01, %v460_v39  ;;  %v943_v47 = vunpack.c.l.bf16 %v1002_v36 }
  0x4e   : > { %716 = vst.msk [vmem:[%s1140_s27 + $0x130] sm:$0xff] %vm677_vm0, %v651_v45  ;;  %v461_v48 = vadd.f32 %v1118_v9, %v390_v40  ;;  %v462_v49 = vadd.f32 %v1118_v9, %v391_v41  ;;  %v463_v50 = vadd.f32 %v1118_v9, %v392_v42  ;;  %v464_v51 = vadd.f32 %v1118_v9, %v393_v43 }
  0x4f   : > { %v652_v52 = vsel %vm524_vm10, %v460_v39, %v588_v46  ;;  %v394_v53 = vmul.f32 %v943_v47, %v1109_v0  ;;  %v944_v54 = vunpack.c.h.bf16 %v1002_v36  ;;  %v947_v55 = vunpack.c.l.bf16 %v1003_v44  ;;  %v1008_v39 = vld [vmem:[%s1104_s19 + $0xe0] sm:$0xff]  }
  0x50   : > { %717 = vst.msk [vmem:[%s1140_s27 + $0x138] sm:$0xff] %vm677_vm0, %v652_v52  ;;  %vm525_vm11 = vcmp.ge.f32.partialorder %v461_v48, 0.0  ;;  %v589_v57 = vmul.f32 0.01, %v461_v48  ;;  %vm526_vm12 = vcmp.ge.f32.partialorder %v462_v49, 0.0  ;;  %vm527_vm13 = vcmp.ge.f32.partialorder %v463_v50, 0.0 }
  0x51   : > { %v590_v58 = vmul.f32 0.01, %v462_v49  ;;  %v591_v59 = vmul.f32 0.01, %v463_v50  ;;  %vm528_vm14 = vcmp.ge.f32.partialorder %v464_v51, 0.0  ;;  %v465_v63 = vadd.f32 %v1118_v9, %v394_v53 }
  0x52   : > { %v592_v60 = vmul.f32 0.01, %v464_v51  ;;  %v653_v61 = vsel %vm525_vm11, %v461_v48, %v589_v57  ;;  %v395_v1 = vmul.f32 %v944_v54, %v1109_v0  ;;  %v396_v5 = vmul.f32 %v947_v55, %v1109_v0 }
  0x53   : > { %v654_v62 = vsel %vm526_vm12, %v462_v49, %v590_v58  ;;  %718 = vst.msk [vmem:[%s1140_s27 + $0x140] sm:$0xff] %vm677_vm0, %v653_v61  ;;  %v655_v3 = vsel %vm527_vm13, %v463_v50, %v591_v59  ;;  %v948_v6 = vunpack.c.h.bf16 %v1003_v44  ;;  %vm529_vm15 = vcmp.ge.f32.partialorder %v465_v63, 0.0  ;;  %v1009_v44 = vld [vmem:[%s1104_s19 + $0xe8] sm:$0xff]  }
  0x54   : > { %719 = vst.msk [vmem:[%s1140_s27 + $0x148] sm:$0xff] %vm677_vm0, %v654_v62  ;;  %v656_v4 = vsel %vm528_vm14, %v464_v51, %v592_v60  ;;  %720 = vst.msk [vmem:[%s1140_s27 + $0x150] sm:$0xff] %vm677_vm0, %v655_v3  ;;  %v593_v7 = vmul.f32 0.01, %v465_v63  ;;  %v466_v8 = vadd.f32 %v1118_v9, %v395_v1  ;;  %v951_v10 = vunpack.c.l.bf16 %v1004_v56 }
  0x55   : > { %721 = vst.msk [vmem:[%s1140_s27 + $0x158] sm:$0xff] %vm677_vm0, %v656_v4  ;;  %v467_v11 = vadd.f32 %v1118_v9, %v396_v5  ;;  %v397_v12 = vmul.f32 %v948_v6, %v1109_v0  ;;  %v952_v13 = vunpack.c.h.bf16 %v1004_v56  ;;  %v955_v14 = vunpack.c.l.bf16 %v1005_v2 }
  0x56   : > { %v657_v15 = vsel %vm529_vm15, %v465_v63, %v593_v7  ;;  %vm530_vm1 = vcmp.ge.f32.partialorder %v466_v8, 0.0  ;;  %v594_v16 = vmul.f32 0.01, %v466_v8  ;;  %v398_v17 = vmul.f32 %v951_v10, %v1109_v0  ;;  %v1010_v10 = vld [vmem:[%s1104_s19 + $0xf0] sm:$0xff]  }
  0x57   : > { %722 = vst.msk [vmem:[%s1140_s27 + $0x160] sm:$0xff] %vm677_vm0, %v657_v15  ;;  %vm531_vm2 = vcmp.ge.f32.partialorder %v467_v11, 0.0  ;;  %v595_v18 = vmul.f32 0.01, %v467_v11  ;;  %v468_v19 = vadd.f32 %v1118_v9, %v397_v12  ;;  %v399_v20 = vmul.f32 %v952_v13, %v1109_v0 }
  0x58   : > { %v658_v21 = vsel %vm530_vm1, %v466_v8, %v594_v16  ;;  %v469_v22 = vadd.f32 %v1118_v9, %v398_v17  ;;  %v400_v23 = vmul.f32 %v955_v14, %v1109_v0  ;;  %v956_v24 = vunpack.c.h.bf16 %v1005_v2  ;;  %v1011_v14 = vld [vmem:[%s1104_s19 + $0xf8] sm:$0xff]  }
  0x59   : > { %723 = vst.msk [vmem:[%s1140_s27 + $0x168] sm:$0xff] %vm677_vm0, %v658_v21  ;;  %v659_v26 = vsel %vm531_vm2, %v467_v11, %v595_v18  ;;  %vm532_vm3 = vcmp.ge.f32.partialorder %v468_v19, 0.0  ;;  %v596_v27 = vmul.f32 0.01, %v468_v19  ;;  %v470_v28 = vadd.f32 %v1118_v9, %v399_v20 }
  0x5a   : > { %724 = vst.msk [vmem:[%s1140_s27 + $0x170] sm:$0xff] %vm677_vm0, %v659_v26  ;;  %vm533_vm4 = vcmp.ge.f32.partialorder %v469_v22, 0.0  ;;  %v597_v29 = vmul.f32 0.01, %v469_v22  ;;  %v471_v30 = vadd.f32 %v1118_v9, %v400_v23  ;;  %v401_v31 = vmul.f32 %v956_v24, %v1109_v0 }
  0x5b   : > { %v660_v33 = vsel %vm532_vm3, %v468_v19, %v596_v27  ;;  %vm534_vm5 = vcmp.ge.f32.partialorder %v470_v28, 0.0  ;;  %v598_v34 = vmul.f32 0.01, %v470_v28  ;;  %v959_v35 = vunpack.c.l.bf16 %v1006_v25 }
  0x5c   : > { %725 = vst.msk [vmem:[%s1140_s27 + $0x178] sm:$0xff] %vm677_vm0, %v660_v33  ;;  %v661_v36 = vsel %vm533_vm4, %v469_v22, %v597_v29  ;;  %vm535_vm6 = vcmp.ge.f32.partialorder %v471_v30, 0.0  ;;  %v599_v37 = vmul.f32 0.01, %v471_v30  ;;  %v472_v38 = vadd.f32 %v1118_v9, %v401_v31 }
  0x5d   : > { %726 = vst.msk [vmem:[%s1140_s27 + $0x180] sm:$0xff] %vm677_vm0, %v661_v36  ;;  %v662_v40 = vsel %vm534_vm5, %v470_v28, %v598_v34  ;;  %v402_v41 = vmul.f32 %v959_v35, %v1109_v0  ;;  %v960_v42 = vunpack.c.h.bf16 %v1006_v25  ;;  %v963_v43 = vunpack.c.l.bf16 %v1007_v32 }
  0x5e   : > { %727 = vst.msk [vmem:[%s1140_s27 + $0x188] sm:$0xff] %vm677_vm0, %v662_v40  ;;  %v663_v45 = vsel %vm535_vm6, %v471_v30, %v599_v37  ;;  %vm536_vm7 = vcmp.ge.f32.partialorder %v472_v38, 0.0  ;;  %v600_v46 = vmul.f32 0.01, %v472_v38  ;;  %v964_v47 = vunpack.c.h.bf16 %v1007_v32 }
  0x5f   : > { %728 = vst.msk [vmem:[%s1140_s27 + $0x190] sm:$0xff] %vm677_vm0, %v663_v45  ;;  %v473_v48 = vadd.f32 %v1118_v9, %v402_v41  ;;  %v403_v49 = vmul.f32 %v960_v42, %v1109_v0  ;;  %v404_v50 = vmul.f32 %v963_v43, %v1109_v0  ;;  %v967_v51 = vunpack.c.l.bf16 %v1008_v39 }
  0x60   : > { %v664_v52 = vsel %vm536_vm7, %v472_v38, %v600_v46  ;;  %v405_v53 = vmul.f32 %v964_v47, %v1109_v0  ;;  %v968_v54 = vunpack.c.h.bf16 %v1008_v39  ;;  %v971_v55 = vunpack.c.l.bf16 %v1009_v44 }
  0x61   : > { %729 = vst.msk [vmem:[%s1140_s27 + $0x198] sm:$0xff] %vm677_vm0, %v664_v52  ;;  %vm537_vm8 = vcmp.ge.f32.partialorder %v473_v48, 0.0  ;;  %v601_v56 = vmul.f32 0.01, %v473_v48  ;;  %v474_v57 = vadd.f32 %v1118_v9, %v403_v49  ;;  %v475_v58 = vadd.f32 %v1118_v9, %v404_v50 }
  0x62   : > { %v476_v59 = vadd.f32 %v1118_v9, %v405_v53  ;;  %v406_v60 = vmul.f32 %v967_v51, %v1109_v0  ;;  %v407_v61 = vmul.f32 %v968_v54, %v1109_v0  ;;  %v408_v62 = vmul.f32 %v971_v55, %v1109_v0 }
  0x63   : > { %v665_v63 = vsel %vm537_vm8, %v473_v48, %v601_v56  ;;  %vm538_vm9 = vcmp.ge.f32.partialorder %v474_v57, 0.0  ;;  %v602_v1 = vmul.f32 0.01, %v474_v57  ;;  %vm539_vm10 = vcmp.ge.f32.partialorder %v475_v58, 0.0 }
  0x64   : > { %730 = vst.msk [vmem:[%s1140_s27 + $0x1a0] sm:$0xff] %vm677_vm0, %v665_v63  ;;  %v603_v2 = vmul.f32 0.01, %v475_v58  ;;  %vm540_vm11 = vcmp.ge.f32.partialorder %v476_v59, 0.0  ;;  %v604_v3 = vmul.f32 0.01, %v476_v59  ;;  %v477_v4 = vadd.f32 %v1118_v9, %v406_v60 }
  0x65   : > { %v666_v5 = vsel %vm538_vm9, %v474_v57, %v602_v1  ;;  %v478_v6 = vadd.f32 %v1118_v9, %v407_v61  ;;  %v479_v7 = vadd.f32 %v1118_v9, %v408_v62  ;;  %v972_v8 = vunpack.c.h.bf16 %v1009_v44 }
  0x66   : > { %731 = vst.msk [vmem:[%s1140_s27 + $0x1a8] sm:$0xff] %vm677_vm0, %v666_v5  ;;  %v667_v11 = vsel %vm539_vm10, %v475_v58, %v603_v2  ;;  %v668_v12 = vsel %vm540_vm11, %v476_v59, %v604_v3  ;;  %vm541_vm12 = vcmp.ge.f32.partialorder %v477_v4, 0.0  ;;  %v605_v13 = vmul.f32 0.01, %v477_v4 }
  0x67   : > { %732 = vst.msk [vmem:[%s1140_s27 + $0x1b0] sm:$0xff] %vm677_vm0, %v667_v11  ;;  %733 = vst.msk [vmem:[%s1140_s27 + $0x1b8] sm:$0xff] %vm677_vm0, %v668_v12  ;;  %vm542_vm13 = vcmp.ge.f32.partialorder %v478_v6, 0.0  ;;  %v606_v15 = vmul.f32 0.01, %v478_v6  ;;  %vm543_vm14 = vcmp.ge.f32.partialorder %v479_v7, 0.0  ;;  %v409_v18 = vmul.f32 %v972_v8, %v1109_v0 }
  0x68   : > { %v607_v16 = vmul.f32 0.01, %v479_v7  ;;  %v669_v17 = vsel %vm541_vm12, %v477_v4, %v605_v13  ;;  %v975_v19 = vunpack.c.l.bf16 %v1010_v10  ;;  %v976_v20 = vunpack.c.h.bf16 %v1010_v10 }
  0x69   : > { %734 = vst.msk [vmem:[%s1140_s27 + $0x1c0] sm:$0xff] %vm677_vm0, %v669_v17  ;;  %v670_v21 = vsel %vm542_vm13, %v478_v6, %v606_v15  ;;  %v979_v23 = vunpack.c.l.bf16 %v1011_v14  ;;  %v980_v24 = vunpack.c.h.bf16 %v1011_v14  ;;  %v480_v25 = vadd.f32 %v1118_v9, %v409_v18 }
  0x6a   : > { %v671_v22 = vsel %vm543_vm14, %v479_v7, %v607_v16  ;;  %735 = vst.msk [vmem:[%s1140_s27 + $0x1c8] sm:$0xff] %vm677_vm0, %v670_v21  ;;  %v410_v26 = vmul.f32 %v975_v19, %v1109_v0  ;;  %v411_v27 = vmul.f32 %v976_v20, %v1109_v0 }
  0x6b   : > { %736 = vst.msk [vmem:[%s1140_s27 + $0x1d0] sm:$0xff] %vm677_vm0, %v671_v22  ;;  %v412_v28 = vmul.f32 %v979_v23, %v1109_v0  ;;  %v413_v29 = vmul.f32 %v980_v24, %v1109_v0  ;;  %vm544_vm15 = vcmp.ge.f32.partialorder %v480_v25, 0.0  ;;  %v608_v30 = vmul.f32 0.01, %v480_v25 }
  0x6c   : > { %v481_v31 = vadd.f32 %v1118_v9, %v410_v26  ;;  %v482_v32 = vadd.f32 %v1118_v9, %v411_v27 }
  0x6d   : > { %v483_v33 = vadd.f32 %v1118_v9, %v412_v28  ;;  %v484_v34 = vadd.f32 %v1118_v9, %v413_v29  ;;  %v672_v35 = vsel %vm544_vm15, %v480_v25, %v608_v30 }
  0x6e   : > { %vm545_vm1 = vcmp.ge.f32.partialorder %v481_v31, 0.0  ;;  %v609_v36 = vmul.f32 0.01, %v481_v31  ;;  %vm546_vm2 = vcmp.ge.f32.partialorder %v482_v32, 0.0  ;;  %737 = vst.msk [vmem:[%s1140_s27 + $0x1d8] sm:$0xff] %vm677_vm0, %v672_v35 }
  0x6f   : > { %v610_v0 = vmul.f32 0.01, %v482_v32  ;;  %vm547_vm3 = vcmp.ge.f32.partialorder %v483_v33, 0.0  ;;  %v611_v37 = vmul.f32 0.01, %v483_v33  ;;  %vm548_vm4 = vcmp.ge.f32.partialorder %v484_v34, 0.0 }
  0x70   : > { %v673_v38 = vsel %vm545_vm1, %v481_v31, %v609_v36  ;;  %v612_v39 = vmul.f32 0.01, %v484_v34 }
  0x71   : > { %738 = vst.msk [vmem:[%s1140_s27 + $0x1e0] sm:$0xff] %vm677_vm0, %v673_v38  ;;  %v674_v40 = vsel %vm546_vm2, %v482_v32, %v610_v0  ;;  %v675_v41 = vsel %vm547_vm3, %v483_v33, %v611_v37 }
  0x72   : > { %739 = vst.msk [vmem:[%s1140_s27 + $0x1e8] sm:$0xff] %vm677_vm0, %v674_v40  ;;  %740 = vst.msk [vmem:[%s1140_s27 + $0x1f0] sm:$0xff] %vm677_vm0, %v675_v41  ;;  %v676_v9 = vsel %vm548_vm4, %v484_v34, %v612_v39 }
  0x73   : > { %741 = vst.msk [vmem:[%s1140_s27 + $0x1f8] sm:$0xff] %vm677_vm0, %v676_v9 }
  0x74 PF: > { %s13_s14 = sadd.s32 1, %s1058_s14   ;;  %s1423_s12 = smov %s1054_s13 }
  0x75   : > { %p10_p5 = scmp.ge.s32.totalorder %s13_s14, 4   ;;  %s1424_s13 = smov %s1426_s15 }
  0x77   :  { %12 = sbr.rel (!%p10_p5) target bundleno = 2 (0x2), region = 62 }

// kernel: transposed_conv_layer.2
= control target key start
LH: loop header
LB: loop body
LE: loop exit
PB: predicated region body
PF: predicated region fallthrough
CT: control target
= control target key end

     0   :  { %s7211_s15 = smov 0   ;;  %s7213_s16 = smov 0   ;;  %s10120_s0 = inlined_call_operand.vmem [shape: bf16[2,18,18,4], index: 0, kind: input, shape index: {}]   ;;  %s10121_s1 = inlined_call_operand.vmem [shape: bf16[16,4,8], index: 1, kind: input, shape index: {}]   ;;  %s10122_s2 = inlined_call_operand.vmem [shape: bf16[2,32,16,16], index: 2, kind: output, shape index: {0}]   ;;  %s10123_s3 = inlined_call_operand.vmem [shape: f32[2,1,8], index: 3, kind: output, shape index: {1}]   ;;  %s10124_s4 = inlined_call_operand.vmem [shape: f32[2,1,8], index: 4, kind: output, shape index: {2}]  }
   0x1   :  { %s7215_s17 = smov 0  }
   0x2 LB: > { %s27_s18 = sadd.s32 1, %s7178_s16  ;;  %p5641_p0 = scmp.ge.s32.totalorder %s7182_s17, 1  ;;  %s7182_s17 = sphi %s7215_s17, %s15_s17   ;;  %s7178_s16 = sphi %s7213_s16, %s10661_s16   ;;  %s7174_s15 = sphi %s7211_s15, %s10660_s15  }
   0x3   : > { %p29_p1 = scmp.ge.s32.totalorder %s27_s18, 2  ;;  %p181_p2 = scmp.lt.s32.totalorder %s7182_s17, 3 }
   0x5   : > { %s10663_s18 = smov (%p29_p1, %s27_s18), 0  ;;  %p182_p3 = pnand %p5641_p0, %p181_p2 }
   0x7   : > { %185 = sbr.rel (%p182_p3) target bundleno = 872 (0x368), region = 28 }
   0xc   : > { %v306_v0 = vld [vmem:[%s10121_s1] sm:$0x3]  ;;  %vm793_vm0 = vcmask 1041408   ;;  %v5645_v1 = vld [vmem:[%s10121_s1 + $0x2] sm:$0x3]  ;;  %p218_p4 = scmp.lt.s32.totalorder %s7174_s15, 1 }
   0xd   : > { %6936 = vmatprep.subr.msk.bf16.mxu1 %vm793_vm0, %v306_v0  ;;  %v1087_v2 = vsel %vm793_vm0, %v306_v0, 0  ;;  %6935 = vmatprep.subr.msk.bf16.mxu0 %vm793_vm0, %v5645_v1  ;;  %v795_v3 = vsel %vm793_vm0, %v5645_v1, 0  ;;  %v5710_v4 = vld [vmem:[%s10121_s1 + $0x4] sm:$0x3]  ;;  %v5728_v5 = vld [vmem:[%s10121_s1 + $0x6] sm:$0x3] }
   0xe   : > { %6426 = vmatpush3.bf16.msra.mxu1 %v1087_v2  ;;  %s10665_s15 = smov (!%p218_p4, %s7174_s15), 1  ;;  %6392 = vmatpush3.bf16.msra.mxu0 %v795_v3  ;;  %vm744_vm1 = vcmask 31744   ;;  %vm307_vm2 = vsmask.f32 3328  ;;  %vm308_vm3 = vsmask.f32 7440 }
   0xf   : > { %6937 = vmatprep.subr.msk.bf16.mxu0 %vm793_vm0, %v5710_v4  ;;  %s6951_s27 = smul.u32 216, %s10665_s15  ;;  %6938 = vmatprep.subr.msk.bf16.mxu1 %vm793_vm0, %v5728_v5  ;;  %v1489_v19 = vsel %vm793_vm0, %v5728_v5, 0  ;;  %v7285_v20 = vld [vmem:[%s10121_s1 + $0x8] sm:$0x3]  ;;  %vm7299_vm4 = vmor %vm307_vm2, %vm308_vm3  ;;  %v10297_v34 = vmov 0  ;;  %v1261_v37 = vsel %vm793_vm0, %v5710_v4, 0  ;;  %s9554_s14 = scalar_lea.vmem %s10123_s3, %s10665_s15 }
  0x10   : > { %v10298_v34 = vsel %vm7299_vm4, 4294967295, %v10297_v34  ;;  %vm1875_vm5 = vcmask 1042432   ;;  %vm1876_vm6 = vcmask 1046532   ;;  %vm1684_vm8 = vcmask 64512   ;;  %s7184_s8 = smov 8   ;;  %s9560_s21 = scalar_lea.vmem %s10124_s4, %s10665_s15 }
  0x11   : > { %s7253_s30 = scalar_lea.vmem %s10120_s0, %s6951_s27  ;;  %10299 = vst [vmem:[#allocation2_spill] sm:$0xff] %v10298_v34  ;;  %vm7721_vm7 = vmor %vm1875_vm5, %vm1876_vm6  ;;  %vm5426_vm9 = vcmask 125952   ;;  %vm245_vm10 = vcmask 57344  }
  0x12   : > { %v7256_v6 = vld [vmem:[%s7253_s30] sm:$0xf]  ;;  %v7259_v7 = vld [vmem:[%s7253_s30 + $0x4] sm:$0xf]  ;;  %v7262_v8 = vld [vmem:[%s7253_s30 + $0xc] sm:$0xf] }
  0x13   : > { %v311_v9 = vshrl.u32 %v7256_v6, 16  ;;  %v314_v10 = vshll.u32 %v7256_v6, 16  ;;  %v5678_v11 = vcombine.low %v7256_v6, %v7259_v7  ;;  %v7269_v12 = vld [vmem:[%s7253_s30 + $0x10] sm:$0xf]  ;;  %v324_v13 = vshrl.u32 %v7259_v7, 16 }
  0x14   : > { %v335_v14 = vshrl.u32 %v7262_v8, 16  ;;  %v338_v15 = vshll.u32 %v7262_v8, 16  ;;  %v344_v16 = vshll.u32 %v7269_v12, 16  ;;  %v348_v17 = vshrl.u32 %v7269_v12, 16  ;;  %v7288_v23 = vld [vmem:[%s7253_s30 + $0x8] sm:$0x1] }
  0x15   : > { %6427 = vmatprep.mubr.msk.bf16.mxu1 %vm744_vm1, %v5678_v11  ;;  %v7279_v18 = vcombine.low %v7262_v8, %v7269_v12  ;;  %v7291_v24 = vld [vmem:[%s7253_s30 + $0x14] sm:$0x1]  ;;  %v313_v27 = vrot.slane %v311_v9, 4  ;;  %v316_v28 = vrot.slane %v314_v10, 5  ;;  %v258_v29 = vld [vmem:[%s7253_s30 + $0x18] sm:$0xf] }
  0x16   : > { %v337_v21 = vrot.slane %v335_v14, 4  ;;  %v340_v22 = vrot.slane %v338_v15, 5  ;;  %v346_v25 = vrot.slane %v344_v16, 5  ;;  %v350_v26 = vrot.slane %v348_v17, 4  ;;  %v7309_v41 = vld [vmem:[%s7253_s30 + $0x1c] sm:$0xf] }
  0x17   : > { %6428 = vmatmul.mubr.msk.bf16.vlgmr.msra.gmra.mxu1 %vm744_vm1, %v7279_v18  ;;  %v320_v31 = vshll.u32 %v7259_v7, 16  ;;  %v326_v32 = vrot.slane %v324_v13, 4  ;;  %v317_v35 = vor.u32 %v316_v28, %v313_v27  ;;  %v330_v36 = vshll.u32 %v7288_v23, 16  ;;  %10300 = vst [vmem:[#allocation3_spill] sm:$0xff] %v7309_v41  ;;  %v7312_v46 = vld [vmem:[%s7253_s30 + $0x20] sm:$0x1] }
  0x18   : > { %v341_v30 = vor.u32 %v340_v22, %v337_v21  ;;  %6494 = vmatpush3.bf16.msra.mxu1 %v1489_v19  ;;  %v351_v33 = vor.u32 %v350_v26, %v346_v25  ;;  %v354_v40 = vshll.u32 %v7291_v24, 16  ;;  %v359_v42 = vshrl.u32 %v258_v29, 16  ;;  %10301 = vst [vmem:[#allocation4_spill] sm:$0xff] %v7312_v46  ;;  %v7321_v56 = vld [vmem:[%s7253_s30 + $0x24] sm:$0xf] }
  0x19   : > { %6940 = vmatprep.subr.msk.bf16.mxu1 %vm793_vm0, %v7285_v20  ;;  %v322_v39 = vrot.slane %v320_v31, 5  ;;  %v318_v44 = vrot.slane %v317_v35, 4  ;;  %v332_v45 = vrot.slane %v330_v36, 5  ;;  %v362_v47 = vshll.u32 %v258_v29, 16  ;;  %10302 = vst [vmem:[#allocation5_spill] sm:$0xff] %v7321_v56 }
  0x1a   : > { %v342_v38 = vrot.slane %v341_v30, 4  ;;  %v352_v43 = vrot.slane %v351_v33, 4  ;;  %v356_v50 = vrot.slane %v354_v40, 5  ;;  %v361_v51 = vrot.slane %v359_v42, 4  ;;  %v7330_v61 = vld [vmem:[%s7253_s30 + $0x28] sm:$0xf] }
  0x1b   : > { %v327_v48 = vor.u32 %v326_v32, %v322_v39  ;;  %v323_v52 = vsel %vm7299_vm4, %v318_v44, %v322_v39  ;;  %v364_v53 = vrot.slane %v362_v47, 5  ;;  %v368_v54 = vshll.u32 %v7309_v41, 16  ;;  %10303 = vst [vmem:[#allocation6_spill] sm:$0xff] %v7330_v61  ;;  %v7335_v2 = vld [vmem:[%s7253_s30 + $0x2c] sm:$0x1] }
  0x1c   : > { %v347_v49 = vsel %vm7299_vm4, %v342_v38, %v346_v25  ;;  %v372_v55 = vshrl.u32 %v7309_v41, 16  ;;  %v357_v58 = vsel %vm7299_vm4, %v352_v43, %v356_v50  ;;  %v378_v59 = vshll.u32 %v7312_v46, 16  ;;  %10305 = vst [vmem:[#allocation8_spill] sm:$0xff] %v7335_v2  ;;  %v7347_v15 = vld [vmem:[%s7253_s30 + $0x30] sm:$0xf] }
  0x1d   : > { %v328_v57 = vrot.slane %v327_v48, 4  ;;  %v7327_v60 = vcombine.low %v258_v29, %v7309_v41  ;;  %v7332_v62 = vcombine.low %v347_v49, %v357_v58  ;;  %v365_v63 = vor.u32 %v364_v53, %v361_v51  ;;  %10307 = vst [vmem:[#allocation10_spill] sm:$0xff] %v7347_v15  ;;  %v7352_v22 = vld [vmem:[%s7253_s30 + $0x34] sm:$0xf]  ;;  %v7365_v29 = vld [vmem:[%s10121_s1 + $0xa] sm:$0x3] }
  0x1e   : > { %v370_v0 = vrot.slane %v368_v54, 5  ;;  %v374_v1 = vrot.slane %v372_v55, 4  ;;  %v380_v4 = vrot.slane %v378_v59, 5  ;;  %v383_v5 = vshrl.u32 %v7321_v56, 16  ;;  %10308 = vst [vmem:[#allocation11_spill] sm:$0xff] %v7352_v22 }
  0x1f   : > { %10304 = vst [vmem:[#allocation7_spill] sm:$0xff] %v7332_v62  ;;  %v333_v3 = vsel %vm7299_vm4, %v328_v57, %v332_v45  ;;  %6431 = vmatprep.mubr.msk.bf16.mxu1 %vm744_vm1, %v7327_v60  ;;  %v386_v9 = vshll.u32 %v7321_v56, 16  ;;  %v366_v11 = vrot.slane %v365_v63, 4  ;;  %v392_v14 = vshll.u32 %v7330_v61, 16  ;;  %v7370_v33 = vld [vmem:[%s7253_s30 + $0x38] sm:$0x1] }
  0x20   : > { %v7343_v10 = vcombine.low %v323_v52, %v333_v3  ;;  %v375_v13 = vor.u32 %v374_v1, %v370_v0  ;;  %v385_v16 = vrot.slane %v383_v5, 4  ;;  %v396_v19 = vshrl.u32 %v7330_v61, 16  ;;  %10310 = vst [vmem:[#allocation13_spill] sm:$0xff] %v7370_v33  ;;  %v7381_v42 = vld [vmem:[%s7253_s30 + $0x3c] sm:$0xf] }
  0x21   : > { %v388_v17 = vrot.slane %v386_v9, 5  ;;  %v402_v21 = vshll.u32 %v7335_v2, 16  ;;  %v371_v25 = vsel %vm7299_vm4, %v366_v11, %v370_v0  ;;  %v394_v27 = vrot.slane %v392_v14, 5  ;;  %v7389_v51 = vld [vmem:[%s7253_s30 + $0x40] sm:$0xf] }
  0x22   : > { %10306 = vst [vmem:[#allocation9_spill] sm:$0xff] %v7343_v10  ;;  %6393 = vmatprep.mubr.msk.bf16.mxu0 %vm744_vm1, %v7343_v10  ;;  %v376_v26 = vrot.slane %v375_v13, 4  ;;  %v7360_v28 = vcombine.low %v7321_v56, %v7330_v61  ;;  %v398_v31 = vrot.slane %v396_v19, 4  ;;  %v407_v35 = vshrl.u32 %v7347_v15, 16  ;;  %v7401_v63 = vld [vmem:[%s7253_s30 + $0x44] sm:$0x1] }
  0x23   : > { %6394 = vmatmul.mubr.msk.bf16.vlgmr.msra.gmra.mxu0 %vm744_vm1, %v7332_v62  ;;  %v389_v30 = vor.u32 %v388_v17, %v385_v16  ;;  %v404_v32 = vrot.slane %v402_v21, 5  ;;  %v410_v38 = vshll.u32 %v7347_v15, 16  ;;  %v416_v39 = vshll.u32 %v7352_v22, 16  ;;  %v7411_v9 = vld [vmem:[%s7253_s30 + $0x48] sm:$0xf] }
  0x24   : > { %10309 = vst [vmem:[#allocation12_spill] sm:$0xff] %v7360_v28  ;;  %6460 = vmatpush3.bf16.msra.mxu0 %v1261_v37  ;;  %v381_v36 = vsel %vm7299_vm4, %v376_v26, %v380_v4  ;;  %6432 = vmatmul.mubr.msk.bf16.gmra.mxu1 %vm744_vm1, %v7360_v28  ;;  %v420_v40 = vshrl.u32 %v7352_v22, 16  ;;  %v399_v45 = vor.u32 %v398_v31, %v394_v27  ;;  %v409_v37 = vrot.slane %v407_v35, 4  ;;  %v7421_v26 = vld [vmem:[%s7253_s30 + $0x4c] sm:$0xf] }
  0x25   : > { %v7383_v43 = vcombine.low %v371_v25, %v381_v36  ;;  %v390_v44 = vrot.slane %v389_v30, 4  ;;  %6939 = vmatprep.subr.msk.bf16.mxu0 %vm793_vm0, %v7365_v29  ;;  %v412_v47 = vrot.slane %v410_v38, 5  ;;  %v418_v48 = vrot.slane %v416_v39, 5  ;;  %v7528_v2 = vld [vmem:[%s7253_s30 + $0x7c] sm:$0xf] }
  0x26   : > { %v422_v49 = vrot.slane %v420_v40, 4  ;;  %v426_v50 = vshll.u32 %v7370_v33, 16  ;;  %v400_v53 = vrot.slane %v399_v45, 4  ;;  %v7397_v54 = vcombine.low %v7347_v15, %v7352_v22  ;;  %v7523_v33 = vld [vmem:[%s7253_s30 + $0x78] sm:$0xf] }
  0x27   : > { %10311 = vst [vmem:[#allocation14_spill] sm:$0xff] %v7383_v43  ;;  %v395_v52 = vsel %vm7299_vm4, %v390_v44, %v394_v27  ;;  %6397 = vmatprep.mubr.msk.bf16.mxu0 %vm744_vm1, %v7383_v43  ;;  %v431_v55 = vshrl.u32 %v7381_v42, 16  ;;  %v413_v57 = vor.u32 %v412_v47, %v409_v37  ;;  %v434_v0 = vshll.u32 %v7381_v42, 16  ;;  %v7439_v44 = vld [vmem:[%s7253_s30 + $0x54] sm:$0xf] }
  0x28   : > { %10312 = vst [vmem:[#allocation15_spill] sm:$0xff] %v7397_v54  ;;  %v423_v58 = vor.u32 %v422_v49, %v418_v48  ;;  %v428_v59 = vrot.slane %v426_v50, 5  ;;  %v405_v1 = vsel %vm7299_vm4, %v400_v53, %v404_v32  ;;  %6435 = vmatprep.mubr.msk.bf16.mxu1 %vm744_vm1, %v7397_v54  ;;  %v440_v4 = vshll.u32 %v7389_v51, 16  ;;  %v7430_v32 = vld [vmem:[%s7253_s30 + $0x50] sm:$0x1] }
  0x29   : > { %v433_v3 = vrot.slane %v431_v55, 4  ;;  %v444_v5 = vshrl.u32 %v7389_v51, 16  ;;  %v7413_v11 = vcombine.low %v395_v52, %v405_v1  ;;  %v414_v13 = vrot.slane %v413_v57, 4  ;;  %v7451_v55 = vld [vmem:[%s7253_s30 + $0x58] sm:$0xf] }
  0x2a   : > { %v424_v14 = vrot.slane %v423_v58, 4  ;;  %v436_v16 = vrot.slane %v434_v0, 5  ;;  %v442_v17 = vrot.slane %v440_v4, 5  ;;  %v450_v21 = vshll.u32 %v7401_v63, 16  ;;  %v7456_v0 = vld [vmem:[%s7253_s30 + $0x5c] sm:$0x1] }
  0x2b   : > { %10313 = vst [vmem:[#allocation16_spill] sm:$0xff] %v7413_v11  ;;  %v446_v19 = vrot.slane %v444_v5, 4  ;;  %v7418_v25 = vcombine.low %v7381_v42, %v7389_v51  ;;  %6398 = vmatmul.mubr.msk.bf16.gmra.mxu0 %vm744_vm1, %v7413_v11  ;;  %v419_v27 = vsel %vm7299_vm4, %v414_v13, %v418_v48  ;;  %v455_v35 = vshrl.u32 %v7411_v9, 16 }
  0x2c   : > { %v429_v30 = vsel %vm7299_vm4, %v424_v14, %v428_v59  ;;  %v437_v31 = vor.u32 %v436_v16, %v433_v3  ;;  %v452_v39 = vrot.slane %v450_v21, 5  ;;  %v458_v40 = vshll.u32 %v7411_v9, 16  ;;  %v7465_v14 = vld [vmem:[%s7253_s30 + $0x60] sm:$0xf] }
  0x2d   : > { %10314 = vst [vmem:[#allocation17_spill] sm:$0xff] %v7418_v25  ;;  %v7433_v36 = vcombine.low %v419_v27, %v429_v30  ;;  %v447_v38 = vor.u32 %v446_v19, %v442_v17  ;;  %6436 = vmatmul.mubr.msk.bf16.gmra.mxu1 %vm744_vm1, %v7418_v25  ;;  %v457_v37 = vrot.slane %v455_v35, 4  ;;  %v464_v47 = vshll.u32 %v7421_v26, 16 }
  0x2e   : > { %v438_v45 = vrot.slane %v437_v31, 4  ;;  %v468_v48 = vshrl.u32 %v7421_v26, 16  ;;  %v460_v50 = vrot.slane %v458_v40, 5  ;;  %v474_v52 = vshll.u32 %v7430_v32, 16 }
  0x2f   : > { %10315 = vst [vmem:[#allocation18_spill] sm:$0xff] %v7433_v36  ;;  %v448_v49 = vrot.slane %v447_v38, 4  ;;  %6401 = vmatprep.mubr.msk.bf16.mxu0 %vm744_vm1, %v7433_v36  ;;  %v7448_v53 = vcombine.low %v7411_v9, %v7421_v26  ;;  %v466_v58 = vrot.slane %v464_v47, 5  ;;  %v479_v1 = vshrl.u32 %v7439_v44, 16  ;;  %v7473_v38 = vld [vmem:[%s7253_s30 + $0x64] sm:$0xf] }
  0x30   : > { %v443_v57 = vsel %vm7299_vm4, %v438_v45, %v442_v17  ;;  %v470_v59 = vrot.slane %v468_v48, 4  ;;  %v461_v4 = vor.u32 %v460_v50, %v457_v37  ;;  %v476_v5 = vrot.slane %v474_v52, 5  ;;  %v7485_v52 = vld [vmem:[%s7253_s30 + $0x68] sm:$0x1] }
  0x31   : > { %10316 = vst [vmem:[#allocation19_spill] sm:$0xff] %v7448_v53  ;;  %v453_v3 = vsel %vm7299_vm4, %v448_v49, %v452_v39  ;;  %6439 = vmatprep.mubr.msk.bf16.mxu1 %vm744_vm1, %v7448_v53  ;;  %v482_v13 = vshll.u32 %v7439_v44, 16  ;;  %v481_v19 = vrot.slane %v479_v1, 4  ;;  %v488_v21 = vshll.u32 %v7451_v55, 16 }
  0x32   : > { %v7467_v16 = vcombine.low %v443_v57, %v453_v3  ;;  %v471_v17 = vor.u32 %v470_v59, %v466_v58  ;;  %v462_v27 = vrot.slane %v461_v4, 4  ;;  %v492_v31 = vshrl.u32 %v7451_v55, 16  ;;  %v7494_v4 = vld [vmem:[%s7253_s30 + $0x6c] sm:$0xf] }
  0x33   : > { %v484_v30 = vrot.slane %v482_v13, 5  ;;  %v498_v35 = vshll.u32 %v7456_v0, 16  ;;  %v490_v40 = vrot.slane %v488_v21, 5  ;;  %v7479_v45 = vcombine.low %v7439_v44, %v7451_v55  ;;  %v7500_v21 = vld [vmem:[%s7253_s30 + $0x70] sm:$0xf] }
  0x34   : > { %10317 = vst [vmem:[#allocation20_spill] sm:$0xff] %v7467_v16  ;;  %6402 = vmatmul.mubr.msk.bf16.gmra.mxu0 %vm744_vm1, %v7467_v16  ;;  %v472_v39 = vrot.slane %v471_v17, 4  ;;  %v503_v37 = vshrl.u32 %v7465_v14, 16  ;;  %v467_v47 = vsel %vm7299_vm4, %v462_v27, %v466_v58  ;;  %v494_v49 = vrot.slane %v492_v31, 4 }
  0x35   : > { %10318 = vst [vmem:[#allocation21_spill] sm:$0xff] %v7479_v45  ;;  %v485_v48 = vor.u32 %v484_v30, %v481_v19  ;;  %v500_v50 = vrot.slane %v498_v35, 5  ;;  %6440 = vmatmul.mubr.msk.bf16.gmra.mxu1 %vm744_vm1, %v7479_v45  ;;  %v506_v1 = vshll.u32 %v7465_v14, 16  ;;  %v512_v3 = vshll.u32 %v7473_v38, 16 }
  0x36   : > { %v477_v57 = vsel %vm7299_vm4, %v472_v39, %v476_v5  ;;  %v505_v59 = vrot.slane %v503_v37, 4  ;;  %v495_v17 = vor.u32 %v494_v49, %v490_v40  ;;  %v516_v19 = vshrl.u32 %v7473_v38, 16 }
  0x37   : > { %v7496_v13 = vcombine.low %v467_v47, %v477_v57  ;;  %v486_v58 = vrot.slane %v485_v48, 4  ;;  %v508_v5 = vrot.slane %v506_v1, 5  ;;  %v514_v27 = vrot.slane %v512_v3, 5  ;;  %v7515_v57 = vld [vmem:[%s7253_s30 + $0x74] sm:$0x1] }
  0x38   : > { %v522_v30 = vshll.u32 %v7485_v52, 16  ;;  %v7505_v31 = vcombine.low %v7465_v14, %v7473_v38  ;;  %v496_v39 = vrot.slane %v495_v17, 4  ;;  %v518_v37 = vrot.slane %v516_v19, 4 }
  0x39   : > { %10319 = vst [vmem:[#allocation22_spill] sm:$0xff] %v7496_v13  ;;  %v491_v35 = vsel %vm7299_vm4, %v486_v58, %v490_v40  ;;  %6405 = vmatprep.mubr.msk.bf16.mxu0 %vm744_vm1, %v7496_v13  ;;  %v527_v47 = vshrl.u32 %v7494_v4, 16  ;;  %v509_v48 = vor.u32 %v508_v5, %v505_v59  ;;  %v530_v1 = vshll.u32 %v7494_v4, 16 }
  0x3a   : > { %10320 = vst [vmem:[#allocation23_spill] sm:$0xff] %v7505_v31  ;;  %v524_v49 = vrot.slane %v522_v30, 5  ;;  %6443 = vmatprep.mubr.msk.bf16.mxu1 %vm744_vm1, %v7505_v31  ;;  %v536_v3 = vshll.u32 %v7500_v21, 16  ;;  %v501_v40 = vsel %vm7299_vm4, %v496_v39, %v500_v50  ;;  %v519_v58 = vor.u32 %v518_v37, %v514_v27  ;;  %v7540_v37 = vld [vmem:[%s7253_s30 + $0x80] sm:$0x1] }
  0x3b   : > { %v529_v17 = vrot.slane %v527_v47, 4  ;;  %v540_v19 = vshrl.u32 %v7500_v21, 16  ;;  %v7525_v59 = vcombine.low %v491_v35, %v501_v40  ;;  %v510_v5 = vrot.slane %v509_v48, 4 }
  0x3c   : > { %v532_v30 = vrot.slane %v530_v1, 5  ;;  %v538_v15 = vrot.slane %v536_v3, 5  ;;  %v520_v56 = vrot.slane %v519_v58, 4  ;;  %v546_v61 = vshll.u32 %v7515_v57, 16 }
  0x3d   : > { %10321 = vst [vmem:[#allocation24_spill] sm:$0xff] %v7525_v59  ;;  %v542_v22 = vrot.slane %v540_v19, 4  ;;  %v7533_v50 = vcombine.low %v7494_v4, %v7500_v21  ;;  %6406 = vmatmul.mubr.msk.bf16.gmra.mxu0 %vm744_vm1, %v7525_v59  ;;  %v515_v35 = vsel %vm7299_vm4, %v510_v5, %v514_v27  ;;  %v551_v47 = vshrl.u32 %v7523_v33, 16  ;;  %v7550_v27 = vld [vmem:[%s7253_s30 + $0x84] sm:$0xf] }
  0x3e   : > { %v533_v39 = vor.u32 %v532_v30, %v529_v17  ;;  %v554_v48 = vshll.u32 %v7523_v33, 16  ;;  %v525_v1 = vsel %vm7299_vm4, %v520_v56, %v524_v49  ;;  %v548_v40 = vrot.slane %v546_v61, 5 }
  0x3f   : > { %10322 = vst [vmem:[#allocation25_spill] sm:$0xff] %v7533_v50  ;;  %v543_v3 = vor.u32 %v542_v22, %v538_v15  ;;  %6444 = vmatmul.mubr.msk.bf16.gmra.mxu1 %vm744_vm1, %v7533_v50  ;;  %v560_v58 = vshll.u32 %v7528_v2, 16  ;;  %v7552_v17 = vcombine.low %v515_v35, %v525_v1  ;;  %v553_v5 = vrot.slane %v551_v47, 4  ;;  %v7557_v22 = vld [vmem:[%s7253_s30 + $0x88] sm:$0xf] }
  0x40   : > { %v534_v19 = vrot.slane %v533_v39, 4  ;;  %v556_v30 = vrot.slane %v554_v48, 5  ;;  %v564_v56 = vshrl.u32 %v7528_v2, 16  ;;  %v570_v61 = vshll.u32 %v7540_v37, 16  ;;  %v7568_v47 = vld [vmem:[%s7253_s30 + $0x8c] sm:$0x1] }
  0x41   : > { %10323 = vst [vmem:[#allocation26_spill] sm:$0xff] %v7552_v17  ;;  %v544_v46 = vrot.slane %v543_v3, 4  ;;  %v562_v41 = vrot.slane %v560_v58, 5  ;;  %6409 = vmatprep.mubr.msk.bf16.mxu0 %vm744_vm1, %v7552_v17  ;;  %v7565_v39 = vcombine.low %v7523_v33, %v7528_v2  ;;  %10325 = vst [vmem:[#allocation28_spill] sm:$0xff] %v7568_v47  ;;  %v575_v48 = vshrl.u32 %v7550_v27, 16 }
  0x42   : > { %v539_v49 = vsel %vm7299_vm4, %v534_v19, %v538_v15  ;;  %v557_v35 = vor.u32 %v556_v30, %v553_v5  ;;  %v566_v3 = vrot.slane %v564_v56, 4  ;;  %v572_v58 = vrot.slane %v570_v61, 5  ;;  %v7575_v19 = vld [vmem:[%s7253_s30 + $0x90] sm:$0xf]  ;;  %v7585_v56 = vld [vmem:[%s7253_s30 + $0x94] sm:$0xf] }
  0x43   : > { %10324 = vst [vmem:[#allocation27_spill] sm:$0xff] %v7565_v39  ;;  %v549_v1 = vsel %vm7299_vm4, %v544_v46, %v548_v40  ;;  %v578_v15 = vshll.u32 %v7550_v27, 16  ;;  %6447 = vmatprep.mubr.msk.bf16.mxu1 %vm744_vm1, %v7565_v39  ;;  %v577_v10 = vrot.slane %v575_v48, 4  ;;  %v584_v50 = vshll.u32 %v7557_v22, 16  ;;  %10327 = vst [vmem:[#allocation30_spill] sm:$0xff] %v7585_v56 }
  0x44   : > { %v7577_v5 = vcombine.low %v539_v49, %v549_v1  ;;  %v558_v30 = vrot.slane %v557_v35, 4  ;;  %v567_v31 = vor.u32 %v566_v3, %v562_v41  ;;  %v588_v46 = vshrl.u32 %v7557_v22, 16  ;;  %v7596_v48 = vld [vmem:[%s7253_s30 + $0x98] sm:$0x1] }
  0x45   : > { %v580_v45 = vrot.slane %v578_v15, 5  ;;  %v594_v40 = vshll.u32 %v7568_v47, 16  ;;  %v586_v49 = vrot.slane %v584_v50, 5  ;;  %v7593_v35 = vcombine.low %v7550_v27, %v7557_v22  ;;  %10329 = vst [vmem:[#allocation32_spill] sm:$0xff] %v7596_v48  ;;  %v7616_v47 = vld [vmem:[%s7253_s30 + $0xa4] sm:$0x1] }
  0x46   : > { %10326 = vst [vmem:[#allocation29_spill] sm:$0xff] %v7577_v5  ;;  %6410 = vmatmul.mubr.msk.bf16.gmra.mxu0 %vm744_vm1, %v7577_v5  ;;  %v563_v61 = vsel %vm7299_vm4, %v558_v30, %v562_v41  ;;  %v599_v1 = vshrl.u32 %v7575_v19, 16  ;;  %v568_v3 = vrot.slane %v567_v31, 4  ;;  %v590_v39 = vrot.slane %v588_v46, 4  ;;  %v7611_v31 = vld [vmem:[%s7253_s30 + $0xa0] sm:$0xf] }
  0x47   : > { %10328 = vst [vmem:[#allocation31_spill] sm:$0xff] %v7593_v35  ;;  %v581_v15 = vor.u32 %v580_v45, %v577_v10  ;;  %v596_v17 = vrot.slane %v594_v40, 5  ;;  %6448 = vmatmul.mubr.msk.bf16.gmra.mxu1 %vm744_vm1, %v7593_v35  ;;  %v602_v50 = vshll.u32 %v7575_v19, 16  ;;  %v608_v30 = vshll.u32 %v7585_v56, 16  ;;  %v7608_v45 = vld [vmem:[%s7253_s30 + $0x9c] sm:$0xf] }
  0x48   : > { %v601_v41 = vrot.slane %v599_v1, 4  ;;  %v612_v5 = vshrl.u32 %v7585_v56, 16  ;;  %v573_v53 = vsel %vm7299_vm4, %v568_v3, %v572_v58  ;;  %v591_v25 = vor.u32 %v590_v39, %v586_v49  ;;  %10330 = vst [vmem:[#allocation33_spill] sm:$0xff] %v7608_v45  ;;  %10331 = vst [vmem:[#allocation34_spill] sm:$0xff] %v7611_v31 }
  0x49   : > { %v582_v59 = vrot.slane %v581_v15, 4  ;;  %v618_v10 = vshll.u32 %v7596_v48, 16  ;;  %v7613_v46 = vcombine.low %v563_v61, %v573_v53  ;;  %v604_v40 = vrot.slane %v602_v50, 5  ;;  %10333 = vst [vmem:[#allocation36_spill] sm:$0xff] %v7616_v47 }
  0x4a   : > { %v610_v1 = vrot.slane %v608_v30, 5  ;;  %v614_v35 = vrot.slane %v612_v5, 4  ;;  %v592_v58 = vrot.slane %v591_v25, 4  ;;  %v7622_v39 = vcombine.low %v7575_v19, %v7585_v56  ;;  %v7636_v30 = vld [vmem:[%s7253_s30 + $0xa8] sm:$0xf] }
  0x4b   : > { %10332 = vst [vmem:[#allocation35_spill] sm:$0xff] %v7613_v46  ;;  %v587_v13 = vsel %vm7299_vm4, %v582_v59, %v586_v49  ;;  %v620_v3 = vrot.slane %v618_v10, 5  ;;  %6413 = vmatprep.mubr.msk.bf16.mxu0 %vm744_vm1, %v7613_v46  ;;  %v605_v53 = vor.u32 %v604_v40, %v601_v41  ;;  %v623_v5 = vshrl.u32 %v7608_v45, 16  ;;  %10335 = vst [vmem:[#allocation38_spill] sm:$0xff] %v7636_v30  ;;  %v7641_v46 = vld [vmem:[%s7253_s30 + $0xac] sm:$0xf] }
  0x4c   : > { %10334 = vst [vmem:[#allocation37_spill] sm:$0xff] %v7622_v39  ;;  %v615_v61 = vor.u32 %v614_v35, %v610_v1  ;;  %v626_v15 = vshll.u32 %v7608_v45, 16  ;;  %v597_v59 = vsel %vm7299_vm4, %v592_v58, %v596_v17  ;;  %6451 = vmatprep.mubr.msk.bf16.mxu1 %vm744_vm1, %v7622_v39  ;;  %v632_v25 = vshll.u32 %v7611_v31, 16  ;;  %10337 = vst [vmem:[#allocation40_spill] sm:$0xff] %v7641_v46  ;;  %v7644_v56 = vld [vmem:[%s7253_s30 + $0xb0] sm:$0x1] }
  0x4d   : > { %v636_v49 = vshrl.u32 %v7611_v31, 16  ;;  %v642_v50 = vshll.u32 %v7616_v47, 16  ;;  %v7638_v35 = vcombine.low %v587_v13, %v597_v59  ;;  %v606_v41 = vrot.slane %v605_v53, 4  ;;  %10338 = vst [vmem:[#allocation41_spill] sm:$0xff] %v7644_v56 }
  0x4e   : > { %v616_v10 = vrot.slane %v615_v61, 4  ;;  %v625_v40 = vrot.slane %v623_v5, 4  ;;  %v628_v17 = vrot.slane %v626_v15, 5  ;;  %v634_v58 = vrot.slane %v632_v25, 5 }
  0x4f   : > { %10336 = vst [vmem:[#allocation39_spill] sm:$0xff] %v7638_v35  ;;  %v638_v48 = vrot.slane %v636_v49, 4  ;;  %v644_v39 = vrot.slane %v642_v50, 5  ;;  %6414 = vmatmul.mubr.msk.bf16.gmra.mxu0 %vm744_vm1, %v7638_v35  ;;  %v611_v47 = vsel %vm7299_vm4, %v606_v41, %v610_v1  ;;  %v7654_v53 = vcombine.low %v7608_v45, %v7611_v31  ;;  %v7661_v49 = vld [vmem:[%s7253_s30 + $0xb4] sm:$0xf] }
  0x50   : > { %v621_v13 = vsel %vm7299_vm4, %v616_v10, %v620_v3  ;;  %v647_v61 = vshrl.u32 %v7636_v30, 16  ;;  %v629_v15 = vor.u32 %v628_v17, %v625_v40  ;;  %v650_v25 = vshll.u32 %v7636_v30, 16  ;;  %v7675_v17 = vld [vmem:[%s7253_s30 + $0xb8] sm:$0xf]  ;;  %v7678_v35 = vld [vmem:[%s7253_s30 + $0xbc] sm:$0x1] }
  0x51   : > { %10339 = vst [vmem:[#allocation42_spill] sm:$0xff] %v7654_v53  ;;  %v7657_v5 = vcombine.low %v611_v47, %v621_v13  ;;  %v639_v59 = vor.u32 %v638_v48, %v634_v58  ;;  %6452 = vmatmul.mubr.msk.bf16.gmra.mxu1 %vm744_vm1, %v7654_v53  ;;  %v656_v3 = vshll.u32 %v7641_v46, 16  ;;  %v660_v50 = vshrl.u32 %v7641_v46, 16 }
  0x52   : > { %v649_v1 = vrot.slane %v647_v61, 4  ;;  %v666_v41 = vshll.u32 %v7644_v56, 16  ;;  %v630_v10 = vrot.slane %v629_v15, 4  ;;  %v652_v48 = vrot.slane %v650_v25, 5 }
  0x53   : > { %10340 = vst [vmem:[#allocation43_spill] sm:$0xff] %v7657_v5  ;;  %v640_v47 = vrot.slane %v639_v59, 4  ;;  %6417 = vmatprep.mubr.msk.bf16.mxu0 %vm744_vm1, %v7657_v5  ;;  %v7672_v40 = vcombine.low %v7636_v30, %v7641_v46  ;;  %v658_v13 = vrot.slane %v656_v3, 5  ;;  %v662_v61 = vrot.slane %v660_v50, 4 }
  0x54   : > { %v668_v53 = vrot.slane %v666_v41, 5  ;;  %v671_v31 = vshrl.u32 %v7661_v49, 16  ;;  %v635_v15 = vsel %vm7299_vm4, %v630_v10, %v634_v58  ;;  %v653_v25 = vor.u32 %v652_v48, %v649_v1 }
  0x55   : > { %10341 = vst [vmem:[#allocation44_spill] sm:$0xff] %v7672_v40  ;;  %v645_v59 = vsel %vm7299_vm4, %v640_v47, %v644_v39  ;;  %6455 = vmatprep.mubr.msk.bf16.mxu1 %vm744_vm1, %v7672_v40  ;;  %v674_v5 = vshll.u32 %v7661_v49, 16  ;;  %v663_v3 = vor.u32 %v662_v61, %v658_v13  ;;  %v680_v41 = vshll.u32 %v7675_v17, 16 }
  0x56   : > { %v7688_v56 = vcombine.low %v635_v15, %v645_v59  ;;  %v673_v50 = vrot.slane %v671_v31, 4  ;;  %v654_v46 = vrot.slane %v653_v25, 4  ;;  %v684_v45 = vshrl.u32 %v7675_v17, 16 }
  0x57   : > { %v676_v30 = vrot.slane %v674_v5, 5  ;;  %v690_v58 = vshll.u32 %v7678_v35, 16  ;;  %v1880_v39 = vrot.slane %v7259_v7, 5  ;;  %v664_v1 = vrot.slane %v663_v3, 4 }
  0x58   : > { %10342 = vst [vmem:[#allocation45_spill] sm:$0xff] %v7688_v56  ;;  %6418 = vmatmul.mubr.msk.bf16.gmra.mxu0 %vm744_vm1, %v7688_v56  ;;  %v682_v10 = vrot.slane %v680_v41, 5  ;;  %v7698_v47 = vcombine.low %v7661_v49, %v7675_v17  ;;  %v1887_v31 = vrot.slane %v7269_v12, 5  ;;  %v659_v5 = vsel %vm7299_vm4, %v654_v46, %v658_v13 }
  0x59   : > { %v677_v48 = vor.u32 %v676_v30, %v673_v50  ;;  %v686_v61 = vrot.slane %v684_v45, 4  ;;  %v669_v15 = vsel %vm7299_vm4, %v664_v1, %v668_v53  ;;  %v692_v3 = vrot.slane %v690_v58, 5 }
  0x5a   : > { %10343 = vst [vmem:[#allocation46_spill] sm:$0xff] %v7698_v47  ;;  %6456 = vmatmul.mubr.msk.bf16.gmra.mxu1 %vm744_vm1, %v7698_v47  ;;  %v7707_v7 = vcombine.low %v659_v5, %v669_v15  ;;  %v5747_v12 = vrot.slane %v7256_v6, 9  ;;  %v1882_v41 = vrot.slane %v1880_v39, 4  ;;  %v5748_v46 = vrot.slane %v7262_v8, 9 }
  0x5b   : > { %v678_v59 = vrot.slane %v677_v48, 4  ;;  %v687_v25 = vor.u32 %v686_v61, %v682_v10  ;;  %6495 = vmatprep.mubr.msk.bf16.mxu1 %vm744_vm1, %v7332_v62  ;;  %v1883_v45 = vrot.slane %v7288_v23, 5  ;;  %v1889_v30 = vrot.slane %v1887_v31, 4 }
  0x5c   : > { %6421 = vmatprep.mubr.msk.bf16.mxu0 %vm744_vm1, %v7707_v7  ;;  %v1890_v50 = vrot.slane %v7291_v24, 5  ;;  %v10344_v58 = vmov 0  ;;  %v2253_v23 = vsel %vm793_vm0, %v7285_v20, 0  ;;  %v7731_v1 = vsel %vm7721_vm7, %v5747_v12, %v1880_v39  ;;  %v7746_v20 = vld [vmem:[%s10121_s1 + $0xe] sm:$0x3] }
  0x5d   : > { %v683_v53 = vsel %vm7299_vm4, %v678_v59, %v682_v10  ;;  %v688_v13 = vrot.slane %v687_v25, 4  ;;  %v10345_v58 = vsel %vm7721_vm7, 4294967295, %v10344_v58  ;;  %v7735_v10 = vsel %vm7721_vm7, %v1882_v41, %v1883_v45  ;;  %v7770_v12 = vld [vmem:[%s10121_s1 + $0xc] sm:$0x3]  ;;  %v7156_v24 = vld [vmem:[%s7253_s30 + $0x18] sm:$0xf] }
  0x5e   : > { %10346 = vst [vmem:[#allocation47_spill] sm:$0xff] %v10345_v58  ;;  %v1888_v5 = vsel %vm7721_vm7, %v5748_v46, %v1887_v31  ;;  %v1891_v48 = vsel %vm7721_vm7, %v1889_v30, %v1890_v50  ;;  %v5752_v31 = vrot.slane %v7381_v42, 9  ;;  %v1915_v61 = vrot.slane %v7389_v51, 5 }
  0x5f   : > { %v693_v6 = vsel %vm7299_vm4, %v688_v13, %v692_v3  ;;  %v7752_v39 = vcombine.low %v1888_v5, %v1891_v48  ;;  %v2089_v15 = vsel %vm793_vm0, %v7365_v29, 0  ;;  %v1918_v3 = vrot.slane %v7401_v63, 5 }
  0x60   : > { %v7725_v8 = vcombine.low %v683_v53, %v693_v6  ;;  %v1916_v59 = vsel %vm7721_vm7, %v5752_v31, %v1915_v61  ;;  %v1917_v25 = vrot.slane %v1915_v61, 4  ;;  %v5753_v41 = vrot.slane %v7411_v9, 9 }
  0x61   : > { %10347 = vst [vmem:[#allocation48_spill] sm:$0xff] %v7752_v39  ;;  %v1922_v42 = vrot.slane %v7421_v26, 5  ;;  %v1925_v51 = vrot.slane %v7430_v32, 5  ;;  %v5754_v63 = vrot.slane %v7439_v44, 9  ;;  %v1929_v46 = vrot.slane %v7451_v55, 5 }
  0x62   : > { %6422 = vmatmul.mubr.msk.bf16.gmra.mxu0 %vm744_vm1, %v7725_v8  ;;  %6496 = vmatmul.mubr.msk.bf16.vlgmr.msra.gmra.mxu1 %vm744_vm1, %v7383_v43  ;;  %v1919_v29 = vsel %vm7721_vm7, %v1917_v25, %v1918_v3  ;;  %v1932_v45 = vrot.slane %v7456_v0, 5  ;;  %v5755_v30 = vrot.slane %v7465_v14, 9  ;;  %v1936_v53 = vrot.slane %v7473_v38, 5 }
  0x63   : > { %6461 = vmatprep.mubr.msk.bf16.mxu0 %vm744_vm1, %v7279_v18  ;;  %6562 = vmatpush3.bf16.msra.mxu1 %v2253_v23  ;;  %v7785_v9 = vcombine.low %v1916_v59, %v1919_v29  ;;  %v1923_v26 = vsel %vm7721_vm7, %v5753_v41, %v1922_v42  ;;  %v1924_v32 = vrot.slane %v1922_v42, 4  ;;  %v1930_v44 = vsel %vm7721_vm7, %v5754_v63, %v1929_v46  ;;  %v10355_v63 = vld [vmem:[#allocation17_spill] sm:$0xff] }
  0x64   : > { %6499 = vmatprep.mubr.msk.bf16.mxu1 %vm744_vm1, %v7413_v11  ;;  %6942 = vmatprep.subr.msk.bf16.mxu1 %vm793_vm0, %v7746_v20  ;;  %v1931_v55 = vrot.slane %v1929_v46, 4  ;;  %v1939_v50 = vrot.slane %v7485_v52, 5  ;;  %v5756_v0 = vrot.slane %v7494_v4, 9  ;;  %v1943_v6 = vrot.slane %v7500_v21, 5 }
  0x65   : > { %10348 = vst [vmem:[#allocation49_spill] sm:$0xff] %v7785_v9  ;;  %v1926_v13 = vsel %vm7721_vm7, %v1924_v32, %v1925_v51  ;;  %v1937_v48 = vsel %vm7721_vm7, %v5755_v30, %v1936_v53  ;;  %v1938_v14 = vrot.slane %v1936_v53, 4  ;;  %v1946_v52 = vrot.slane %v7515_v57, 5  ;;  %v10352_v57 = vld [vmem:[#allocation22_spill] sm:$0xff]  ;;  %v10354_v51 = vld [vmem:[#allocation28_spill] sm:$0xff]  ;;  %v10359_v53 = vld [vmem:[#allocation33_spill] sm:$0xff] }
  0x66   : > { %v7803_v23 = vcombine.low %v1923_v26, %v1926_v13  ;;  %v1933_v5 = vsel %vm7721_vm7, %v1931_v55, %v1932_v45  ;;  %v1944_v38 = vsel %vm7721_vm7, %v5756_v0, %v1943_v6  ;;  %v1945_v61 = vrot.slane %v1943_v6, 4  ;;  %v10357_v32 = vld [vmem:[#allocation30_spill] sm:$0xff]  ;;  %v10358_v55 = vld [vmem:[#allocation32_spill] sm:$0xff] }
  0x67   : > { %v7809_v31 = vcombine.low %v1930_v44, %v1933_v5  ;;  %v1940_v4 = vsel %vm7721_vm7, %v1938_v14, %v1939_v50  ;;  %v5757_v21 = vrot.slane %v7523_v33, 9  ;;  %v1953_v59 = vrot.slane %v7540_v37, 5  ;;  %v10360_v50 = vld [vmem:[#allocation34_spill] sm:$0xff] }
  0x68   : > { %10349 = vst [vmem:[#allocation50_spill] sm:$0xff] %v7803_v23  ;;  %v7819_v25 = vcombine.low %v1937_v48, %v1940_v4  ;;  %v1947_v3 = vsel %vm7721_vm7, %v1945_v61, %v1946_v52  ;;  %v5758_v41 = vrot.slane %v7550_v27, 9  ;;  %v1957_v42 = vrot.slane %v7557_v22, 5  ;;  %v10356_v27 = vld [vmem:[#allocation24_spill] sm:$0xff] }
  0x69   : > { %10350 = vst [vmem:[#allocation51_spill] sm:$0xff] %v7809_v31  ;;  %v7829_v33 = vcombine.low %v1944_v38, %v1947_v3  ;;  %v1960_v29 = vrot.slane %v10354_v51, 5  ;;  %v5759_v26 = vrot.slane %v7575_v19, 9  ;;  %v1964_v45 = vrot.slane %v10357_v32, 5  ;;  %v10363_v52 = vld [vmem:[#allocation36_spill] sm:$0xff] }
  0x6a   : > { %6462 = vmatmul.mubr.msk.bf16.vlgmr.msra.gmra.mxu0 %vm744_vm1, %v7327_v60  ;;  %6500 = vmatmul.mubr.msk.bf16.gmra.mxu1 %vm744_vm1, %v7433_v36  ;;  %10351 = vst [vmem:[#allocation52_spill] sm:$0xff] %v7819_v25  ;;  %v1958_v22 = vsel %vm7721_vm7, %v5758_v41, %v1957_v42  ;;  %v1959_v46 = vrot.slane %v1957_v42, 4  ;;  %v1967_v30 = vrot.slane %v10358_v55, 5  ;;  %v5760_v13 = vrot.slane %v10359_v53, 9  ;;  %v10365_v3 = vld [vmem:[#allocation40_spill] sm:$0xff]  ;;  %v10366_v42 = vld [vmem:[#allocation41_spill] sm:$0xff] }
  0x6b   : > { %6528 = vmatpush3.bf16.msra.mxu0 %v2089_v15  ;;  %6465 = vmatprep.mubr.msk.bf16.mxu0 %vm744_vm1, %v7360_v28  ;;  %v1950_v15 = vrot.slane %v7528_v2, 5  ;;  %10353 = vst [vmem:[#allocation22_spill] sm:$0xff] %v7829_v33  ;;  %v1971_v0 = vrot.slane %v10360_v50, 5  ;;  %v1965_v48 = vsel %vm7721_vm7, %v5759_v26, %v1964_v45  ;;  %v1966_v19 = vrot.slane %v1964_v45, 4  ;;  %v10370_v55 = vld [vmem:[#allocation26_spill] sm:$0xff]  ;;  %v10372_v53 = vld [vmem:[#allocation29_spill] sm:$0xff] }
  0x6c   : > { %6503 = vmatprep.mubr.msk.bf16.mxu1 %vm744_vm1, %v7467_v16  ;;  %6941 = vmatprep.subr.msk.bf16.mxu0 %vm793_vm0, %v7770_v12  ;;  %v1961_v5 = vsel %vm7721_vm7, %v1959_v46, %v1960_v29  ;;  %v1974_v4 = vrot.slane %v10363_v52, 5  ;;  %v1978_v41 = vrot.slane %v10365_v3, 5  ;;  %v5762_v29 = vrot.slane %v7661_v49, 9  ;;  %v10378_v52 = vld [vmem:[#allocation39_spill] sm:$0xff] }
  0x6d   : > { %v1951_v2 = vsel %vm7721_vm7, %v5757_v21, %v1950_v15  ;;  %v1952_v37 = vrot.slane %v1950_v15, 4  ;;  %v7853_v14 = vcombine.low %v1958_v22, %v1961_v5  ;;  %v1972_v38 = vsel %vm7721_vm7, %v5760_v13, %v1971_v0  ;;  %v10364_v15 = vld [vmem:[#allocation38_spill] sm:$0xff] }
  0x6e   : > { %v1973_v61 = vrot.slane %v1971_v0, 4  ;;  %v1968_v21 = vsel %vm7721_vm7, %v1966_v19, %v1967_v30  ;;  %v1985_v22 = vrot.slane %v7675_v17, 5  ;;  %v1980_v32 = vrot.slane %v1978_v41, 4  ;;  %v10371_v17 = vld [vmem:[#allocation21_spill] sm:$0xff]  ;;  %v300_v5 = vld [vmem:[%s7253_s30 + $0xc0] sm:$0xf] }
  0x6f   : > { %v1954_v44 = vsel %vm7721_vm7, %v1952_v37, %v1953_v59  ;;  %10362 = vst [vmem:[#allocation24_spill] sm:$0xff] %v7853_v14  ;;  %v5761_v59 = vrot.slane %v10364_v15, 9  ;;  %v7863_v37 = vcombine.low %v1965_v48, %v1968_v21  ;;  %v1988_v45 = vrot.slane %v7678_v35, 5  ;;  %v301_v48 = vld [vmem:[%s7253_s30 + $0xc4] sm:$0xf]  ;;  %v10375_v19 = vld [vmem:[#allocation23_spill] sm:$0xff] }
  0x70   : > { %v7847_v6 = vcombine.low %v1951_v2, %v1954_v44  ;;  %v1981_v2 = vrot.slane %v10366_v42, 5  ;;  %v1975_v51 = vsel %vm7721_vm7, %v1973_v61, %v1974_v4  ;;  %v10369_v44 = vld [vmem:[#allocation19_spill] sm:$0xff]  ;;  %v1986_v49 = vsel %vm7721_vm7, %v5762_v29, %v1985_v22  ;;  %v10377_v61 = vld [vmem:[#allocation25_spill] sm:$0xff] }
  0x71   : > { %10367 = vst [vmem:[#allocation30_spill] sm:$0xff] %v7863_v37  ;;  %v7869_v46 = vcombine.low %v1972_v38, %v1975_v51  ;;  %v1979_v26 = vsel %vm7721_vm7, %v5761_v59, %v1978_v41  ;;  %v1987_v30 = vrot.slane %v1985_v22, 4  ;;  %v10376_v38 = vld [vmem:[#allocation35_spill] sm:$0xff]  ;;  %v1457_v4 = vshrl.u32 %v300_v5, 16 }
  0x72   : > { %6466 = vmatmul.mubr.msk.bf16.gmra.mxu0 %vm744_vm1, %v7397_v54  ;;  %6504 = vmatmul.mubr.msk.bf16.gmra.mxu1 %vm744_vm1, %v10352_v57  ;;  %10361 = vst [vmem:[#allocation28_spill] sm:$0xff] %v7847_v6  ;;  %v1982_v13 = vsel %vm7721_vm7, %v1980_v32, %v1981_v2  ;;  %v1460_v21 = vshll.u32 %v300_v5, 16  ;;  %v1466_v15 = vshll.u32 %v301_v48, 16  ;;  %v1470_v59 = vshrl.u32 %v301_v48, 16  ;;  %v302_v51 = vld [vmem:[%s7253_s30 + $0xc8] sm:$0x1] }
  0x73   : > { %6469 = vmatprep.mubr.msk.bf16.mxu0 %vm744_vm1, %v10355_v63  ;;  %6507 = vmatprep.mubr.msk.bf16.mxu1 %vm744_vm1, %v10356_v27  ;;  %10368 = vst [vmem:[#allocation32_spill] sm:$0xff] %v7869_v46  ;;  %v7886_v35 = vcombine.low %v1979_v26, %v1982_v13  ;;  %v1989_v50 = vsel %vm7721_vm7, %v1987_v30, %v1988_v45  ;;  %v1459_v3 = vrot.slane %v1457_v4, 4  ;;  %v10379_v29 = vld [vmem:[#allocation27_spill] sm:$0xff]  ;;  %v10382_v4 = vld [vmem:[#allocation37_spill] sm:$0xff]  ;;  %v5749_v34 = vrot.slane %v7156_v24, 9  ;;  %v10391_v24 = vld [vmem:[#allocation6_spill] sm:$0xff] }
  0x74   : > { %v7890_v0 = vcombine.low %v1986_v49, %v1989_v50  ;;  %v1462_v41 = vrot.slane %v1460_v21, 5  ;;  %v1468_v42 = vrot.slane %v1466_v15, 5  ;;  %v1472_v2 = vrot.slane %v1470_v59, 4  ;;  %v10380_v22 = vld [vmem:[#allocation43_spill] sm:$0xff]  ;;  %v10383_v21 = vld [vmem:[#allocation42_spill] sm:$0xff] }
  0x75   : > { %10373 = vst [vmem:[#allocation33_spill] sm:$0xff] %v7886_v35  ;;  %v10381_v26 = vld [vmem:[#allocation31_spill] sm:$0xff]  ;;  %v1476_v49 = vshll.u32 %v302_v51, 16 }
  0x76   : > { %10374 = vst [vmem:[#allocation34_spill] sm:$0xff] %v7890_v0  ;;  %v1463_v32 = vor.u32 %v1462_v41, %v1459_v3  ;;  %v1473_v45 = vor.u32 %v1472_v2, %v1468_v42  ;;  %v2617_v41 = vrot.slane %v301_v48, 5  ;;  %v5829_v2 = vrot.slane %v300_v5, 9 }
  0x77   : > { %v1478_v50 = vrot.slane %v1476_v49, 5 }
  0x78   : > { %v1464_v30 = vrot.slane %v1463_v32, 4  ;;  %v1474_v13 = vrot.slane %v1473_v45, 4  ;;  %v2619_v32 = vrot.slane %v2617_v41, 4  ;;  %v2620_v45 = vrot.slane %v302_v51, 5 }
  0x79   : > { %v2618_v49 = vsel %vm7721_vm7, %v5829_v2, %v2617_v41  ;;  %v5848_v41 = vld [vmem:[%s10121_s1 + $0x10] sm:$0x3]  ;;  %v10392_v2 = vld [vmem:[#allocation11_spill] sm:$0xff] }
  0x7a   : > { %6470 = vmatmul.mubr.msk.bf16.gmra.mxu0 %vm744_vm1, %v10369_v44  ;;  %6508 = vmatmul.mubr.msk.bf16.gmra.mxu1 %vm744_vm1, %v10370_v55  ;;  %v1469_v15 = vsel %vm7299_vm4, %v1464_v30, %v1468_v42  ;;  %v1479_v59 = vsel %vm7299_vm4, %v1474_v13, %v1478_v50  ;;  %v10385_v42 = vld [vmem:[#allocation9_spill] sm:$0xff]  ;;  %v2621_v30 = vsel %vm7721_vm7, %v2619_v32, %v2620_v45  ;;  %v10386_v13 = vld [vmem:[#allocation3_spill] sm:$0xff]  ;;  %v1908_v32 = vrot.slane %v10392_v2, 5 }
  0x7b   : > { %6473 = vmatprep.mubr.msk.bf16.mxu0 %vm744_vm1, %v10371_v17  ;;  %6511 = vmatprep.mubr.msk.bf16.mxu1 %vm744_vm1, %v10372_v53  ;;  %v7923_v3 = vcombine.low %v1469_v15, %v1479_v59  ;;  %v1894_v51 = vrot.slane %v10386_v13, 5  ;;  %v7938_v50 = vcombine.low %v2618_v49, %v2621_v30  ;;  %v7940_v15 = vcombine.low %v300_v5, %v301_v48  ;;  %v10395_v30 = vld [vmem:[#allocation8_spill] sm:$0xff] }
  0x7c   : > { %v2631_v59 = vsel %vm793_vm0, %v7746_v20, 0  ;;  %v10390_v5 = vcombine.low %v7731_v1, %v7735_v10  ;;  %v1901_v20 = vrot.slane %v10391_v24, 5  ;;  %v10394_v1 = vld [vmem:[#allocation5_spill] sm:$0xff]  ;;  %v1904_v13 = vrot.slane %v10395_v30, 5  ;;  %v8050_v30 = vld [vmem:[%s10121_s1 + $0x16] sm:$0x3] }
  0x7d   : > { %10384 = vst [vmem:[#allocation36_spill] sm:$0xff] %v7923_v3  ;;  %10387 = vst [vmem:[#allocation38_spill] sm:$0xff] %v7938_v50  ;;  %v5750_v10 = vrot.slane %v10394_v1, 9 }
  0x7e   : > { %10388 = vst [vmem:[#allocation40_spill] sm:$0xff] %v7940_v15  ;;  %v1903_v49 = vrot.slane %v1901_v20, 4 }
  0x82   : > { %6474 = vmatmul.mubr.msk.bf16.gmra.mxu0 %vm744_vm1, %v10375_v19  ;;  %6512 = vmatmul.mubr.msk.bf16.gmra.mxu1 %vm744_vm1, %v10376_v38 }
  0x83   : > { %6477 = vmatprep.mubr.msk.bf16.mxu0 %vm744_vm1, %v10377_v61  ;;  %6515 = vmatprep.mubr.msk.bf16.mxu1 %vm744_vm1, %v10378_v52 }
  0x8a   : > { %6478 = vmatmul.mubr.msk.bf16.gmra.mxu0 %vm744_vm1, %v10379_v29  ;;  %6516 = vmatmul.mubr.msk.bf16.gmra.mxu1 %vm744_vm1, %v10380_v22 }
  0x8b   : > { %6481 = vmatprep.mubr.msk.bf16.mxu0 %vm744_vm1, %v10381_v26  ;;  %6519 = vmatprep.mubr.msk.bf16.mxu1 %vm744_vm1, %v7688_v56 }
  0x92   : > { %6482 = vmatmul.mubr.msk.bf16.gmra.mxu0 %vm744_vm1, %v10382_v4  ;;  %6520 = vmatmul.mubr.msk.bf16.gmra.mxu1 %vm744_vm1, %v7707_v7 }
  0x93   : > { %6485 = vmatprep.mubr.msk.bf16.mxu0 %vm744_vm1, %v10383_v21  ;;  %6523 = vmatprep.mubr.msk.bf16.mxu1 %vm744_vm1, %v7725_v8 }
  0x9a   : > { %6486 = vmatmul.mubr.msk.bf16.gmra.mxu0 %vm744_vm1, %v7672_v40  ;;  %6524 = vmatmul.mubr.msk.bf16.gmra.mxu1 %vm744_vm1, %v7923_v3  ;;  %v10389_v40 = vld [vmem:[#allocation4_spill] sm:$0xff] }
  0x9b   : > { %6489 = vmatprep.mubr.msk.bf16.mxu0 %vm744_vm1, %v7698_v47  ;;  %6563 = vmatprep.mubr.msk.bf16.mxu1 %vm744_vm1, %v10385_v42  ;;  %v1896_v47 = vrot.slane %v1894_v51, 4  ;;  %v1897_v42 = vrot.slane %v10389_v40, 5  ;;  %v1895_v40 = vsel %vm7721_vm7, %v5749_v34, %v1894_v51  ;;  %v1910_v34 = vrot.slane %v1908_v32, 4  ;;  %v10397_v51 = vld [vmem:[#allocation13_spill] sm:$0xff] }
  0x9d   : > { %v1898_v48 = vsel %vm7721_vm7, %v1896_v47, %v1897_v42  ;;  %v5849_v47 = vld [vmem:[%s10121_s1 + $0x12] sm:$0x3]  ;;  %v1905_v42 = vsel %vm7721_vm7, %v1903_v49, %v1904_v13  ;;  %v3327_v49 = vsel %vm793_vm0, %v5848_v41, 0 }
  0x9e   : > { %v7966_v45 = vcombine.low %v1895_v40, %v1898_v48 }
  0xa0   : > { %10393 = vst [vmem:[#allocation41_spill] sm:$0xff] %v7966_v45 }
  0xa2   : > { %6490 = vmatmul.mubr.msk.bf16.gmra.mxu0 %vm744_vm1, %v7940_v15  ;;  %6564 = vmatmul.mubr.msk.bf16.vlgmr.msra.gmra.mxu1 %vm744_vm1, %v7332_v62  ;;  %v1911_v15 = vrot.slane %v10397_v51, 5 }
  0xa3   : > { %6529 = vmatprep.mubr.msk.bf16.mxu0 %vm744_vm1, %v10390_v5  ;;  %6630 = vmatpush3.bf16.msra.mxu1 %v2631_v59  ;;  %v2419_v59 = vsel %vm793_vm0, %v7770_v12, 0  ;;  %v10396_v5 = vld [vmem:[#allocation10_spill] sm:$0xff]  ;;  %v1902_v12 = vsel %vm7721_vm7, %v5750_v10, %v1901_v20 }
  0xa4   : > { %6567 = vmatprep.mubr.msk.bf16.mxu1 %vm744_vm1, %v7383_v43  ;;  %6944 = vmatprep.subr.msk.bf16.mxu1 %vm793_vm0, %v5848_v41  ;;  %v5751_v24 = vrot.slane %v10396_v5, 9  ;;  %v1912_v48 = vsel %vm7721_vm7, %v1910_v34, %v1911_v15  ;;  %v7994_v2 = vcombine.low %v1902_v12, %v1905_v42  ;;  %v3163_v12 = vsel %vm793_vm0, %v5849_v47, 0 }
  0xa6   : > { %v1909_v40 = vsel %vm7721_vm7, %v5751_v24, %v1908_v32  ;;  %10398 = vst [vmem:[#allocation19_spill] sm:$0xff] %v7994_v2 }
  0xa7   : > { %v7996_v1 = vcombine.low %v1909_v40, %v1912_v48 }
  0xa9   : > { %10399 = vst [vmem:[#allocation26_spill] sm:$0xff] %v7996_v1 }
  0xaa   : > { %6530 = vmatmul.mubr.msk.bf16.vlgmr.msra.gmra.mxu0 %vm744_vm1, %v7752_v39  ;;  %6568 = vmatmul.mubr.msk.bf16.gmra.mxu1 %vm744_vm1, %v7413_v11 }
  0xab   : > { %6596 = vmatpush3.bf16.msra.mxu0 %v2419_v59  ;;  %6533 = vmatprep.mubr.msk.bf16.mxu0 %vm744_vm1, %v7966_v45 }
  0xac   : > { %6571 = vmatprep.mubr.msk.bf16.mxu1 %vm744_vm1, %v7433_v36  ;;  %6943 = vmatprep.subr.msk.bf16.mxu0 %vm793_vm0, %v5849_v47 }
  0xb2   : > { %6534 = vmatmul.mubr.msk.bf16.gmra.mxu0 %vm744_vm1, %v7994_v2  ;;  %6572 = vmatmul.mubr.msk.bf16.gmra.mxu1 %vm744_vm1, %v7467_v16 }
  0xb3   : > { %6537 = vmatprep.mubr.msk.bf16.mxu0 %vm744_vm1, %v7996_v1  ;;  %6575 = vmatprep.mubr.msk.bf16.mxu1 %vm744_vm1, %v10352_v57 }
  0xba   : > { %6538 = vmatmul.mubr.msk.bf16.gmra.mxu0 %vm744_vm1, %v7785_v9  ;;  %6576 = vmatmul.mubr.msk.bf16.gmra.mxu1 %vm744_vm1, %v10356_v27 }
  0xbb   : > { %6541 = vmatprep.mubr.msk.bf16.mxu0 %vm744_vm1, %v7803_v23  ;;  %6579 = vmatprep.mubr.msk.bf16.mxu1 %vm744_vm1, %v10370_v55 }
  0xc2   : > { %6542 = vmatmul.mubr.msk.bf16.gmra.mxu0 %vm744_vm1, %v7809_v31  ;;  %6580 = vmatmul.mubr.msk.bf16.gmra.mxu1 %vm744_vm1, %v10372_v53 }
  0xc3   : > { %6545 = vmatprep.mubr.msk.bf16.mxu0 %vm744_vm1, %v7819_v25  ;;  %6583 = vmatprep.mubr.msk.bf16.mxu1 %vm744_vm1, %v10376_v38 }
  0xca   : > { %6546 = vmatmul.mubr.msk.bf16.gmra.mxu0 %vm744_vm1, %v7829_v33  ;;  %6584 = vmatmul.mubr.msk.bf16.gmra.mxu1 %vm744_vm1, %v10378_v52 }
  0xcb   : > { %6549 = vmatprep.mubr.msk.bf16.mxu0 %vm744_vm1, %v7847_v6  ;;  %6587 = vmatprep.mubr.msk.bf16.mxu1 %vm744_vm1, %v10380_v22 }
  0xd2   : > { %6550 = vmatmul.mubr.msk.bf16.gmra.mxu0 %vm744_vm1, %v7853_v14  ;;  %6588 = vmatmul.mubr.msk.bf16.gmra.mxu1 %vm744_vm1, %v7688_v56 }
  0xd3   : > { %6553 = vmatprep.mubr.msk.bf16.mxu0 %vm744_vm1, %v7863_v37  ;;  %6591 = vmatprep.mubr.msk.bf16.mxu1 %vm744_vm1, %v7707_v7 }
  0xd7   : > { %v6429_v15 = vpop.f32.mrf.mxu1 }
  0xd9   : > { %v1123_v20 = vpop.f32.mrf.mxu1 }
  0xda   : > { %6554 = vmatmul.mubr.msk.bf16.gmra.mxu0 %vm744_vm1, %v7869_v46  ;;  %6592 = vmatmul.mubr.msk.bf16.gmra.mxu1 %vm744_vm1, %v7725_v8 }
  0xdb   : > { %6557 = vmatprep.mubr.msk.bf16.mxu0 %vm744_vm1, %v7886_v35  ;;  %6631 = vmatprep.mubr.msk.bf16.mxu1 %vm744_vm1, %v7752_v39  ;;  %v6430_v32 = vpop.f32.mrf.mxu1 }
  0xdd   : > { %v1126_v10 = vpop.f32.mrf.mxu1 }
  0xe2   : > { %6558 = vmatmul.mubr.msk.bf16.gmra.mxu0 %vm744_vm1, %v7890_v0  ;;  %6632 = vmatmul.mubr.msk.bf16.vlgmr.msra.gmra.mxu1 %vm744_vm1, %v7966_v45 }
  0xe3   : > { %6597 = vmatprep.mubr.msk.bf16.mxu0 %vm744_vm1, %v7332_v62  ;;  %v6395_v13 = vpop.f32.mrf.mxu0  ;;  %6698 = vmatpush3.bf16.msra.mxu1 %v3327_v49 }
  0xe4   : > { %v8058_v59 = vadd.f32 %v6429_v15, %v6395_v13  ;;  %6635 = vmatprep.mubr.msk.bf16.mxu1 %vm744_vm1, %v7994_v2  ;;  %v6433_v41 = vpop.f32.mrf.mxu1  ;;  %6946 = vmatprep.subr.msk.bf16.mxu1 %vm793_vm0, %v8050_v30  ;;  %v8072_v15 = vld [vmem:[%s10121_s1 + $0x14] sm:$0x3] }
  0xe5   : > { %v831_v5 = vpop.f32.mrf.mxu0 }
  0xe6   : > { %v8064_v24 = vadd.f32 %v1123_v20, %v831_v5  ;;  %v1139_v34 = vpop.f32.mrf.mxu1 }
  0xe7   : > { %v6396_v51 = vpop.f32.mrf.mxu0 }
  0xe8   : > { %v8067_v42 = vadd.f32 %v6430_v32, %v6396_v51  ;;  %v6434_v40 = vpop.f32.mrf.mxu1 }
  0xe9   : > { %v834_v48 = vpop.f32.mrf.mxu0 }
  0xea   : > { %6598 = vmatmul.mubr.msk.bf16.vlgmr.msra.gmra.mxu0 %vm744_vm1, %v7383_v43  ;;  %6636 = vmatmul.mubr.msk.bf16.gmra.mxu1 %vm744_vm1, %v7996_v1  ;;  %v8078_v20 = vadd.f32 %v1126_v10, %v834_v48  ;;  %v1142_v49 = vpop.f32.mrf.mxu1 }
  0xeb   : > { %6664 = vmatpush3.bf16.msra.mxu0 %v3163_v12  ;;  %6601 = vmatprep.mubr.msk.bf16.mxu0 %vm744_vm1, %v7413_v11  ;;  %v6399_v47 = vpop.f32.mrf.mxu0 }
  0xec   : > { %6639 = vmatprep.mubr.msk.bf16.mxu1 %vm744_vm1, %v7785_v9  ;;  %6945 = vmatprep.subr.msk.bf16.mxu0 %vm793_vm0, %v8072_v15  ;;  %v8086_v32 = vadd.f32 %v6433_v41, %v6399_v47 }
  0xed   : > { %v6437_v13 = vpop.f32.mrf.mxu1  ;;  %v847_v5 = vpop.f32.mrf.mxu0 }
  0xee   : > { %v8088_v51 = vadd.f32 %v1139_v34, %v847_v5 }
  0xef   : > { %v1155_v10 = vpop.f32.mrf.mxu1  ;;  %v6400_v48 = vpop.f32.mrf.mxu0 }
  0xf0   : > { %v8090_v58 = vadd.f32 %v6434_v40, %v6400_v48 }
  0xf1   : > { %v6438_v12 = vpop.f32.mrf.mxu1  ;;  %v850_v9 = vpop.f32.mrf.mxu0 }
  0xf2   : > { %6602 = vmatmul.mubr.msk.bf16.gmra.mxu0 %vm744_vm1, %v7433_v36  ;;  %6640 = vmatmul.mubr.msk.bf16.gmra.mxu1 %vm744_vm1, %v7803_v23  ;;  %v8096_v1 = vadd.f32 %v1142_v49, %v850_v9 }
  0xf3   : > { %6605 = vmatprep.mubr.msk.bf16.mxu0 %vm744_vm1, %v7467_v16  ;;  %v1158_v41 = vpop.f32.mrf.mxu1  ;;  %6643 = vmatprep.mubr.msk.bf16.mxu1 %vm744_vm1, %v7809_v31 }
  0xf4   : > { %v6403_v34 = vpop.f32.mrf.mxu0 }
  0xf5   : > { %v8102_v40 = vadd.f32 %v6437_v13, %v6403_v34  ;;  %v6441_v5 = vpop.f32.mrf.mxu1 }
  0xf6   : > { %v863_v47 = vpop.f32.mrf.mxu0 }
  0xf7   : > { %v8104_v48 = vadd.f32 %v1155_v10, %v863_v47  ;;  %v1171_v45 = vpop.f32.mrf.mxu1 }
  0xf8   : > { %v6404_v2 = vpop.f32.mrf.mxu0 }
  0xf9   : > { %v8106_v23 = vadd.f32 %v6438_v12, %v6404_v2  ;;  %v6442_v49 = vpop.f32.mrf.mxu1 }
  0xfa   : > { %6606 = vmatmul.mubr.msk.bf16.gmra.mxu0 %vm744_vm1, %v10352_v57  ;;  %6644 = vmatmul.mubr.msk.bf16.gmra.mxu1 %vm744_vm1, %v7819_v25  ;;  %v866_v9 = vpop.f32.mrf.mxu0 }
  0xfb   : > { %v8112_v31 = vadd.f32 %v1158_v41, %v866_v9  ;;  %6609 = vmatprep.mubr.msk.bf16.mxu0 %vm744_vm1, %v10356_v27  ;;  %6647 = vmatprep.mubr.msk.bf16.mxu1 %vm744_vm1, %v7829_v33  ;;  %v1174_v13 = vpop.f32.mrf.mxu1 }
  0xfd   : > { %v6407_v10 = vpop.f32.mrf.mxu0 }
  0xfe   : > { %v8118_v2 = vadd.f32 %v6441_v5, %v6407_v10 }
  0xff   : > { %v6445_v12 = vpop.f32.mrf.mxu1  ;;  %v879_v34 = vpop.f32.mrf.mxu0 }
 0x100   : > { %v8120_v47 = vadd.f32 %v1171_v45, %v879_v34 }
 0x101   : > { %v1187_v39 = vpop.f32.mrf.mxu1  ;;  %v6408_v41 = vpop.f32.mrf.mxu0 }
 0x102   : > { %10400 = vst [vmem:[#allocation21_spill] sm:$0xff] %v8120_v47  ;;  %6610 = vmatmul.mubr.msk.bf16.gmra.mxu0 %vm744_vm1, %v10370_v55  ;;  %6648 = vmatmul.mubr.msk.bf16.gmra.mxu1 %vm744_vm1, %v7847_v6  ;;  %v8126_v9 = vadd.f32 %v6442_v49, %v6408_v41 }
 0x103   : > { %6613 = vmatprep.mubr.msk.bf16.mxu0 %vm744_vm1, %v10372_v53  ;;  %v6446_v33 = vpop.f32.mrf.mxu1  ;;  %6651 = vmatprep.mubr.msk.bf16.mxu1 %vm744_vm1, %v7853_v14  ;;  %v882_v5 = vpop.f32.mrf.mxu0 }
 0x104   : > { %v8132_v45 = vadd.f32 %v1174_v13, %v882_v5 }
 0x105   : > { %v1190_v10 = vpop.f32.mrf.mxu1 }
 0x106   : > { %v6411_v34 = vpop.f32.mrf.mxu0 }
 0x107   : > { %v8134_v25 = vadd.f32 %v6445_v12, %v6411_v34  ;;  %v6449_v4 = vpop.f32.mrf.mxu1 }
 0x108   : > { %v895_v21 = vpop.f32.mrf.mxu0 }
 0x109   : > { %v8136_v47 = vadd.f32 %v1187_v39, %v895_v21  ;;  %v1203_v41 = vpop.f32.mrf.mxu1 }
 0x10a   : > { %6614 = vmatmul.mubr.msk.bf16.gmra.mxu0 %vm744_vm1, %v10376_v38  ;;  %v6412_v49 = vpop.f32.mrf.mxu0  ;;  %6652 = vmatmul.mubr.msk.bf16.gmra.mxu1 %vm744_vm1, %v7863_v37 }
 0x10b   : > { %v8142_v14 = vadd.f32 %v6446_v33, %v6412_v49  ;;  %6617 = vmatprep.mubr.msk.bf16.mxu0 %vm744_vm1, %v10378_v52  ;;  %6655 = vmatprep.mubr.msk.bf16.mxu1 %vm744_vm1, %v7869_v46  ;;  %v6450_v12 = vpop.f32.mrf.mxu1 }
 0x10c   : > { %v898_v13 = vpop.f32.mrf.mxu0 }
 0x10d   : > { %v8148_v39 = vadd.f32 %v1190_v10, %v898_v13  ;;  %v1206_v21 = vpop.f32.mrf.mxu1 }
 0x10f   : > { %10401 = vst [vmem:[#allocation29_spill] sm:$0xff] %v8148_v39  ;;  %v6415_v5 = vpop.f32.mrf.mxu0 }
 0x110   : > { %v8150_v34 = vadd.f32 %v6449_v4, %v6415_v5 }
 0x111   : > { %v911_v37 = vpop.f32.mrf.mxu0  ;;  %v6453_v33 = vpop.f32.mrf.mxu1 }
 0x112   : > { %10402 = vst [vmem:[#allocation23_spill] sm:$0xff] %v8150_v34  ;;  %6618 = vmatmul.mubr.msk.bf16.gmra.mxu0 %vm744_vm1, %v10380_v22  ;;  %6656 = vmatmul.mubr.msk.bf16.gmra.mxu1 %vm744_vm1, %v7886_v35  ;;  %v8156_v49 = vadd.f32 %v1203_v41, %v911_v37 }
 0x113   : > { %6621 = vmatprep.mubr.msk.bf16.mxu0 %vm744_vm1, %v7688_v56  ;;  %6659 = vmatprep.mubr.msk.bf16.mxu1 %vm744_vm1, %v7890_v0  ;;  %v6416_v10 = vpop.f32.mrf.mxu0  ;;  %v1219_v13 = vpop.f32.mrf.mxu1 }
 0x114   : > { %v8162_v4 = vadd.f32 %v6450_v12, %v6416_v10 }
 0x115   : > { %v914_v5 = vpop.f32.mrf.mxu0  ;;  %v6454_v46 = vpop.f32.mrf.mxu1 }
 0x116   : > { %v8164_v6 = vadd.f32 %v1206_v21, %v914_v5 }
 0x117   : > { %v1222_v22 = vpop.f32.mrf.mxu1 }
 0x118   : > { %v6419_v34 = vpop.f32.mrf.mxu0 }
 0x119   : > { %v8166_v39 = vadd.f32 %v6453_v33, %v6419_v34 }
 0x11a   : > { %6622 = vmatmul.mubr.msk.bf16.gmra.mxu0 %vm744_vm1, %v7707_v7  ;;  %v927_v37 = vpop.f32.mrf.mxu0  ;;  %v6457_v41 = vpop.f32.mrf.mxu1  ;;  %6660 = vmatmul.mubr.msk.bf16.gmra.mxu1 %vm744_vm1, %v7938_v50  ;;  %v3729_v50 = vsel %vm793_vm0, %v8050_v30, 0 }
 0x11b   : > { %v8172_v0 = vadd.f32 %v1219_v13, %v927_v37  ;;  %6625 = vmatprep.mubr.msk.bf16.mxu0 %vm744_vm1, %v7725_v8  ;;  %6699 = vmatprep.mubr.msk.bf16.mxu1 %vm744_vm1, %v7279_v18  ;;  %v8187_v13 = vld [vmem:[%s10121_s1 + $0x18] sm:$0x3] }
 0x11c   : > { %v6420_v12 = vpop.f32.mrf.mxu0  ;;  %v1235_v21 = vpop.f32.mrf.mxu1 }
 0x11d   : > { %v8178_v34 = vadd.f32 %v6454_v46, %v6420_v12 }
 0x11e   : > { %v930_v33 = vpop.f32.mrf.mxu0  ;;  %v6458_v10 = vpop.f32.mrf.mxu1 }
 0x11f   : > { %v8180_v5 = vadd.f32 %v1222_v22, %v930_v33 }
 0x120   : > { %v1238_v35 = vpop.f32.mrf.mxu1 }
 0x121   : > { %10403 = vst [vmem:[#allocation35_spill] sm:$0xff] %v8180_v5 }
 0x122   : > { %v6423_v37 = vpop.f32.mrf.mxu0  ;;  %6626 = vmatmul.mubr.msk.bf16.gmra.mxu0 %vm744_vm1, %v7923_v3  ;;  %v6497_v18 = vpop.f32.mrf.mxu1  ;;  %6700 = vmatmul.mubr.msk.bf16.vlgmr.msra.gmra.mxu1 %vm744_vm1, %v7327_v60 }
 0x123   : > { %v8193_v46 = vadd.f32 %v6457_v41, %v6423_v37  ;;  %6665 = vmatprep.mubr.msk.bf16.mxu0 %vm744_vm1, %v7332_v62  ;;  %6766 = vmatpush3.bf16.msra.mxu1 %v3729_v50  ;;  %v3501_v37 = vsel %vm793_vm0, %v8072_v15, 0 }
 0x124   : > { %v943_v22 = vpop.f32.mrf.mxu0  ;;  %v1525_v30 = vpop.f32.mrf.mxu1  ;;  %6703 = vmatprep.mubr.msk.bf16.mxu1 %vm744_vm1, %v7360_v28  ;;  %6948 = vmatprep.subr.msk.bf16.mxu1 %vm793_vm0, %v8187_v13  ;;  %v8212_v28 = vld [vmem:[%s10121_s1 + $0x1a] sm:$0x3] }
 0x125   : > { %10404 = vst [vmem:[#allocation25_spill] sm:$0xff] %v8193_v46  ;;  %v8201_v12 = vadd.f32 %v1235_v21, %v943_v22 }
 0x126   : > { %v6424_v33 = vpop.f32.mrf.mxu0  ;;  %v6498_v3 = vpop.f32.mrf.mxu1 }
 0x127   : > { %10405 = vst [vmem:[#allocation39_spill] sm:$0xff] %v8201_v12  ;;  %v8203_v5 = vadd.f32 %v6458_v10, %v6424_v33 }
 0x128   : > { %v946_v41 = vpop.f32.mrf.mxu0  ;;  %v1528_v62 = vpop.f32.mrf.mxu1 }
 0x129   : > { %10406 = vst [vmem:[#allocation27_spill] sm:$0xff] %v8203_v5  ;;  %v8207_v50 = vadd.f32 %v1238_v35, %v946_v41 }
 0x12a   : > { %v6463_v46 = vpop.f32.mrf.mxu0  ;;  %6666 = vmatmul.mubr.msk.bf16.vlgmr.msra.gmra.mxu0 %vm744_vm1, %v7383_v43  ;;  %v6501_v21 = vpop.f32.mrf.mxu1  ;;  %6704 = vmatmul.mubr.msk.bf16.gmra.mxu1 %vm744_vm1, %v7397_v54 }
 0x12b   : > { %10407 = vst [vmem:[#allocation31_spill] sm:$0xff] %v8207_v50  ;;  %v1426_v10 = vadd.f32 %v6463_v46, %v8058_v59  ;;  %6732 = vmatpush3.bf16.msra.mxu0 %v3501_v37  ;;  %6669 = vmatprep.mubr.msk.bf16.mxu0 %vm744_vm1, %v7413_v11 }
 0x12c   : > { %v1297_v35 = vpop.f32.mrf.mxu0  ;;  %v1541_v15 = vpop.f32.mrf.mxu1  ;;  %6707 = vmatprep.mubr.msk.bf16.mxu1 %vm744_vm1, %v10355_v63  ;;  %6947 = vmatprep.subr.msk.bf16.mxu0 %vm793_vm0, %v8212_v28 }
 0x12d   : > { %v8225_v22 = vadd.f32 %v6497_v18, %v1426_v10  ;;  %v1424_v33 = vadd.f32 %v1297_v35, %v8064_v24 }
 0x12e   : > { %v6464_v41 = vpop.f32.mrf.mxu0  ;;  %v6502_v54 = vpop.f32.mrf.mxu1 }
 0x12f   : > { %10408 = vst [vmem:[#allocation9_spill] sm:$0xff] %v8225_v22  ;;  %v8228_v50 = vadd.f32 %v1525_v30, %v1424_v33  ;;  %v1427_v59 = vadd.f32 %v6464_v41, %v8067_v42 }
 0x130   : > { %v1300_v46 = vpop.f32.mrf.mxu0  ;;  %v1544_v37 = vpop.f32.mrf.mxu1 }
 0x131   : > { %10409 = vst [vmem:[#allocation3_spill] sm:$0xff] %v8228_v50  ;;  %v8231_v5 = vadd.f32 %v6498_v3, %v1427_v59  ;;  %v1425_v12 = vadd.f32 %v1300_v46, %v8078_v20  ;;  %v305_v50 = vld [vmem:[%s7253_s30 + $0xd4] sm:$0x1] }
 0x132   : > { %v6467_v63 = vpop.f32.mrf.mxu0  ;;  %6670 = vmatmul.mubr.msk.bf16.gmra.mxu0 %vm744_vm1, %v7433_v36  ;;  %v6505_v18 = vpop.f32.mrf.mxu1  ;;  %6708 = vmatmul.mubr.msk.bf16.gmra.mxu1 %vm744_vm1, %v10369_v44 }
 0x133   : > { %10410 = vst [vmem:[#allocation4_spill] sm:$0xff] %v8231_v5  ;;  %v1430_v24 = vadd.f32 %v6467_v63, %v8086_v32  ;;  %6673 = vmatprep.mubr.msk.bf16.mxu0 %vm744_vm1, %v7467_v16  ;;  %6711 = vmatprep.mubr.msk.bf16.mxu1 %vm744_vm1, %v10371_v17  ;;  %v8243_v3 = vadd.f32 %v1528_v62, %v1425_v12 }
 0x134   : > { %v1313_v42 = vpop.f32.mrf.mxu0  ;;  %v1557_v20 = vpop.f32.mrf.mxu1 }
 0x135   : > { %10411 = vst [vmem:[#allocation6_spill] sm:$0xff] %v8243_v3  ;;  %v8245_v30 = vadd.f32 %v6501_v21, %v1430_v24  ;;  %v1428_v10 = vadd.f32 %v1313_v42, %v8088_v51 }
 0x136   : > { %v6468_v35 = vpop.f32.mrf.mxu0  ;;  %v6506_v33 = vpop.f32.mrf.mxu1 }
 0x137   : > { %10412 = vst [vmem:[#allocation11_spill] sm:$0xff] %v8245_v30  ;;  %v8248_v41 = vadd.f32 %v1541_v15, %v1428_v10  ;;  %v1431_v63 = vadd.f32 %v6468_v35, %v8090_v58 }
 0x138   : > { %v1316_v32 = vpop.f32.mrf.mxu0  ;;  %v1560_v59 = vpop.f32.mrf.mxu1 }
 0x139   : > { %10413 = vst [vmem:[#allocation5_spill] sm:$0xff] %v8248_v41  ;;  %v8251_v46 = vadd.f32 %v6502_v54, %v1431_v63  ;;  %v1429_v5 = vadd.f32 %v1316_v32, %v8096_v1 }
 0x13a   : > { %v6471_v62 = vpop.f32.mrf.mxu0  ;;  %6674 = vmatmul.mubr.msk.bf16.gmra.mxu0 %vm744_vm1, %v10352_v57  ;;  %v6509_v12 = vpop.f32.mrf.mxu1  ;;  %6712 = vmatmul.mubr.msk.bf16.gmra.mxu1 %vm744_vm1, %v10375_v19 }
 0x13b   : > { %10414 = vst [vmem:[#allocation8_spill] sm:$0xff] %v8251_v46  ;;  %v1434_v51 = vadd.f32 %v6471_v62, %v8102_v40  ;;  %6677 = vmatprep.mubr.msk.bf16.mxu0 %vm744_vm1, %v10356_v27  ;;  %6715 = vmatprep.mubr.msk.bf16.mxu1 %vm744_vm1, %v10377_v61  ;;  %v8263_v54 = vadd.f32 %v1544_v37, %v1429_v5 }
 0x13c   : > { %v1329_v58 = vpop.f32.mrf.mxu0  ;;  %v1573_v1 = vpop.f32.mrf.mxu1 }
 0x13d   : > { %10415 = vst [vmem:[#allocation10_spill] sm:$0xff] %v8263_v54  ;;  %v8265_v21 = vadd.f32 %v6505_v18, %v1434_v51  ;;  %v1432_v15 = vadd.f32 %v1329_v58, %v8104_v48 }
 0x13e   : > { %v6472_v24 = vpop.f32.mrf.mxu0  ;;  %v6510_v42 = vpop.f32.mrf.mxu1 }
 0x13f   : > { %10416 = vst [vmem:[#allocation13_spill] sm:$0xff] %v8265_v21  ;;  %v8268_v10 = vadd.f32 %v1557_v20, %v1432_v15  ;;  %v1435_v40 = vadd.f32 %v6472_v24, %v8106_v23 }
 0x140   : > { %v1332_v35 = vpop.f32.mrf.mxu0  ;;  %v1576_v63 = vpop.f32.mrf.mxu1 }
 0x141   : > { %10417 = vst [vmem:[#allocation53_spill] sm:$0xff] %v8268_v10  ;;  %v1433_v32 = vadd.f32 %v1332_v35, %v8112_v31  ;;  %v8272_v62 = vadd.f32 %v6506_v33, %v1435_v40  ;;  %v10421_v33 = vld [vmem:[#allocation21_spill] sm:$0xff] }
 0x142   : > { %v6475_v5 = vpop.f32.mrf.mxu0  ;;  %6678 = vmatmul.mubr.msk.bf16.gmra.mxu0 %vm744_vm1, %v10370_v55  ;;  %v6513_v37 = vpop.f32.mrf.mxu1  ;;  %6716 = vmatmul.mubr.msk.bf16.gmra.mxu1 %vm744_vm1, %v10379_v29 }
 0x143   : > { %10418 = vst [vmem:[#allocation54_spill] sm:$0xff] %v8272_v62  ;;  %v8278_v48 = vadd.f32 %v1560_v59, %v1433_v32  ;;  %v1438_v18 = vadd.f32 %v6475_v5, %v8118_v2  ;;  %6681 = vmatprep.mubr.msk.bf16.mxu0 %vm744_vm1, %v10372_v53  ;;  %6719 = vmatprep.mubr.msk.bf16.mxu1 %vm744_vm1, %v10381_v26 }
 0x144   : > { %v1345_v23 = vpop.f32.mrf.mxu0  ;;  %v1589_v20 = vpop.f32.mrf.mxu1 }
 0x145   : > { %10419 = vst [vmem:[#allocation55_spill] sm:$0xff] %v8278_v48  ;;  %v8285_v31 = vadd.f32 %v6509_v12, %v1438_v18  ;;  %v1436_v51 = vadd.f32 %v1345_v23, %v10421_v33  ;;  %v10424_v18 = vld [vmem:[#allocation37_spill] sm:$0xff] }
 0x146   : > { %v6476_v58 = vpop.f32.mrf.mxu0  ;;  %v6514_v15 = vpop.f32.mrf.mxu1 }
 0x147   : > { %10420 = vst [vmem:[#allocation56_spill] sm:$0xff] %v8285_v31  ;;  %v1439_v24 = vadd.f32 %v6476_v58, %v8126_v9  ;;  %v8289_v59 = vadd.f32 %v1573_v1, %v1436_v51  ;;  %v10425_v9 = vld [vmem:[#allocation42_spill] sm:$0xff] }
 0x148   : > { %v1348_v40 = vpop.f32.mrf.mxu0  ;;  %v1592_v2 = vpop.f32.mrf.mxu1 }
 0x149   : > { %10422 = vst [vmem:[#allocation21_spill] sm:$0xff] %v8289_v59  ;;  %v8291_v35 = vadd.f32 %v6510_v42, %v1439_v24  ;;  %v1437_v32 = vadd.f32 %v1348_v40, %v8132_v45 }
 0x14a   : > { %v6479_v5 = vpop.f32.mrf.mxu0  ;;  %6682 = vmatmul.mubr.msk.bf16.gmra.mxu0 %vm744_vm1, %v10376_v38  ;;  %v6517_v12 = vpop.f32.mrf.mxu1  ;;  %6720 = vmatmul.mubr.msk.bf16.gmra.mxu1 %vm744_vm1, %v10424_v18 }
 0x14b   : > { %10423 = vst [vmem:[#allocation57_spill] sm:$0xff] %v8291_v35  ;;  %6685 = vmatprep.mubr.msk.bf16.mxu0 %vm744_vm1, %v10378_v52  ;;  %6723 = vmatprep.mubr.msk.bf16.mxu1 %vm744_vm1, %v10425_v9  ;;  %v8302_v1 = vadd.f32 %v1576_v63, %v1437_v32  ;;  %v1442_v42 = vadd.f32 %v6479_v5, %v8134_v25  ;;  %v10430_v63 = vld [vmem:[#allocation29_spill] sm:$0xff]  ;;  %v10431_v25 = vld [vmem:[#allocation43_spill] sm:$0xff] }
 0x14c   : > { %v1361_v23 = vpop.f32.mrf.mxu0  ;;  %v1605_v45 = vpop.f32.mrf.mxu1 }
 0x14d   : > { %10426 = vst [vmem:[#allocation37_spill] sm:$0xff] %v8302_v1  ;;  %v1440_v33 = vadd.f32 %v1361_v23, %v8136_v47  ;;  %v8306_v51 = vadd.f32 %v6513_v37, %v1442_v42  ;;  %v10432_v47 = vld [vmem:[#allocation44_spill] sm:$0xff]  ;;  %v10433_v37 = vld [vmem:[#allocation23_spill] sm:$0xff] }
 0x14e   : > { %v6480_v58 = vpop.f32.mrf.mxu0  ;;  %v6518_v24 = vpop.f32.mrf.mxu1 }
 0x14f   : > { %10427 = vst [vmem:[#allocation42_spill] sm:$0xff] %v8306_v51  ;;  %v8308_v40 = vadd.f32 %v1589_v20, %v1440_v33  ;;  %v1443_v31 = vadd.f32 %v6480_v58, %v8142_v14  ;;  %v10434_v14 = vld [vmem:[#allocation46_spill] sm:$0xff] }
 0x150   : > { %v1364_v35 = vpop.f32.mrf.mxu0  ;;  %v1608_v59 = vpop.f32.mrf.mxu1 }
 0x151   : > { %10428 = vst [vmem:[#allocation58_spill] sm:$0xff] %v8308_v40  ;;  %v8311_v62 = vadd.f32 %v6514_v15, %v1443_v31  ;;  %v1441_v32 = vadd.f32 %v1364_v35, %v10430_v63 }
 0x152   : > { %v6483_v1 = vpop.f32.mrf.mxu0  ;;  %6686 = vmatmul.mubr.msk.bf16.gmra.mxu0 %vm744_vm1, %v10431_v25  ;;  %v6521_v5 = vpop.f32.mrf.mxu1  ;;  %6724 = vmatmul.mubr.msk.bf16.gmra.mxu1 %vm744_vm1, %v10432_v47 }
 0x153   : > { %10429 = vst [vmem:[#allocation59_spill] sm:$0xff] %v8311_v62  ;;  %v1446_v42 = vadd.f32 %v6483_v1, %v10433_v37  ;;  %6689 = vmatprep.mubr.msk.bf16.mxu0 %vm744_vm1, %v7688_v56  ;;  %6727 = vmatprep.mubr.msk.bf16.mxu1 %vm744_vm1, %v10434_v14  ;;  %v8323_v20 = vadd.f32 %v1592_v2, %v1441_v32  ;;  %v10439_v32 = vld [vmem:[#allocation40_spill] sm:$0xff] }
 0x154   : > { %v1377_v31 = vpop.f32.mrf.mxu0  ;;  %v1621_v15 = vpop.f32.mrf.mxu1 }
 0x155   : > { %10435 = vst [vmem:[#allocation29_spill] sm:$0xff] %v8323_v20  ;;  %v8325_v35 = vadd.f32 %v6517_v12, %v1446_v42  ;;  %v1444_v23 = vadd.f32 %v1377_v31, %v8156_v49 }
 0x156   : > { %v6484_v33 = vpop.f32.mrf.mxu0  ;;  %v6522_v58 = vpop.f32.mrf.mxu1 }
 0x157   : > { %10436 = vst [vmem:[#allocation44_spill] sm:$0xff] %v8325_v35  ;;  %v8328_v63 = vadd.f32 %v1605_v45, %v1444_v23  ;;  %v1447_v1 = vadd.f32 %v6484_v33, %v8162_v4 }
 0x158   : > { %v1380_v37 = vpop.f32.mrf.mxu0  ;;  %v1624_v40 = vpop.f32.mrf.mxu1 }
 0x159   : > { %10437 = vst [vmem:[#allocation23_spill] sm:$0xff] %v8328_v63  ;;  %v1445_v51 = vadd.f32 %v1380_v37, %v8164_v6  ;;  %v8332_v62 = vadd.f32 %v6518_v24, %v1447_v1  ;;  %v4265_v1 = vsel %vm793_vm0, %v8187_v13, 0 }
 0x15a   : > { %v6487_v2 = vpop.f32.mrf.mxu0  ;;  %6690 = vmatmul.mubr.msk.bf16.gmra.mxu0 %vm744_vm1, %v7707_v7  ;;  %v6525_v12 = vpop.f32.mrf.mxu1  ;;  %6728 = vmatmul.mubr.msk.bf16.gmra.mxu1 %vm744_vm1, %v10439_v32 }
 0x15b   : > { %10438 = vst [vmem:[#allocation46_spill] sm:$0xff] %v8332_v62  ;;  %v8338_v49 = vadd.f32 %v1608_v59, %v1445_v51  ;;  %v1450_v45 = vadd.f32 %v6487_v2, %v8166_v39  ;;  %6693 = vmatprep.mubr.msk.bf16.mxu0 %vm744_vm1, %v7725_v8  ;;  %6767 = vmatprep.mubr.msk.bf16.mxu1 %vm744_vm1, %v7383_v43  ;;  %v10444_v2 = vld [vmem:[#allocation35_spill] sm:$0xff] }
 0x15c   : > { %v1393_v4 = vpop.f32.mrf.mxu0  ;;  %v1637_v42 = vpop.f32.mrf.mxu1 }
 0x15d   : > { %10440 = vst [vmem:[#allocation40_spill] sm:$0xff] %v8338_v49  ;;  %v8345_v6 = vadd.f32 %v6521_v5, %v1450_v45  ;;  %v1448_v24 = vadd.f32 %v1393_v4, %v8172_v0  ;;  %v8359_v5 = vld [vmem:[%s10121_s1 + $0x1e] sm:$0x3]  ;;  %v10445_v45 = vld [vmem:[#allocation36_spill] sm:$0xff] }
 0x15e   : > { %v6488_v31 = vpop.f32.mrf.mxu0  ;;  %v6526_v23 = vpop.f32.mrf.mxu1 }
 0x15f   : > { %10441 = vst [vmem:[#allocation60_spill] sm:$0xff] %v8345_v6  ;;  %v1451_v33 = vadd.f32 %v6488_v31, %v8178_v34  ;;  %v8349_v59 = vadd.f32 %v1621_v15, %v1448_v24  ;;  %v10447_v15 = vld [vmem:[#allocation25_spill] sm:$0xff]  ;;  %v10448_v31 = vld [vmem:[#allocation39_spill] sm:$0xff] }
 0x160   : > { %v1396_v51 = vpop.f32.mrf.mxu0  ;;  %v1640_v39 = vpop.f32.mrf.mxu1 }
 0x161   : > { %10442 = vst [vmem:[#allocation61_spill] sm:$0xff] %v8349_v59  ;;  %v8353_v37 = vadd.f32 %v6522_v58, %v1451_v33  ;;  %v1449_v63 = vadd.f32 %v1396_v51, %v10444_v2 }
 0x162   : > { %v6491_v0 = vpop.f32.mrf.mxu0  ;;  %6694 = vmatmul.mubr.msk.bf16.gmra.mxu0 %vm744_vm1, %v10445_v45  ;;  %v6565_v34 = vpop.f32.mrf.mxu1  ;;  %6768 = vmatmul.mubr.msk.bf16.vlgmr.msra.gmra.mxu1 %vm744_vm1, %v7413_v11 }
 0x163   : > { %10443 = vst [vmem:[#allocation62_spill] sm:$0xff] %v8353_v37  ;;  %6733 = vmatprep.mubr.msk.bf16.mxu0 %vm744_vm1, %v7327_v60  ;;  %6834 = vmatpush3.bf16.msra.mxu1 %v4265_v1  ;;  %v8367_v13 = vadd.f32 %v1624_v40, %v1449_v63  ;;  %v1454_v58 = vadd.f32 %v6491_v0, %v10447_v15  ;;  %v10451_v40 = vld [vmem:[#allocation27_spill] sm:$0xff]  ;;  %v4101_v0 = vsel %vm793_vm0, %v8212_v28, 0 }
 0x164   : > { %v1409_v4 = vpop.f32.mrf.mxu0  ;;  %v2289_v24 = vpop.f32.mrf.mxu1  ;;  %6771 = vmatprep.mubr.msk.bf16.mxu1 %vm744_vm1, %v7433_v36  ;;  %6950 = vmatprep.subr.msk.bf16.mxu1 %vm793_vm0, %v8359_v5 }
 0x165   : > { %10446 = vst [vmem:[#allocation35_spill] sm:$0xff] %v8367_v13  ;;  %v1452_v33 = vadd.f32 %v1409_v4, %v10448_v31  ;;  %v8375_v51 = vadd.f32 %v6525_v12, %v1454_v58  ;;  %v8389_v13 = vld [vmem:[%s10121_s1 + $0x1c] sm:$0x3]  ;;  %v10453_v58 = vld [vmem:[#allocation31_spill] sm:$0xff] }
 0x166   : > { %v6492_v2 = vpop.f32.mrf.mxu0  ;;  %v8377_v59 = vpop.f32.mrf.mxu1 }
 0x167   : > { %10449 = vst [vmem:[#allocation25_spill] sm:$0xff] %v8375_v51  ;;  %v8379_v60 = vadd.f32 %v1637_v42, %v1452_v33  ;;  %v1455_v63 = vadd.f32 %v6492_v2, %v10451_v40  ;;  %v10454_v42 = vld [vmem:[#allocation12_spill] sm:$0xff]  ;;  %v10455_v2 = vld [vmem:[#allocation15_spill] sm:$0xff] }
 0x168   : > { %v1412_v1 = vpop.f32.mrf.mxu0  ;;  %v8384_v15 = vpop.f32.mrf.mxu1 }
 0x169   : > { %10450 = vst [vmem:[#allocation39_spill] sm:$0xff] %v8379_v60  ;;  %v8391_v12 = vadd.f32 %v6526_v23, %v1455_v63  ;;  %v1453_v4 = vadd.f32 %v1412_v1, %v10453_v58 }
 0x16a   : > { %v6531_v31 = vpop.f32.mrf.mxu0  ;;  %6734 = vmatmul.mubr.msk.bf16.vlgmr.msra.gmra.mxu0 %vm744_vm1, %v10454_v42  ;;  %v6569_v33 = vpop.f32.mrf.mxu1  ;;  %6772 = vmatmul.mubr.msk.bf16.gmra.mxu1 %vm744_vm1, %v7467_v16 }
 0x16b   : > { %10452 = vst [vmem:[#allocation27_spill] sm:$0xff] %v8391_v12  ;;  %v8398_v28 = vadd.f32 %v6565_v34, %v6531_v31  ;;  %6800 = vmatpush3.bf16.msra.mxu0 %v4101_v0  ;;  %6737 = vmatprep.mubr.msk.bf16.mxu0 %vm744_vm1, %v10455_v2  ;;  %v8402_v40 = vadd.f32 %v1640_v39, %v1453_v4  ;;  %v10457_v39 = vld [vmem:[#allocation17_spill] sm:$0xff] }
 0x16c   : > { %v2125_v23 = vpop.f32.mrf.mxu0  ;;  %v2305_v63 = vpop.f32.mrf.mxu1  ;;  %6775 = vmatprep.mubr.msk.bf16.mxu1 %vm744_vm1, %v10352_v57  ;;  %6949 = vmatprep.subr.msk.bf16.mxu0 %vm793_vm0, %v8389_v13 }
 0x16d   : > { %10456 = vst [vmem:[#allocation31_spill] sm:$0xff] %v8402_v40  ;;  %v8408_v1 = vadd.f32 %v2289_v24, %v2125_v23 }
 0x16e   : > { %v8410_v58 = vpop.f32.mrf.mxu0  ;;  %v8412_v34 = vpop.f32.mrf.mxu1 }
 0x170   : > { %v8414_v0 = vpop.f32.mrf.mxu0  ;;  %v2308_v31 = vpop.f32.mrf.mxu1 }
 0x172   : > { %v6535_v42 = vpop.f32.mrf.mxu0  ;;  %6738 = vmatmul.mubr.msk.bf16.gmra.mxu0 %vm744_vm1, %v10457_v39  ;;  %v6573_v4 = vpop.f32.mrf.mxu1  ;;  %6776 = vmatmul.mubr.msk.bf16.gmra.mxu1 %vm744_vm1, %v10356_v27 }
 0x173   : > { %v8420_v2 = vadd.f32 %v6569_v33, %v6535_v42  ;;  %6741 = vmatprep.mubr.msk.bf16.mxu0 %vm744_vm1, %v10369_v44  ;;  %6779 = vmatprep.mubr.msk.bf16.mxu1 %vm744_vm1, %v10370_v55 }
 0x174   : > { %v2141_v24 = vpop.f32.mrf.mxu0  ;;  %v2321_v23 = vpop.f32.mrf.mxu1 }
 0x175   : > { %v8426_v40 = vadd.f32 %v2305_v63, %v2141_v24 }
 0x176   : > { %v8428_v60 = vpop.f32.mrf.mxu0  ;;  %v8430_v51 = vpop.f32.mrf.mxu1 }
 0x178   : > { %v2144_v39 = vpop.f32.mrf.mxu0  ;;  %v8432_v12 = vpop.f32.mrf.mxu1 }
 0x179   : > { %v8434_v33 = vadd.f32 %v2308_v31, %v2144_v39 }
 0x17a   : > { %v6539_v42 = vpop.f32.mrf.mxu0  ;;  %6742 = vmatmul.mubr.msk.bf16.gmra.mxu0 %vm744_vm1, %v10371_v17  ;;  %v6577_v44 = vpop.f32.mrf.mxu1  ;;  %6780 = vmatmul.mubr.msk.bf16.gmra.mxu1 %vm744_vm1, %v10372_v53  ;;  %v8453_v17 = vld [vmem:[%s7253_s30 + $0xcc] sm:$0xf] }
 0x17b   : > { %v8440_v63 = vadd.f32 %v6573_v4, %v6539_v42  ;;  %6745 = vmatprep.mubr.msk.bf16.mxu0 %vm744_vm1, %v10375_v19  ;;  %6783 = vmatprep.mubr.msk.bf16.mxu1 %vm744_vm1, %v10376_v38  ;;  %v8460_v42 = vld [vmem:[%s7253_s30 + $0xd0] sm:$0xf]  ;;  %v3700_v62 = vshll.u32 %v8453_v17, 16 }
 0x17c   : > { %v2157_v24 = vpop.f32.mrf.mxu0  ;;  %v2337_v31 = vpop.f32.mrf.mxu1  ;;  %v3706_v20 = vshll.u32 %v8460_v42, 16 }
 0x17d   : > { %v8446_v39 = vadd.f32 %v2321_v23, %v2157_v24  ;;  %v3697_v23 = vshrl.u32 %v8453_v17, 16 }
 0x17e   : > { %v8448_v6 = vpop.f32.mrf.mxu0  ;;  %v8450_v37 = vpop.f32.mrf.mxu1  ;;  %v3708_v30 = vrot.slane %v3706_v20, 5 }
 0x180   : > { %v8455_v49 = vpop.f32.mrf.mxu0  ;;  %v8457_v4 = vpop.f32.mrf.mxu1 }
 0x182   : > { %v6543_v19 = vpop.f32.mrf.mxu0  ;;  %6746 = vmatmul.mubr.msk.bf16.gmra.mxu0 %vm744_vm1, %v10377_v61  ;;  %v6581_v35 = vpop.f32.mrf.mxu1  ;;  %6784 = vmatmul.mubr.msk.bf16.gmra.mxu1 %vm744_vm1, %v10378_v52  ;;  %v3710_v61 = vshrl.u32 %v8460_v42, 16 }
 0x183   : > { %v8467_v24 = vadd.f32 %v6577_v44, %v6543_v19  ;;  %6749 = vmatprep.mubr.msk.bf16.mxu0 %vm744_vm1, %v10379_v29  ;;  %6787 = vmatprep.mubr.msk.bf16.mxu1 %vm744_vm1, %v10431_v25  ;;  %v3699_v19 = vrot.slane %v3697_v23, 4  ;;  %v3702_v29 = vrot.slane %v3700_v62, 5 }
 0x184   : > { %v2173_v21 = vpop.f32.mrf.mxu0  ;;  %v2353_v48 = vpop.f32.mrf.mxu1  ;;  %v3712_v54 = vrot.slane %v3710_v61, 4 }
 0x185   : > { %v8476_v10 = vadd.f32 %v2337_v31, %v2173_v21  ;;  %v3703_v62 = vor.u32 %v3702_v29, %v3699_v19  ;;  %v3716_v31 = vshll.u32 %v305_v50, 16 }
 0x186   : > { %v8478_v46 = vpop.f32.mrf.mxu0  ;;  %v8480_v44 = vpop.f32.mrf.mxu1  ;;  %v3713_v20 = vor.u32 %v3712_v54, %v3708_v30 }
 0x187   : > { %10458 = vst [vmem:[#allocation12_spill] sm:$0xff] %v8476_v10  ;;  %10459 = vst [vmem:[#allocation15_spill] sm:$0xff] %v8480_v44 }
 0x188   : > { %v8482_v41 = vpop.f32.mrf.mxu0  ;;  %v8484_v22 = vpop.f32.mrf.mxu1 }
 0x189   : > { %10460 = vst [vmem:[#allocation17_spill] sm:$0xff] %v8484_v22 }
 0x18a   : > { %v6547_v3 = vpop.f32.mrf.mxu0  ;;  %6750 = vmatmul.mubr.msk.bf16.gmra.mxu0 %vm744_vm1, %v10381_v26  ;;  %v6585_v25 = vpop.f32.mrf.mxu1  ;;  %6788 = vmatmul.mubr.msk.bf16.gmra.mxu1 %vm744_vm1, %v7688_v56  ;;  %v3704_v56 = vrot.slane %v3703_v62, 4 }
 0x18b   : > { %v8491_v21 = vadd.f32 %v6581_v35, %v6547_v3  ;;  %6753 = vmatprep.mubr.msk.bf16.mxu0 %vm744_vm1, %v10424_v18  ;;  %6791 = vmatprep.mubr.msk.bf16.mxu1 %vm744_vm1, %v7707_v7  ;;  %v3714_v3 = vrot.slane %v3713_v20, 4  ;;  %v3718_v35 = vrot.slane %v3716_v31, 5 }
 0x18c   : > { %v2189_v23 = vpop.f32.mrf.mxu0  ;;  %v2369_v61 = vpop.f32.mrf.mxu1  ;;  %v3709_v19 = vsel %vm7299_vm4, %v3704_v56, %v3708_v30 }
 0x18d   : > { %10461 = vst [vmem:[#allocation63_spill] sm:$0xff] %v8491_v21  ;;  %v8497_v22 = vadd.f32 %v2353_v48, %v2189_v23  ;;  %v3719_v29 = vsel %vm7299_vm4, %v3714_v3, %v3718_v35 }
 0x18e   : > { %v8499_v26 = vpop.f32.mrf.mxu0  ;;  %v8501_v44 = vpop.f32.mrf.mxu1 }
 0x190   : > { %v8503_v21 = vpop.f32.mrf.mxu0  ;;  %v8505_v18 = vpop.f32.mrf.mxu1 }
 0x192   : > { %v6551_v10 = vpop.f32.mrf.mxu0  ;;  %6754 = vmatmul.mubr.msk.bf16.gmra.mxu0 %vm744_vm1, %v10425_v9  ;;  %v6589_v50 = vpop.f32.mrf.mxu1  ;;  %6792 = vmatmul.mubr.msk.bf16.gmra.mxu1 %vm744_vm1, %v7725_v8 }
 0x193   : > { %v8511_v54 = vadd.f32 %v6585_v25, %v6551_v10  ;;  %6757 = vmatprep.mubr.msk.bf16.mxu0 %vm744_vm1, %v10432_v47  ;;  %6795 = vmatprep.mubr.msk.bf16.mxu1 %vm744_vm1, %v10445_v45  ;;  %v8527_v25 = vcombine.low %v3709_v19, %v3719_v29 }
 0x194   : > { %v2205_v62 = vpop.f32.mrf.mxu0  ;;  %v2385_v9 = vpop.f32.mrf.mxu1 }
 0x195   : > { %v8521_v20 = vadd.f32 %v2369_v61, %v2205_v62  ;;  %10463 = vst [vmem:[#allocation2_spill] sm:$0xff] %v8527_v25  ;;  %v10466_v61 = vld [vmem:[#allocation7_spill] sm:$0xff] }
 0x196   : > { %v8523_v31 = vpop.f32.mrf.mxu0  ;;  %v8525_v10 = vpop.f32.mrf.mxu1 }
 0x198   : > { %v8529_v47 = vpop.f32.mrf.mxu0  ;;  %v8531_v23 = vpop.f32.mrf.mxu1 }
 0x199   : > { %10464 = vst [vmem:[#allocation64_spill] sm:$0xff] %v8531_v23 }
 0x19a   : > { %v6555_v45 = vpop.f32.mrf.mxu0  ;;  %6758 = vmatmul.mubr.msk.bf16.gmra.mxu0 %vm744_vm1, %v10434_v14  ;;  %v6593_v56 = vpop.f32.mrf.mxu1  ;;  %6796 = vmatmul.mubr.msk.bf16.gmra.mxu1 %vm744_vm1, %v8527_v25  ;;  %v5883_v14 = vcombine.low %v8453_v17, %v8460_v42 }
 0x19b   : > { %v8537_v30 = vadd.f32 %v6589_v50, %v6555_v45  ;;  %6761 = vmatprep.mubr.msk.bf16.mxu0 %vm744_vm1, %v10439_v32  ;;  %6835 = vmatprep.mubr.msk.bf16.mxu1 %vm744_vm1, %v10466_v61  ;;  %v4643_v32 = vsel %vm793_vm0, %v8359_v5, 0 }
 0x19c   : > { %v2221_v3 = vpop.f32.mrf.mxu0  ;;  %v2401_v35 = vpop.f32.mrf.mxu1 }
 0x19d   : > { %10465 = vst [vmem:[#allocation65_spill] sm:$0xff] %v8537_v30  ;;  %v8543_v48 = vadd.f32 %v2385_v9, %v2221_v3  ;;  %v10472_v3 = vld [vmem:[#allocation48_spill] sm:$0xff] }
 0x19e   : > { %v8545_v19 = vpop.f32.mrf.mxu0  ;;  %v8547_v29 = vpop.f32.mrf.mxu1 }
 0x19f   : > { %10467 = vst [vmem:[#allocation7_spill] sm:$0xff] %v8543_v48  ;;  %10468 = vst [vmem:[#allocation66_spill] sm:$0xff] %v8547_v29 }
 0x1a0   : > { %v8551_v62 = vpop.f32.mrf.mxu0  ;;  %v8553_v45 = vpop.f32.mrf.mxu1 }
 0x1a1   : > { %10469 = vst [vmem:[#allocation67_spill] sm:$0xff] %v8551_v62  ;;  %10470 = vst [vmem:[#allocation68_spill] sm:$0xff] %v8553_v45  ;;  %v10478_v62 = vld [vmem:[#allocation26_spill] sm:$0xff] }
 0x1a2   : > { %v6559_v50 = vpop.f32.mrf.mxu0  ;;  %6762 = vmatmul.mubr.msk.bf16.gmra.mxu0 %vm744_vm1, %v5883_v14  ;;  %v6633_v61 = vpop.f32.mrf.mxu1  ;;  %6836 = vmatmul.mubr.msk.bf16.vlgmr.msra.gmra.mxu1 %vm744_vm1, %v7383_v43  ;;  %v10476_v43 = vld [vmem:[#allocation41_spill] sm:$0xff] }
 0x1a3   : > { %v8560_v9 = vadd.f32 %v6593_v56, %v6559_v50  ;;  %6801 = vmatprep.mubr.msk.bf16.mxu0 %vm744_vm1, %v10472_v3  ;;  %6902 = vmatpush3.bf16.msra.mxu1 %v4643_v32  ;;  %v4431_v56 = vsel %vm793_vm0, %v8389_v13, 0  ;;  %v2301_v13 = vadd.f32 %v8377_v59, %v8410_v58 }
 0x1a4   : > { %v2237_v17 = vpop.f32.mrf.mxu0  ;;  %v2667_v42 = vpop.f32.mrf.mxu1  ;;  %6839 = vmatprep.mubr.msk.bf16.mxu1 %vm744_vm1, %v7413_v11 }
 0x1a5   : > { %10471 = vst [vmem:[#allocation69_spill] sm:$0xff] %v8560_v9  ;;  %v8566_v25 = vadd.f32 %v2401_v35, %v2237_v17  ;;  %v10477_v35 = vld [vmem:[#allocation19_spill] sm:$0xff] }
 0x1a6   : > { %v8568_v5 = vpop.f32.mrf.mxu0  ;;  %v6634_v14 = vpop.f32.mrf.mxu1 }
 0x1a7   : > { %10473 = vst [vmem:[#allocation48_spill] sm:$0xff] %v8566_v25  ;;  %10474 = vst [vmem:[#allocation70_spill] sm:$0xff] %v8568_v5 }
 0x1a8   : > { %v8570_v45 = vpop.f32.mrf.mxu0  ;;  %v2670_v50 = vpop.f32.mrf.mxu1 }
 0x1a9   : > { %10475 = vst [vmem:[#allocation71_spill] sm:$0xff] %v8570_v45 }
 0x1aa   : > { %v6599_v9 = vpop.f32.mrf.mxu0  ;;  %6802 = vmatmul.mubr.msk.bf16.vlgmr.msra.gmra.mxu0 %vm744_vm1, %v10476_v43  ;;  %v6637_v32 = vpop.f32.mrf.mxu1  ;;  %6840 = vmatmul.mubr.msk.bf16.gmra.mxu1 %vm744_vm1, %v7433_v36 }
 0x1ab   : > { %6868 = vmatpush3.bf16.msra.mxu0 %v4431_v56  ;;  %6805 = vmatprep.mubr.msk.bf16.mxu0 %vm744_vm1, %v10477_v35  ;;  %v2584_v11 = vadd.f32 %v6599_v9, %v8398_v28  ;;  %v2293_v56 = vadd.f32 %v8384_v15, %v8414_v0  ;;  %v2317_v28 = vadd.f32 %v8412_v34, %v8428_v60  ;;  %v10479_v15 = vld [vmem:[#allocation49_spill] sm:$0xff] }
 0x1ac   : > { %v2455_v3 = vpop.f32.mrf.mxu0  ;;  %v2683_v17 = vpop.f32.mrf.mxu1  ;;  %6843 = vmatprep.mubr.msk.bf16.mxu1 %vm744_vm1, %v7467_v16  ;;  %v8607_v60 = vadd.f32 %v8432_v12, %v8455_v49  ;;  %v8611_v34 = vadd.f32 %v8450_v37, %v8478_v46 }
 0x1ad   : > { %v2582_v45 = vadd.f32 %v2455_v3, %v8408_v1  ;;  %v2796_v43 = vadd.f32 %v6633_v61, %v2584_v11  ;;  %v8602_v11 = vadd.f32 %v8430_v51, %v8448_v6 }
 0x1ae   : > { %v6600_v25 = vpop.f32.mrf.mxu0  ;;  %v6638_v29 = vpop.f32.mrf.mxu1 }
 0x1af   : > { %v2794_v5 = vadd.f32 %v2667_v42, %v2582_v45  ;;  %v2585_v36 = vadd.f32 %v6600_v25, %v2301_v13  ;;  %v2898_v61 = vmul.f32 %v2796_v43, %v2796_v43  ;;  %v2829_v49 = vsel %vm1684_vm8, %v2796_v43, 0.0 }
 0x1b0   : > { %v2458_v35 = vpop.f32.mrf.mxu0  ;;  %v2686_v48 = vpop.f32.mrf.mxu1 }
 0x1b1   : > { %v2797_v30 = vadd.f32 %v6634_v14, %v2585_v36  ;;  %v2583_v23 = vadd.f32 %v2458_v35, %v2293_v56  ;;  %v2896_v1 = vmul.f32 %v2794_v5, %v2794_v5  ;;  %v2826_v6 = vsel %vm1684_vm8, %v2794_v5, 0.0 }
 0x1b2   : > { %v6603_v16 = vpop.f32.mrf.mxu0  ;;  %6806 = vmatmul.mubr.msk.bf16.gmra.mxu0 %vm744_vm1, %v10478_v62  ;;  %v8590_v59 = vpop.f32.mrf.mxu1  ;;  %6844 = vmatmul.mubr.msk.bf16.gmra.mxu1 %vm744_vm1, %v10352_v57  ;;  %v8626_v56 = vadd.f32 %v8457_v4, %v8482_v41 }
 0x1b3   : > { %6809 = vmatprep.mubr.msk.bf16.mxu0 %vm744_vm1, %v10479_v15  ;;  %6847 = vmatprep.mubr.msk.bf16.mxu1 %vm744_vm1, %v10356_v27  ;;  %v2795_v36 = vadd.f32 %v2670_v50, %v2583_v23  ;;  %v2588_v58 = vadd.f32 %v6603_v16, %v8420_v2  ;;  %v6978_v25 = vpack.i.bf16 %v2797_v30, %v2796_v43  ;;  %v2928_v46 = vsel %vm1684_vm8, %v2896_v1, 0.0 }
 0x1b4   : > { %v2471_v0 = vpop.f32.mrf.mxu0  ;;  %v2699_v45 = vpop.f32.mrf.mxu1  ;;  %v2831_v1 = vsel %vm1684_vm8, %v2797_v30, 0.0 }
 0x1b5   : > { %v2586_v9 = vadd.f32 %v2471_v0, %v8426_v40  ;;  %v2827_v51 = vsel %vm1684_vm8, %v2795_v36, 0.0  ;;  %v2897_v23 = vmul.f32 %v2795_v36, %v2795_v36  ;;  %6979 = vrot.lane.b32.xlu0 %v6978_v25, %s7184_s8  ;;  %v6983_v2 = vpack.i.bf16 %v2795_v36, %v2794_v5 }
 0x1b6   : > { %v6604_v16 = vpop.f32.mrf.mxu0  ;;  %v8617_v42 = vpop.f32.mrf.mxu1  ;;  %v2828_v37 = vadd.f32 %v2827_v51, %v2826_v6  ;;  %v2899_v40 = vmul.f32 %v2797_v30, %v2797_v30  ;;  %v2800_v50 = vadd.f32 %v6637_v32, %v2588_v58  ;;  %v2931_v5 = vsel %vm1684_vm8, %v2898_v61, 0.0  ;;  %v10481_v30 = vld [vmem:[#allocation51_spill] sm:$0xff] }
 0x1b7   : > { %v8621_v12 = vadd.f32 %v2683_v17, %v2586_v9  ;;  %v2929_v14 = vsel %vm1684_vm8, %v2897_v23, 0.0  ;;  %v2589_v35 = vadd.f32 %v6604_v16, %v2317_v28  ;;  %v10480_v28 = vld [vmem:[#allocation50_spill] sm:$0xff] }
 0x1b8   : > { %v2474_v3 = vpop.f32.mrf.mxu0  ;;  %v2702_v13 = vpop.f32.mrf.mxu1  ;;  %v2830_v36 = vadd.f32 %v2829_v49, %v2828_v37  ;;  %v2930_v43 = vadd.f32 %v2929_v14, %v2928_v46 }
 0x1b9   : > { %v2900_v17 = vmul.f32 %v8621_v12, %v8621_v12  ;;  %v2801_v0 = vadd.f32 %v6638_v29, %v2589_v35  ;;  %v2587_v25 = vadd.f32 %v2474_v3, %v8434_v33  ;;  %6984 = vrot.lane.b32.xlu0 %v6983_v2, %s7184_s8  ;;  %v2933_v33 = vsel %vm1684_vm8, %v2899_v40, 0.0 }
 0x1ba   : > { %v6607_v32 = vpop.f32.mrf.mxu0  ;;  %6810 = vmatmul.mubr.msk.bf16.gmra.mxu0 %vm744_vm1, %v10480_v28  ;;  %v8636_v41 = vpop.f32.mrf.mxu1  ;;  %v2932_v4 = vadd.f32 %v2931_v5, %v2930_v43  ;;  %v2832_v58 = vadd.f32 %v2831_v1, %v2830_v36  ;;  %6848 = vmatmul.mubr.msk.bf16.gmra.mxu1 %vm744_vm1, %v10370_v55  ;;  %v2902_v29 = vmul.f32 %v2800_v50, %v2800_v50  ;;  %v2833_v9 = vsel %vm1684_vm8, %v8621_v12, 0.0 }
 0x1bb   : > { %v2592_v61 = vadd.f32 %v6607_v32, %v8440_v63  ;;  %6813 = vmatprep.mubr.msk.bf16.mxu0 %vm744_vm1, %v10481_v30  ;;  %v2799_v6 = vadd.f32 %v2686_v48, %v2587_v25  ;;  %6851 = vmatprep.mubr.msk.bf16.mxu1 %vm744_vm1, %v10372_v53  ;;  %v2935_v2 = vsel %vm1684_vm8, %v2900_v17, 0.0  ;;  %v2903_v46 = vmul.f32 %v2801_v0, %v2801_v0 }
 0x1bc   : > { %v2487_v51 = vpop.f32.mrf.mxu0  ;;  %v8646_v23 = vpop.f32.mrf.mxu1  ;;  %v2834_v63 = vadd.f32 %v2833_v9, %v2832_v58  ;;  %v2934_v16 = vadd.f32 %v2933_v33, %v2932_v4  ;;  %v6988_v14 = vpack.i.bf16 %v2801_v0, %v2800_v50  ;;  %v2837_v48 = vsel %vm1684_vm8, %v2800_v50, 0.0 }
 0x1bd   : > { %v2590_v49 = vadd.f32 %v2487_v51, %v8446_v39  ;;  %v2835_v37 = vsel %vm1684_vm8, %v2799_v6, 0.0  ;;  %v2901_v40 = vmul.f32 %v2799_v6, %v2799_v6  ;;  %v2804_v43 = vadd.f32 %v8590_v59, %v2592_v61 }
 0x1be   : > { %v6608_v35 = vpop.f32.mrf.mxu0  ;;  %v6646_v3 = vpop.f32.mrf.mxu1  ;;  %v2936_v5 = vadd.f32 %v2935_v2, %v2934_v16  ;;  %v2836_v36 = vadd.f32 %v2835_v37, %v2834_v63  ;;  %6989 = vrot.lane.b32.xlu1 %v6988_v14, %s7184_s8  ;;  %v6993_v32 = vpack.i.bf16 %v2799_v6, %v8621_v12  ;;  %v2939_v58 = vsel %vm1684_vm8, %v2902_v29, 0.0 }
 0x1bf   : > { %v2937_v1 = vsel %vm1684_vm8, %v2901_v40, 0.0  ;;  %v2802_v25 = vadd.f32 %v2699_v45, %v2590_v49  ;;  %v2593_v39 = vadd.f32 %v6608_v35, %v8602_v11  ;;  %v2839_v59 = vsel %vm1684_vm8, %v2801_v0, 0.0  ;;  %v10482_v11 = vld [vmem:[#allocation52_spill] sm:$0xff]  ;;  %v10483_v40 = vld [vmem:[#allocation22_spill] sm:$0xff] }
 0x1c0   : > { %v2490_v17 = vpop.f32.mrf.mxu0  ;;  %v8659_v4 = vpop.f32.mrf.mxu1  ;;  %v2838_v33 = vadd.f32 %v2837_v48, %v2836_v36  ;;  %v2938_v50 = vadd.f32 %v2937_v1, %v2936_v5  ;;  %v2941_v61 = vsel %vm1684_vm8, %v2903_v46, 0.0  ;;  %v10484_v36 = vld [vmem:[#allocation12_spill] sm:$0xff] }
 0x1c1   : > { %v2591_v9 = vadd.f32 %v2490_v17, %v8607_v60  ;;  %v2904_v45 = vmul.f32 %v2802_v25, %v2802_v25  ;;  %v2805_v51 = vadd.f32 %v8617_v42, %v2593_v39  ;;  %v2906_v60 = vmul.f32 %v2804_v43, %v2804_v43 }
 0x1c2   : > { %v6611_v63 = vpop.f32.mrf.mxu0  ;;  %6814 = vmatmul.mubr.msk.bf16.gmra.mxu0 %vm744_vm1, %v10482_v11  ;;  %v8668_v12 = vpop.f32.mrf.mxu1  ;;  %v2940_v6 = vadd.f32 %v2939_v58, %v2938_v50  ;;  %v2840_v16 = vadd.f32 %v2839_v59, %v2838_v33  ;;  %6852 = vmatmul.mubr.msk.bf16.gmra.mxu1 %vm744_vm1, %v10376_v38  ;;  %v2841_v0 = vsel %vm1684_vm8, %v2802_v25, 0.0  ;;  %v10485_v59 = vld [vmem:[#allocation15_spill] sm:$0xff] }
 0x1c3   : > { %v2803_v29 = vadd.f32 %v2702_v13, %v2591_v9  ;;  %v2596_v2 = vadd.f32 %v6611_v63, %v8467_v24  ;;  %v2943_v49 = vsel %vm1684_vm8, %v2904_v45, 0.0  ;;  %6994 = vrot.lane.b32.xlu1 %v6993_v32, %s7184_s8  ;;  %v6998_v46 = vpack.i.bf16 %v2805_v51, %v2804_v43  ;;  %6817 = vmatprep.mubr.msk.bf16.mxu0 %vm744_vm1, %v10483_v40 }
 0x1c4   : > { %v2503_v42 = vpop.f32.mrf.mxu0  ;;  %v2731_v37 = vpop.f32.mrf.mxu1  ;;  %v2842_v14 = vadd.f32 %v2841_v0, %v2840_v16  ;;  %v2942_v13 = vadd.f32 %v2941_v61, %v2940_v6  ;;  %6855 = vmatprep.mubr.msk.bf16.mxu1 %vm744_vm1, %v10378_v52  ;;  %v2907_v48 = vmul.f32 %v2805_v51, %v2805_v51  ;;  %v2365_v61 = vadd.f32 %v10485_v59, %v8499_v26 }
 0x1c5   : > { %v2843_v24 = vsel %vm1684_vm8, %v2803_v29, 0.0  ;;  %v2905_v35 = vmul.f32 %v2803_v29, %v2803_v29  ;;  %v2808_v5 = vadd.f32 %v8636_v41, %v2596_v2  ;;  %v2594_v1 = vadd.f32 %v2503_v42, %v10484_v36  ;;  %v10487_v42 = vld [vmem:[#allocation28_spill] sm:$0xff] }
 0x1c6   : > { %v6612_v39 = vpop.f32.mrf.mxu0  ;;  %v7003_v17 = vpack.i.bf16 %v2803_v29, %v2802_v25  ;;  %v8683_v32 = vpop.f32.mrf.mxu1  ;;  %v2944_v58 = vadd.f32 %v2943_v49, %v2942_v13  ;;  %v2844_v33 = vadd.f32 %v2843_v24, %v2842_v14  ;;  %v2845_v45 = vsel %vm1684_vm8, %v2804_v43, 0.0 }
 0x1c7   : > { %v2945_v50 = vsel %vm1684_vm8, %v2905_v35, 0.0  ;;  %v2597_v9 = vadd.f32 %v6612_v39, %v8611_v34  ;;  %v2806_v63 = vadd.f32 %v8646_v23, %v2594_v1  ;;  %6999 = vrot.lane.b32.xlu1 %v6998_v46, %s7184_s8  ;;  %v10486_v34 = vld [vmem:[#allocation17_spill] sm:$0xff]  ;;  %v2947_v26 = vsel %vm1684_vm8, %v2906_v60, 0.0 }
 0x1c8   : > { %7004 = vrot.lane.b32.xlu0 %v7003_v17, %s7184_s8  ;;  %v2506_v41 = vpop.f32.mrf.mxu0  ;;  %v8693_v25 = vpop.f32.mrf.mxu1  ;;  %v2846_v6 = vadd.f32 %v2845_v45, %v2844_v33  ;;  %v2946_v16 = vadd.f32 %v2945_v50, %v2944_v58  ;;  %v2357_v0 = vadd.f32 %v10486_v34, %v8503_v21  ;;  %v2847_v43 = vsel %vm1684_vm8, %v2805_v51, 0.0  ;;  %v10489_v21 = vld [vmem:[#allocation24_spill] sm:$0xff]  ;;  %v10490_v17 = vld [vmem:[#allocation45_spill] sm:$0xff]  ;;  %v10491_v33 = vld [vmem:[#allocation63_spill] sm:$0xff] }
 0x1c9   : > { %v2809_v29 = vadd.f32 %v6646_v3, %v2597_v9  ;;  %v2595_v2 = vadd.f32 %v2506_v41, %v8626_v56  ;;  %v2908_v23 = vmul.f32 %v2806_v63, %v2806_v63  ;;  %v2949_v14 = vsel %vm1684_vm8, %v2907_v48, 0.0  ;;  %v10488_v56 = vld [vmem:[#allocation43_spill] sm:$0xff] }
 0x1ca   : > { %v6615_v49 = vpop.f32.mrf.mxu0  ;;  %6818 = vmatmul.mubr.msk.bf16.gmra.mxu0 %vm744_vm1, %v10487_v42  ;;  %v8702_v46 = vpop.f32.mrf.mxu1  ;;  %v2948_v13 = vadd.f32 %v2947_v26, %v2946_v16  ;;  %v2910_v3 = vmul.f32 %v2808_v5, %v2808_v5  ;;  %v2848_v24 = vadd.f32 %v2847_v43, %v2846_v6  ;;  %6856 = vmatmul.mubr.msk.bf16.gmra.mxu1 %vm744_vm1, %v10488_v56  ;;  %v2849_v51 = vsel %vm1684_vm8, %v2806_v63, 0.0 }
 0x1cb   : > { %6821 = vmatprep.mubr.msk.bf16.mxu0 %vm744_vm1, %v10489_v21  ;;  %v2911_v60 = vmul.f32 %v2809_v29, %v2809_v29  ;;  %v2807_v35 = vadd.f32 %v8659_v4, %v2595_v2  ;;  %v7008_v1 = vpack.i.bf16 %v2809_v29, %v2808_v5  ;;  %6859 = vmatprep.mubr.msk.bf16.mxu1 %vm744_vm1, %v10490_v17  ;;  %v2951_v59 = vsel %vm1684_vm8, %v2908_v23, 0.0 }
 0x1cc   : > { %v2519_v36 = vpop.f32.mrf.mxu0  ;;  %v8711_v39 = vpop.f32.mrf.mxu1  ;;  %v2850_v48 = vadd.f32 %v2849_v51, %v2848_v24  ;;  %v2950_v58 = vadd.f32 %v2949_v14, %v2948_v13  ;;  %v2600_v50 = vadd.f32 %v6615_v49, %v10491_v33  ;;  %v2381_v49 = vadd.f32 %v8501_v44, %v8523_v31 }
 0x1cd   : > { %v2598_v9 = vadd.f32 %v2519_v36, %v8497_v22  ;;  %v2851_v45 = vsel %vm1684_vm8, %v2807_v35, 0.0  ;;  %v2909_v41 = vmul.f32 %v2807_v35, %v2807_v35  ;;  %7009 = vrot.lane.b32.xlu1 %v7008_v1, %s7184_s8  ;;  %v7013_v6 = vpack.i.bf16 %v2807_v35, %v2806_v63 }
 0x1ce   : > { %v6616_v4 = vpop.f32.mrf.mxu0  ;;  %v8720_v16 = vpop.f32.mrf.mxu1  ;;  %v2952_v2 = vadd.f32 %v2951_v59, %v2950_v58  ;;  %v2852_v34 = vadd.f32 %v2851_v45, %v2850_v48  ;;  %v2373_v22 = vadd.f32 %v8505_v18, %v8529_v47  ;;  %v2853_v23 = vsel %vm1684_vm8, %v2808_v5, 0.0  ;;  %v10492_v5 = vld [vmem:[#allocation30_spill] sm:$0xff] }
 0x1cf   : > { %v2810_v26 = vadd.f32 %v2731_v37, %v2598_v9  ;;  %v2601_v43 = vadd.f32 %v6616_v4, %v2365_v61  ;;  %v2953_v14 = vsel %vm1684_vm8, %v2909_v41, 0.0  ;;  %7014 = vrot.lane.b32.xlu0 %v7013_v6, %s7184_s8  ;;  %v2955_v24 = vsel %vm1684_vm8, %v2910_v3, 0.0 }
 0x1d0   : > { %v2522_v13 = vpop.f32.mrf.mxu0  ;;  %v2750_v63 = vpop.f32.mrf.mxu1  ;;  %v2854_v51 = vadd.f32 %v2853_v23, %v2852_v34  ;;  %v2954_v35 = vadd.f32 %v2953_v14, %v2952_v2  ;;  %v2812_v37 = vadd.f32 %v8668_v12, %v2600_v50  ;;  %v2855_v61 = vsel %vm1684_vm8, %v2809_v29, 0.0  ;;  %v10493_v29 = vld [vmem:[#allocation32_spill] sm:$0xff] }
 0x1d1   : > { %v2912_v44 = vmul.f32 %v2810_v26, %v2810_v26  ;;  %v2813_v31 = vadd.f32 %v8683_v32, %v2601_v43  ;;  %v2599_v18 = vadd.f32 %v2522_v13, %v2357_v0  ;;  %v8739_v1 = vadd.f32 %v8525_v10, %v8545_v19 }
 0x1d2   : > { %v6619_v47 = vpop.f32.mrf.mxu0  ;;  %6822 = vmatmul.mubr.msk.bf16.gmra.mxu0 %vm744_vm1, %v10492_v5  ;;  %v8735_v36 = vpop.f32.mrf.mxu1  ;;  %v2957_v3 = vsel %vm1684_vm8, %v2911_v60, 0.0  ;;  %v2956_v48 = vadd.f32 %v2955_v24, %v2954_v35  ;;  %v2856_v12 = vadd.f32 %v2855_v61, %v2854_v51  ;;  %6860 = vmatmul.mubr.msk.bf16.gmra.mxu1 %vm744_vm1, %v7707_v7  ;;  %v2857_v32 = vsel %vm1684_vm8, %v2810_v26, 0.0  ;;  %v10494_v61 = vld [vmem:[#allocation67_spill] sm:$0xff] }
 0x1d3   : > { %6825 = vmatprep.mubr.msk.bf16.mxu0 %vm744_vm1, %v10493_v29  ;;  %v2811_v0 = vadd.f32 %v8693_v25, %v2599_v18  ;;  %v2604_v58 = vadd.f32 %v6619_v47, %v8511_v54  ;;  %v7018_v50 = vpack.i.bf16 %v2813_v31, %v2812_v37  ;;  %6863 = vmatprep.mubr.msk.bf16.mxu1 %vm744_vm1, %v7725_v8  ;;  %v2959_v45 = vsel %vm1684_vm8, %v2912_v44, 0.0 }
 0x1d4   : > { %v2535_v33 = vpop.f32.mrf.mxu0  ;;  %v8749_v10 = vpop.f32.mrf.mxu1  ;;  %v2914_v19 = vmul.f32 %v2812_v37, %v2812_v37  ;;  %v2858_v60 = vadd.f32 %v2857_v32, %v2856_v12  ;;  %v2958_v9 = vadd.f32 %v2957_v3, %v2956_v48  ;;  %v2861_v2 = vsel %vm1684_vm8, %v2812_v37, 0.0 }
 0x1d5   : > { %v2602_v59 = vadd.f32 %v2535_v33, %v8521_v20  ;;  %v2859_v41 = vsel %vm1684_vm8, %v2811_v0, 0.0  ;;  %v2913_v4 = vmul.f32 %v2811_v0, %v2811_v0  ;;  %7019 = vrot.lane.b32.xlu1 %v7018_v50, %s7184_s8  ;;  %v7023_v25 = vpack.i.bf16 %v2811_v0, %v2810_v26  ;;  %v10495_v26 = vld [vmem:[#allocation64_spill] sm:$0xff] }
 0x1d6   : > { %v6620_v54 = vpop.f32.mrf.mxu0  ;;  %v6658_v6 = vpop.f32.mrf.mxu1  ;;  %v2960_v34 = vadd.f32 %v2959_v45, %v2958_v9  ;;  %v2915_v43 = vmul.f32 %v2813_v31, %v2813_v31  ;;  %v2860_v23 = vadd.f32 %v2859_v41, %v2858_v60  ;;  %v2816_v13 = vadd.f32 %v8702_v46, %v2604_v58  ;;  %v10497_v60 = vld [vmem:[#allocation36_spill] sm:$0xff]  ;;  %v10499_v41 = vld [vmem:[#allocation34_spill] sm:$0xff] }
 0x1d7   : > { %v2961_v14 = vsel %vm1684_vm8, %v2913_v4, 0.0  ;;  %v2814_v20 = vadd.f32 %v8711_v39, %v2602_v59  ;;  %v2605_v24 = vadd.f32 %v6620_v54, %v2381_v49  ;;  %7024 = vrot.lane.b32.xlu0 %v7023_v25, %s7184_s8  ;;  %v2389_v44 = vadd.f32 %v10495_v26, %v10494_v61  ;;  %v10496_v49 = vld [vmem:[#allocation33_spill] sm:$0xff] }
 0x1d8   : > { %v2538_v51 = vpop.f32.mrf.mxu0  ;;  %v8762_v35 = vpop.f32.mrf.mxu1  ;;  %v2862_v18 = vadd.f32 %v2861_v2, %v2860_v23  ;;  %v2962_v37 = vadd.f32 %v2961_v14, %v2960_v34  ;;  %v2963_v3 = vsel %vm1684_vm8, %v2914_v19, 0.0  ;;  %v2863_v48 = vsel %vm1684_vm8, %v2813_v31, 0.0  ;;  %v10498_v19 = vld [vmem:[#allocation65_spill] sm:$0xff]  ;;  %v10501_v23 = vld [vmem:[#allocation7_spill] sm:$0xff] }
 0x1d9   : > { %v2603_v47 = vadd.f32 %v2538_v51, %v2373_v22  ;;  %v2916_v12 = vmul.f32 %v2814_v20, %v2814_v20  ;;  %v2817_v46 = vadd.f32 %v8720_v16, %v2605_v24  ;;  %v2965_v0 = vsel %vm1684_vm8, %v2915_v43, 0.0  ;;  %v10500_v4 = vld [vmem:[#allocation41_spill] sm:$0xff] }
 0x1da   : > { %v6623_v39 = vpop.f32.mrf.mxu0  ;;  %6826 = vmatmul.mubr.msk.bf16.gmra.mxu0 %vm744_vm1, %v10496_v49  ;;  %v8771_v32 = vpop.f32.mrf.mxu1  ;;  %v2964_v58 = vadd.f32 %v2963_v3, %v2962_v37  ;;  %v2864_v33 = vadd.f32 %v2863_v48, %v2862_v18  ;;  %6864 = vmatmul.mubr.msk.bf16.gmra.mxu1 %vm744_vm1, %v10497_v60  ;;  %v2918_v22 = vmul.f32 %v2816_v13, %v2816_v13  ;;  %v2865_v31 = vsel %vm1684_vm8, %v2814_v20, 0.0 }
 0x1db   : > { %v2815_v50 = vadd.f32 %v2750_v63, %v2603_v47  ;;  %v2608_v9 = vadd.f32 %v6623_v39, %v10498_v19  ;;  %v7028_v59 = vpack.i.bf16 %v2817_v46, %v2816_v13  ;;  %6829 = vmatprep.mubr.msk.bf16.mxu0 %vm744_vm1, %v10499_v41  ;;  %6903 = vmatprep.mubr.msk.bf16.mxu1 %vm744_vm1, %v10500_v4  ;;  %v2967_v34 = vsel %vm1684_vm8, %v2916_v12, 0.0 }
 0x1dc   : > { %v2551_v16 = vpop.f32.mrf.mxu0  ;;  %v2779_v45 = vpop.f32.mrf.mxu1  ;;  %v2866_v54 = vadd.f32 %v2865_v31, %v2864_v33  ;;  %v2966_v25 = vadd.f32 %v2965_v0, %v2964_v58  ;;  %v2919_v43 = vmul.f32 %v2817_v46, %v2817_v46  ;;  %v2869_v3 = vsel %vm1684_vm8, %v2816_v13, 0.0  ;;  %v10502_v13 = vld [vmem:[#allocation38_spill] sm:$0xff] }
 0x1dd   : > { %v2867_v63 = vsel %vm1684_vm8, %v2815_v50, 0.0  ;;  %v2917_v2 = vmul.f32 %v2815_v50, %v2815_v50  ;;  %v2606_v14 = vadd.f32 %v2551_v16, %v10501_v23  ;;  %7029 = vrot.lane.b32.xlu1 %v7028_v59, %s7184_s8  ;;  %v7033_v51 = vpack.i.bf16 %v2815_v50, %v2814_v20 }
 0x1de   : > { %v6624_v24 = vpop.f32.mrf.mxu0  ;;  %v6662_v61 = vpop.f32.mrf.mxu1  ;;  %v2968_v26 = vadd.f32 %v2967_v34, %v2966_v25  ;;  %v2868_v18 = vadd.f32 %v2867_v63, %v2866_v54  ;;  %v2820_v48 = vadd.f32 %v8735_v36, %v2608_v9  ;;  %v2971_v31 = vsel %vm1684_vm8, %v2918_v22, 0.0  ;;  %v10504_v9 = vld [vmem:[#allocation66_spill] sm:$0xff]  ;;  %v10505_v63 = vld [vmem:[#allocation19_spill] sm:$0xff] }
 0x1df   : > { %v2969_v37 = vsel %vm1684_vm8, %v2917_v2, 0.0  ;;  %v2609_v47 = vadd.f32 %v6624_v24, %v8739_v1  ;;  %v2818_v12 = vadd.f32 %v8749_v10, %v2606_v14  ;;  %7034 = vrot.lane.b32.xlu0 %v7033_v51, %s7184_s8  ;;  %v2871_v19 = vsel %vm1684_vm8, %v2817_v46, 0.0  ;;  %v10503_v10 = vld [vmem:[#allocation70_spill] sm:$0xff]  ;;  %v10507_v24 = vld [vmem:[#allocation69_spill] sm:$0xff] }
 0x1e0   : > { %v2554_v39 = vpop.f32.mrf.mxu0  ;;  %v8792_v0 = vpop.f32.mrf.mxu1  ;;  %v2870_v58 = vadd.f32 %v2869_v3, %v2868_v18  ;;  %v2970_v20 = vadd.f32 %v2969_v37, %v2968_v26  ;;  %v2413_v59 = vadd.f32 %v10504_v9, %v10503_v10  ;;  %v2973_v4 = vsel %vm1684_vm8, %v2919_v43, 0.0  ;;  %v10508_v26 = vld [vmem:[#allocation48_spill] sm:$0xff] }
 0x1e1   : > { %v2821_v33 = vadd.f32 %v6658_v6, %v2609_v47  ;;  %v2607_v50 = vadd.f32 %v2554_v39, %v2389_v44  ;;  %v2920_v1 = vmul.f32 %v2818_v12, %v2818_v12  ;;  %v10506_v6 = vld [vmem:[#allocation14_spill] sm:$0xff]  ;;  %v2922_v44 = vmul.f32 %v2820_v48, %v2820_v48  ;;  %v10510_v10 = vld [vmem:[#allocation68_spill] sm:$0xff] }
 0x1e2   : > { %v6627_v16 = vpop.f32.mrf.mxu0  ;;  %6830 = vmatmul.mubr.msk.bf16.gmra.mxu0 %vm744_vm1, %v10502_v13  ;;  %v6701_v36 = vpop.f32.mrf.mxu1  ;;  %v2972_v54 = vadd.f32 %v2971_v31, %v2970_v20  ;;  %v2872_v25 = vadd.f32 %v2871_v19, %v2870_v58  ;;  %6904 = vmatmul.mubr.msk.bf16.vlgmr.msra.gmra.mxu1 %vm744_vm1, %v10505_v63  ;;  %v2873_v46 = vsel %vm1684_vm8, %v2818_v12, 0.0  ;;  %v10509_v19 = vld [vmem:[#allocation71_spill] sm:$0xff] }
 0x1e3   : > { %6869 = vmatprep.mubr.msk.bf16.mxu0 %vm744_vm1, %v10506_v6  ;;  %v2819_v22 = vadd.f32 %v8762_v35, %v2607_v50  ;;  %v7038_v34 = vpack.i.bf16 %v2821_v33, %v2820_v48  ;;  %6907 = vmatprep.mubr.msk.bf16.mxu1 %vm744_vm1, %v10478_v62  ;;  %v2612_v51 = vadd.f32 %v6627_v16, %v10507_v24  ;;  %v2975_v37 = vsel %vm1684_vm8, %v2920_v1, 0.0 }
 0x1e4   : > { %v2567_v2 = vpop.f32.mrf.mxu0  ;;  %v3363_v23 = vpop.f32.mrf.mxu1  ;;  %v2874_v43 = vadd.f32 %v2873_v46, %v2872_v25  ;;  %v2974_v14 = vadd.f32 %v2973_v4, %v2972_v54  ;;  %v2405_v9 = vadd.f32 %v10510_v10, %v10509_v19  ;;  %v2877_v16 = vsel %vm1684_vm8, %v2820_v48, 0.0  ;;  %v10511_v48 = vld [vmem:[#allocation16_spill] sm:$0xff] }
 0x1e5   : > { %v2610_v18 = vadd.f32 %v2567_v2, %v10508_v26  ;;  %v2875_v47 = vsel %vm1684_vm8, %v2819_v22, 0.0  ;;  %v2921_v3 = vmul.f32 %v2819_v22, %v2819_v22  ;;  %7039 = vrot.lane.b32.xlu1 %v7038_v34, %s7184_s8  ;;  %v7043_v39 = vpack.i.bf16 %v2819_v22, %v2818_v12 }
 0x1e6   : > { %v6628_v35 = vpop.f32.mrf.mxu0  ;;  %v6702_v58 = vpop.f32.mrf.mxu1  ;;  %v2976_v20 = vadd.f32 %v2975_v37, %v2974_v14  ;;  %v2876_v50 = vadd.f32 %v2875_v47, %v2874_v43  ;;  %v2923_v4 = vmul.f32 %v2821_v33, %v2821_v33  ;;  %v2979_v63 = vsel %vm1684_vm8, %v2922_v44, 0.0  ;;  %v10512_v44 = vld [vmem:[#allocation18_spill] sm:$0xff] }
 0x1e7   : > { %v2822_v31 = vadd.f32 %v2779_v45, %v2610_v18  ;;  %v2613_v62 = vadd.f32 %v6628_v35, %v2413_v59  ;;  %v2977_v1 = vsel %vm1684_vm8, %v2921_v3, 0.0  ;;  %7044 = vrot.lane.b32.xlu0 %v7043_v39, %s7184_s8  ;;  %v2824_v46 = vadd.f32 %v8771_v32, %v2612_v51 }
 0x1e8   : > { %v2570_v54 = vpop.f32.mrf.mxu0  ;;  %v3366_v25 = vpop.f32.mrf.mxu1  ;;  %v2878_v12 = vadd.f32 %v2877_v16, %v2876_v50  ;;  %v2978_v6 = vadd.f32 %v2977_v1, %v2976_v20  ;;  %v2879_v45 = vsel %vm1684_vm8, %v2821_v33, 0.0  ;;  %v2981_v32 = vsel %vm1684_vm8, %v2923_v4, 0.0 }
 0x1e9   : > { %v2924_v59 = vmul.f32 %v2822_v31, %v2822_v31  ;;  %v2825_v22 = vadd.f32 %v6662_v61, %v2613_v62  ;;  %v2611_v2 = vadd.f32 %v2570_v54, %v2405_v9  ;;  %v2881_v61 = vsel %vm1684_vm8, %v2822_v31, 0.0 }
 0x1ea   : > { %v6667_v34 = vpop.f32.mrf.mxu0  ;;  %6870 = vmatmul.mubr.msk.bf16.vlgmr.msra.gmra.mxu0 %vm744_vm1, %v10511_v48  ;;  %v6705_v43 = vpop.f32.mrf.mxu1  ;;  %v2980_v14 = vadd.f32 %v2979_v63, %v2978_v6  ;;  %v2880_v24 = vadd.f32 %v2879_v45, %v2878_v12  ;;  %6908 = vmatmul.mubr.msk.bf16.gmra.mxu1 %vm744_vm1, %v10479_v15 }
 0x1eb   : > { %v8824_v26 = vadd.f32 %v6701_v36, %v6667_v34  ;;  %6873 = vmatprep.mubr.msk.bf16.mxu0 %vm744_vm1, %v10512_v44  ;;  %v2823_v33 = vadd.f32 %v8792_v0, %v2611_v2  ;;  %v7048_v18 = vpack.i.bf16 %v2825_v22, %v2824_v46  ;;  %6911 = vmatprep.mubr.msk.bf16.mxu1 %vm744_vm1, %v10480_v28  ;;  %v2983_v15 = vsel %vm1684_vm8, %v2924_v59, 0.0 }
 0x1ec   : > { %v3199_v51 = vpop.f32.mrf.mxu0  ;;  %v3379_v37 = vpop.f32.mrf.mxu1  ;;  %v2926_v36 = vmul.f32 %v2824_v46, %v2824_v46  ;;  %v2882_v47 = vadd.f32 %v2881_v61, %v2880_v24  ;;  %v2982_v3 = vadd.f32 %v2981_v32, %v2980_v14  ;;  %v2885_v28 = vsel %vm1684_vm8, %v2824_v46, 0.0 }
 0x1ed   : > { %v8835_v35 = vadd.f32 %v3363_v23, %v3199_v51  ;;  %v2883_v39 = vsel %vm1684_vm8, %v2823_v33, 0.0  ;;  %v2925_v20 = vmul.f32 %v2823_v33, %v2823_v33  ;;  %7049 = vrot.lane.b32.xlu1 %v7048_v18, %s7184_s8  ;;  %v7053_v0 = vpack.i.bf16 %v2823_v33, %v2822_v31 }
 0x1ee   : > { %v6668_v50 = vpop.f32.mrf.mxu0  ;;  %v6706_v62 = vpop.f32.mrf.mxu1  ;;  %v2984_v19 = vadd.f32 %v2983_v15, %v2982_v3  ;;  %v2884_v10 = vadd.f32 %v2883_v39, %v2882_v47  ;;  %v2927_v16 = vmul.f32 %v2825_v22, %v2825_v22  ;;  %v2987_v31 = vsel %vm1684_vm8, %v2926_v36, 0.0 }
 0x1ef   : > { %v8840_v9 = vadd.f32 %v6702_v58, %v6668_v50  ;;  %v2985_v23 = vsel %vm1684_vm8, %v2925_v20, 0.0  ;;  %7054 = vrot.lane.b32.xlu0 %v7053_v0, %s7184_s8  ;;  %v2887_v6 = vsel %vm1684_vm8, %v2825_v22, 0.0  ;;  %v10513_v58 = vld [vmem:[#allocation20_spill] sm:$0xff] }
 0x1f0   : > { %v3202_v4 = vpop.f32.mrf.mxu0  ;;  %v3382_v1 = vpop.f32.mrf.mxu1  ;;  %v2886_v54 = vadd.f32 %v2885_v28, %v2884_v10  ;;  %v2986_v63 = vadd.f32 %v2985_v23, %v2984_v19  ;;  %v10516_v28 = vld [vmem:[#allocation6_spill] sm:$0xff] }
 0x1f1   : > { %v8845_v12 = vadd.f32 %v3366_v25, %v3202_v4  ;;  %v2989_v25 = vsel %vm1684_vm8, %v2927_v16, 0.0  ;;  %v10517_v4 = vld [vmem:[#allocation3_spill] sm:$0xff] }
 0x1f2   : > { %v6671_v45 = vpop.f32.mrf.mxu0  ;;  %6874 = vmatmul.mubr.msk.bf16.gmra.mxu0 %vm744_vm1, %v10513_v58  ;;  %v6709_v46 = vpop.f32.mrf.mxu1  ;;  %v8851_v59 = vadd.f32 %v2887_v6, %v2886_v54  ;;  %v2988_v2 = vadd.f32 %v2987_v31, %v2986_v63  ;;  %6912 = vmatmul.mubr.msk.bf16.gmra.mxu1 %vm744_vm1, %v10481_v30  ;;  %v1686_v63 = vsel %vm1684_vm8, %v10516_v28, 0.0 }
 0x1f3   : > { %v8853_v34 = vadd.f32 %v6705_v43, %v6671_v45  ;;  %6877 = vmatprep.mubr.msk.bf16.mxu0 %vm744_vm1, %v10352_v57  ;;  %6915 = vmatprep.mubr.msk.bf16.mxu1 %vm744_vm1, %v10482_v11 }
 0x1f4   : > { %10514 = vst [vmem:[#allocation26_spill] sm:$0xff] %v8851_v59  ;;  %v3215_v48 = vpop.f32.mrf.mxu0  ;;  %v3395_v22 = vpop.f32.mrf.mxu1  ;;  %v8862_v14 = vadd.f32 %v2989_v25, %v2988_v2  ;;  %v10518_v2 = vld [vmem:[#allocation9_spill] sm:$0xff] }
 0x1f5   : > { %v8864_v24 = vadd.f32 %v3379_v37, %v3215_v48  ;;  %v1757_v25 = vmul.f32 %v10518_v2, %v10518_v2  ;;  %v1685_v48 = vsel %vm1684_vm8, %v10517_v4, 0.0 }
 0x1f6   : > { %10515 = vst [vmem:[#allocation49_spill] sm:$0xff] %v8862_v14  ;;  %v6672_v44 = vpop.f32.mrf.mxu0  ;;  %v6710_v43 = vpop.f32.mrf.mxu1 }
 0x1f7   : > { %v8866_v32 = vadd.f32 %v6706_v62, %v6672_v44 }
 0x1f8   : > { %v3218_v61 = vpop.f32.mrf.mxu0  ;;  %v3398_v30 = vpop.f32.mrf.mxu1 }
 0x1f9   : > { %v8868_v33 = vadd.f32 %v3382_v1, %v3218_v61 }
 0x1fa   : > { %v6675_v57 = vpop.f32.mrf.mxu0  ;;  %6878 = vmatmul.mubr.msk.bf16.gmra.mxu0 %vm744_vm1, %v10356_v27  ;;  %v6713_v51 = vpop.f32.mrf.mxu1  ;;  %6916 = vmatmul.mubr.msk.bf16.gmra.mxu1 %vm744_vm1, %v10483_v40 }
 0x1fb   : > { %v8872_v18 = vadd.f32 %v6709_v46, %v6675_v57  ;;  %6881 = vmatprep.mubr.msk.bf16.mxu0 %vm744_vm1, %v10370_v55  ;;  %6919 = vmatprep.mubr.msk.bf16.mxu1 %vm744_vm1, %v10487_v42 }
 0x1fc   : > { %v3231_v11 = vpop.f32.mrf.mxu0  ;;  %v3411_v37 = vpop.f32.mrf.mxu1 }
 0x1fd   : > { %v8880_v36 = vadd.f32 %v3395_v22, %v3231_v11 }
 0x1fe   : > { %v6676_v47 = vpop.f32.mrf.mxu0  ;;  %v6714_v3 = vpop.f32.mrf.mxu1 }
 0x1ff   : > { %v8882_v15 = vadd.f32 %v6710_v43, %v6676_v47  ;;  %v7159_v47 = vld [vmem:[%s7253_s30 + $0xd4] sm:$0x1] }
 0x200   : > { %v3234_v27 = vpop.f32.mrf.mxu0  ;;  %v3414_v39 = vpop.f32.mrf.mxu1 }
 0x201   : > { %v8884_v20 = vadd.f32 %v3398_v30, %v3234_v27  ;;  %v1688_v27 = vsel %vm1684_vm8, %v10518_v2, 0.0 }
 0x202   : > { %v6679_v50 = vpop.f32.mrf.mxu0  ;;  %6882 = vmatmul.mubr.msk.bf16.gmra.mxu0 %vm744_vm1, %v10372_v53  ;;  %v6717_v55 = vpop.f32.mrf.mxu1  ;;  %6920 = vmatmul.mubr.msk.bf16.gmra.mxu1 %vm744_vm1, %v10489_v21  ;;  %v1756_v53 = vmul.f32 %v10516_v28, %v10516_v28 }
 0x203   : > { %v8888_v40 = vadd.f32 %v6713_v51, %v6679_v50  ;;  %6885 = vmatprep.mubr.msk.bf16.mxu0 %vm744_vm1, %v10376_v38  ;;  %6923 = vmatprep.mubr.msk.bf16.mxu1 %vm744_vm1, %v10492_v5  ;;  %v1755_v38 = vmul.f32 %v10517_v4, %v10517_v4  ;;  %v7158_v51 = vld [vmem:[%s7253_s30 + $0xcc] sm:$0xf]  ;;  %v10519_v50 = vld [vmem:[#allocation4_spill] sm:$0xff] }
 0x204   : > { %v3247_v42 = vpop.f32.mrf.mxu0  ;;  %v3427_v0 = vpop.f32.mrf.mxu1  ;;  %v1788_v31 = vsel %vm1684_vm8, %v1756_v53, 0.0  ;;  %v5969_v11 = vrot.slane %v7158_v51, 9 }
 0x205   : > { %v8896_v62 = vadd.f32 %v3411_v37, %v3247_v42 }
 0x206   : > { %v6680_v19 = vpop.f32.mrf.mxu0  ;;  %v6718_v10 = vpop.f32.mrf.mxu1 }
 0x207   : > { %v8900_v16 = vadd.f32 %v6714_v3, %v6680_v19  ;;  %v4632_v3 = vrot.slane %v7159_v47, 5 }
 0x208   : > { %v3250_v23 = vpop.f32.mrf.mxu0  ;;  %v3430_v21 = vpop.f32.mrf.mxu1 }
 0x209   : > { %v8904_v1 = vadd.f32 %v3414_v39, %v3250_v23  ;;  %v1790_v39 = vsel %vm1684_vm8, %v1757_v25, 0.0 }
 0x20a   : > { %v6683_v54 = vpop.f32.mrf.mxu0  ;;  %6886 = vmatmul.mubr.msk.bf16.gmra.mxu0 %vm744_vm1, %v10378_v52  ;;  %v6721_v5 = vpop.f32.mrf.mxu1  ;;  %6924 = vmatmul.mubr.msk.bf16.gmra.mxu1 %vm744_vm1, %v10493_v29  ;;  %v7157_v52 = vld [vmem:[%s7253_s30 + $0xd0] sm:$0xf]  ;;  %v1787_v29 = vsel %vm1684_vm8, %v1755_v38, 0.0  ;;  %s6054_s30 = sshll.u32 %s10665_s15, 8 }
 0x20b   : > { %v8911_v6 = vadd.f32 %v6717_v55, %v6683_v54  ;;  %6889 = vmatprep.mubr.msk.bf16.mxu0 %vm744_vm1, %v10488_v56  ;;  %6927 = vmatprep.mubr.msk.bf16.mxu1 %vm744_vm1, %v10496_v49  ;;  %v4629_v46 = vrot.slane %v7157_v52, 5  ;;  %v1687_v56 = vadd.f32 %v1686_v63, %v1685_v48  ;;  %v1789_v44 = vadd.f32 %v1788_v31, %v1787_v29  ;;  %v10522_v29 = vld [vmem:[#allocation10_spill] sm:$0xff]  ;;  %s9017_s11 = scalar_lea.vmem %s10122_s2, %s6054_s30 }
 0x20c   : > { %v3263_v45 = vpop.f32.mrf.mxu0  ;;  %v3443_v58 = vpop.f32.mrf.mxu1  ;;  %v1758_v55 = vmul.f32 %v10519_v50, %v10519_v50 }
 0x20d   : > { %v8925_v22 = vadd.f32 %v3427_v0, %v3263_v45  ;;  %v4631_v37 = vrot.slane %v4629_v46, 4  ;;  %v1689_v0 = vadd.f32 %v1688_v27, %v1687_v56  ;;  %v1791_v19 = vadd.f32 %v1790_v39, %v1789_v44 }
 0x20e   : > { %v6684_v43 = vpop.f32.mrf.mxu0  ;;  %v6722_v61 = vpop.f32.mrf.mxu1  ;;  %v4630_v63 = vsel %vm7721_vm7, %v5969_v11, %v4629_v46  ;;  %v1792_v31 = vsel %vm1684_vm8, %v1758_v55, 0.0  ;;  %v1760_v46 = vmul.f32 %v10522_v29, %v10522_v29 }
 0x20f   : > { %v8927_v30 = vadd.f32 %v6718_v10, %v6684_v43  ;;  %v1793_v25 = vadd.f32 %v1792_v31, %v1791_v19  ;;  %v10523_v19 = vld [vmem:[#allocation11_spill] sm:$0xff] }
 0x210   : > { %v3266_v49 = vpop.f32.mrf.mxu0  ;;  %v3446_v57 = vpop.f32.mrf.mxu1  ;;  %v1796_v39 = vsel %vm1684_vm8, %v1760_v46, 0.0 }
 0x211   : > { %v8936_v42 = vadd.f32 %v3430_v21, %v3266_v49 }
 0x212   : > { %v6687_v10 = vpop.f32.mrf.mxu0  ;;  %6890 = vmatmul.mubr.msk.bf16.gmra.mxu0 %vm744_vm1, %v10490_v17  ;;  %v6725_v53 = vpop.f32.mrf.mxu1  ;;  %6928 = vmatmul.mubr.msk.bf16.gmra.mxu1 %vm744_vm1, %v10499_v41  ;;  %v4633_v17 = vsel %vm7721_vm7, %v4631_v37, %v4632_v3  ;;  %v10521_v41 = vld [vmem:[#allocation5_spill] sm:$0xff] }
 0x213   : > { %v8940_v23 = vadd.f32 %v6721_v5, %v6687_v10  ;;  %6893 = vmatprep.mubr.msk.bf16.mxu0 %vm744_vm1, %v7707_v7  ;;  %6931 = vmatprep.mubr.msk.bf16.mxu1 %vm744_vm1, %v10502_v13  ;;  %v1690_v5 = vsel %vm1684_vm8, %v10519_v50, 0.0  ;;  %v1759_v45 = vmul.f32 %v10521_v41, %v10521_v41  ;;  %v5971_v44 = vcombine.low %v4630_v63, %v4633_v17 }
 0x214   : > { %v3279_v38 = vpop.f32.mrf.mxu0  ;;  %v3459_v54 = vpop.f32.mrf.mxu1  ;;  %v1691_v52 = vadd.f32 %v1690_v5, %v1689_v0  ;;  %v1692_v51 = vsel %vm1684_vm8, %v10521_v41, 0.0  ;;  %v1761_v10 = vmul.f32 %v10523_v19, %v10523_v19 }
 0x215   : > { %v8957_v7 = vadd.f32 %v3443_v58, %v3279_v38  ;;  %v1794_v11 = vsel %vm1684_vm8, %v1759_v45, 0.0  ;;  %v1696_v45 = vsel %vm1684_vm8, %v10523_v19, 0.0 }
 0x216   : > { %v6688_v48 = vpop.f32.mrf.mxu0  ;;  %v6726_v13 = vpop.f32.mrf.mxu1  ;;  %v1693_v58 = vadd.f32 %v1692_v51, %v1691_v52  ;;  %v1795_v47 = vadd.f32 %v1794_v11, %v1793_v25  ;;  %v10524_v52 = vld [vmem:[#allocation8_spill] sm:$0xff] }
 0x217   : > { %v8961_v56 = vadd.f32 %v6722_v61, %v6688_v48  ;;  %v1694_v61 = vsel %vm1684_vm8, %v10522_v29, 0.0  ;;  %v1762_v25 = vmul.f32 %v10524_v52, %v10524_v52 }
 0x218   : > { %v3282_v43 = vpop.f32.mrf.mxu0  ;;  %v3462_v49 = vpop.f32.mrf.mxu1  ;;  %v1797_v21 = vadd.f32 %v1796_v39, %v1795_v47  ;;  %v1698_v47 = vsel %vm1684_vm8, %v10524_v52, 0.0 }
 0x219   : > { %v8966_v37 = vadd.f32 %v3446_v57, %v3282_v43  ;;  %v10525_v43 = vld [vmem:[#allocation2_spill] sm:$0xff] }
 0x21a   : > { %v6691_v3 = vpop.f32.mrf.mxu0  ;;  %6894 = vmatmul.mubr.msk.bf16.gmra.mxu0 %vm744_vm1, %v7725_v8  ;;  %v6729_v27 = vpop.f32.mrf.mxu1  ;;  %6932 = vmatmul.mubr.msk.bf16.gmra.mxu1 %vm744_vm1, %v5971_v44  ;;  %v1695_v8 = vadd.f32 %v1694_v61, %v1693_v58  ;;  %v10526_v61 = vld [vmem:[#allocation53_spill] sm:$0xff] }
 0x21b   : > { %v8973_v55 = vadd.f32 %v6725_v53, %v6691_v3  ;;  %6897 = vmatprep.mubr.msk.bf16.mxu0 %vm744_vm1, %v10497_v60  ;;  %v1798_v60 = vsel %vm1684_vm8, %v1761_v10, 0.0  ;;  %v1800_v3 = vsel %vm1684_vm8, %v1762_v25, 0.0 }
 0x21c   : > { %v3295_v57 = vpop.f32.mrf.mxu0  ;;  %v3475_v0 = vpop.f32.mrf.mxu1  ;;  %v1799_v46 = vadd.f32 %v1798_v60, %v1797_v21 }
 0x21d   : > { %v8980_v38 = vadd.f32 %v3459_v54, %v3295_v57  ;;  %v1697_v54 = vadd.f32 %v1696_v45, %v1695_v8 }
 0x21e   : > { %v6692_v63 = vpop.f32.mrf.mxu0  ;;  %v6730_v17 = vpop.f32.mrf.mxu1  ;;  %v1801_v10 = vadd.f32 %v1800_v3, %v1799_v46 }
 0x21f   : > { %v8982_v5 = vadd.f32 %v6726_v13, %v6692_v63  ;;  %v1699_v57 = vadd.f32 %v1698_v47, %v1697_v54 }
 0x220   : > { %v3298_v53 = vpop.f32.mrf.mxu0  ;;  %v3478_v31 = vpop.f32.mrf.mxu1 }
 0x221   : > { %v8989_v48 = vadd.f32 %v3462_v49, %v3298_v53  ;;  %v1763_v49 = vmul.f32 %v10526_v61, %v10526_v61  ;;  %v10529_v53 = vld [vmem:[#allocation55_spill] sm:$0xff] }
 0x222   : > { %v6695_v44 = vpop.f32.mrf.mxu0  ;;  %6898 = vmatmul.mubr.msk.bf16.gmra.mxu0 %vm744_vm1, %v10525_v43  ;;  %v6769_v13 = vpop.f32.mrf.mxu1  ;;  %v1764_v45 = vmul.f32 %v10529_v53, %v10529_v53 }
 0x223   : > { %v8993_v51 = vadd.f32 %v6729_v27, %v6695_v44  ;;  %v1700_v27 = vsel %vm1684_vm8, %v10526_v61, 0.0  ;;  %v1802_v44 = vsel %vm1684_vm8, %v1763_v49, 0.0 }
 0x224   : > { %v3311_v11 = vpop.f32.mrf.mxu0  ;;  %v3765_v58 = vpop.f32.mrf.mxu1  ;;  %v1701_v46 = vadd.f32 %v1700_v27, %v1699_v57  ;;  %v1803_v47 = vadd.f32 %v1802_v44, %v1801_v10 }
 0x225   : > { %v9000_v39 = vadd.f32 %v3475_v0, %v3311_v11 }
 0x226   : > { %v6696_v8 = vpop.f32.mrf.mxu0  ;;  %v6770_v21 = vpop.f32.mrf.mxu1 }
 0x227   : > { %10527 = vst [vmem:[#allocation50_spill] sm:$0xff] %v9000_v39  ;;  %v9002_v63 = vadd.f32 %v6730_v17, %v6696_v8  ;;  %v6980_v60 = vpop.permute.xlu0 %6979  ;;  %v1702_v17 = vsel %vm1684_vm8, %v10529_v53, 0.0  ;;  %v10531_v8 = vld [vmem:[#allocation13_spill] sm:$0xff] }
 0x228   : > { %v3314_v25 = vpop.f32.mrf.mxu0  ;;  %v6982_v43 = vunpack.i.h.bf16 %v6980_v60  ;;  %v6981_v0 = vunpack.i.l.bf16 %v6980_v60  ;;  %v3768_v54 = vpop.f32.mrf.mxu1  ;;  %v1765_v27 = vmul.f32 %v10531_v8, %v10531_v8  ;;  %v1804_v60 = vsel %vm1684_vm8, %v1764_v45, 0.0 }
 0x229   : > { %10528 = vst [vmem:[#allocation51_spill] sm:$0xff] %v9002_v63  ;;  %v9010_v11 = vadd.f32 %v3478_v31, %v3314_v25  ;;  %v1703_v63 = vadd.f32 %v1702_v17, %v1701_v46 }
 0x22a   : > { %v6735_v3 = vpop.f32.mrf.mxu0  ;;  %v3129_v49 = vsel %vm1684_vm8, %v10519_v50, %v6982_v43  ;;  %v3128_v31 = vsel %vm1684_vm8, %v10518_v2, %v6981_v0  ;;  %v6773_v10 = vpop.f32.mrf.mxu1 }
 0x22b   : > { %10530 = vst [vmem:[#allocation52_spill] sm:$0xff] %v9010_v11  ;;  %v3666_v57 = vadd.f32 %v6735_v3, %v8824_v26  ;;  %v6060_v25 = vpack.c.bf16 %v3129_v49, %v3129_v49  ;;  %v6059_v44 = vpack.c.bf16 %v3128_v31, %v3128_v31  ;;  %v6985_v14 = vpop.permute.xlu0 %6984  ;;  %v10533_v26 = vld [vmem:[#allocation54_spill] sm:$0xff]  ;;  %v1805_v49 = vadd.f32 %v1804_v60, %v1803_v47 }
 0x22c   : > { %v3537_v59 = vpop.f32.mrf.mxu0  ;;  %v6987_v50 = vunpack.i.h.bf16 %v6985_v14  ;;  %v6986_v43 = vunpack.i.l.bf16 %v6985_v14  ;;  %v9030_v0 = vpop.f32.mrf.mxu1  ;;  %v1766_v3 = vmul.f32 %v10533_v26, %v10533_v26  ;;  %v1704_v47 = vsel %vm1684_vm8, %v10531_v8, 0.0 }
 0x22d   : > { %v9027_v11 = vadd.f32 %v6769_v13, %v3666_v57  ;;  %v3664_v2 = vadd.f32 %v3537_v59, %v8835_v35  ;;  %5432 = vst.msk [vmem:[%s9017_s11 + $0x14] sm:$0xf] %vm5426_vm9, %v6060_v25  ;;  %5431 = vst.msk [vmem:[%s9017_s11 + $0x10] sm:$0xf] %vm5426_vm9, %v6059_v44  ;;  %v1806_v60 = vsel %vm1684_vm8, %v1765_v27, 0.0 }
 0x22e   : > { %v6736_v45 = vpop.f32.mrf.mxu0  ;;  %v3127_v13 = vsel %vm1684_vm8, %v10516_v28, %v6987_v50  ;;  %v3126_v35 = vsel %vm1684_vm8, %v10517_v4, %v6986_v43  ;;  %v9042_v59 = vpop.f32.mrf.mxu1  ;;  %v1706_v4 = vsel %vm1684_vm8, %v10533_v26, 0.0  ;;  %v1808_v44 = vsel %vm1684_vm8, %v1766_v3, 0.0 }
 0x22f   : > { %10532 = vst [vmem:[#allocation22_spill] sm:$0xff] %v9027_v11  ;;  %v6056_v14 = vpack.c.bf16 %v3127_v13, %v3127_v13  ;;  %v6055_v31 = vpack.c.bf16 %v3126_v35, %v3126_v35  ;;  %v9044_v57 = vadd.f32 %v3765_v58, %v3664_v2  ;;  %v3667_v46 = vadd.f32 %v6736_v45, %v8840_v9 }
 0x230   : > { %v3540_v17 = vpop.f32.mrf.mxu0  ;;  %v9051_v25 = vpop.f32.mrf.mxu1  ;;  %v1705_v50 = vadd.f32 %v1704_v47, %v1703_v63  ;;  %v1807_v35 = vadd.f32 %v1806_v60, %v1805_v49 }
 0x231   : > { %10534 = vst [vmem:[#allocation12_spill] sm:$0xff] %v9044_v57  ;;  %v3665_v28 = vadd.f32 %v3540_v17, %v8845_v12  ;;  %5428 = vst.msk [vmem:[%s9017_s11 + $0x4] sm:$0xf] %vm5426_vm9, %v6056_v14  ;;  %v9060_v9 = vadd.f32 %v6770_v21, %v3667_v46  ;;  %v6990_v58 = vpop.permute.xlu1 %6989  ;;  %v10537_v17 = vld [vmem:[#allocation21_spill] sm:$0xff]  ;;  %v3924_v3 = vsel %vm1684_vm8, %v9044_v57, 0.0  ;;  %v3994_v21 = vmul.f32 %v9044_v57, %v9044_v57 }
 0x232   : > { %5427 = vst.msk [vmem:[%s9017_s11] sm:$0xf] %vm5426_vm9, %v6055_v31  ;;  %v6739_v43 = vpop.f32.mrf.mxu0  ;;  %v6992_v2 = vunpack.i.h.bf16 %v6990_v58  ;;  %v6991_v27 = vunpack.i.l.bf16 %v6990_v58  ;;  %v9065_v13 = vpop.f32.mrf.mxu1  ;;  %v1708_v63 = vsel %vm1684_vm8, %v10537_v17, 0.0  ;;  %v1707_v47 = vadd.f32 %v1706_v4, %v1705_v50 }
 0x233   : > { %10535 = vst [vmem:[#allocation15_spill] sm:$0xff] %v9060_v9  ;;  %v9062_v45 = vadd.f32 %v3768_v54, %v3665_v28  ;;  %v3670_v12 = vadd.f32 %v6739_v43, %v8853_v34 }
 0x234   : > { %v3553_v14 = vpop.f32.mrf.mxu0  ;;  %v3133_v31 = vsel %vm1684_vm8, %v10524_v52, %v6992_v2  ;;  %v3132_v34 = vsel %vm1684_vm8, %v10523_v19, %v6991_v27  ;;  %v9081_v46 = vpop.f32.mrf.mxu1  ;;  %v3927_v52 = vsel %vm1684_vm8, %v9027_v11, 0.0 }
 0x235   : > { %10536 = vst [vmem:[#allocation17_spill] sm:$0xff] %v9062_v45  ;;  %v3925_v54 = vsel %vm1684_vm8, %v9062_v45, 0.0  ;;  %v3995_v49 = vmul.f32 %v9062_v45, %v9062_v45  ;;  %v6068_v60 = vpack.c.bf16 %v3133_v31, %v3133_v31  ;;  %v6067_v28 = vpack.c.bf16 %v3132_v34, %v3132_v34  ;;  %v6995_v43 = vpop.permute.xlu1 %6994 }
 0x236   : > { %v3926_v58 = vadd.f32 %v3925_v54, %v3924_v3  ;;  %v6740_v57 = vpop.f32.mrf.mxu0  ;;  %v9085_v2 = vadd.f32 %v6773_v10, %v3670_v12  ;;  %v6997_v19 = vunpack.i.h.bf16 %v6995_v43  ;;  %v6996_v27 = vunpack.i.l.bf16 %v6995_v43  ;;  %v9087_v39 = vpop.f32.mrf.mxu1 }
 0x237   : > { %5440 = vst.msk [vmem:[%s9017_s11 + $0x34] sm:$0xf] %vm5426_vm9, %v6068_v60  ;;  %5439 = vst.msk [vmem:[%s9017_s11 + $0x30] sm:$0xf] %vm5426_vm9, %v6067_v28  ;;  %v4027_v4 = vsel %vm1684_vm8, %v3995_v49, 0.0  ;;  %v3668_v50 = vadd.f32 %v3553_v14, %v8864_v24  ;;  %v3671_v3 = vadd.f32 %v6740_v57, %v8866_v32  ;;  %v3996_v10 = vmul.f32 %v9027_v11, %v9027_v11 }
 0x238   : > { %10538 = vst [vmem:[#allocation28_spill] sm:$0xff] %v9085_v2  ;;  %v3928_v45 = vadd.f32 %v3927_v52, %v3926_v58  ;;  %v3556_v31 = vpop.f32.mrf.mxu0  ;;  %v4026_v12 = vsel %vm1684_vm8, %v3994_v21, 0.0  ;;  %v3131_v34 = vsel %vm1684_vm8, %v10522_v29, %v6997_v19  ;;  %v3130_v54 = vsel %vm1684_vm8, %v10521_v41, %v6996_v27  ;;  %v9103_v60 = vpop.f32.mrf.mxu1 }
 0x239   : > { %v3929_v24 = vsel %vm1684_vm8, %v9060_v9, 0.0  ;;  %v6064_v32 = vpack.c.bf16 %v3131_v34, %v3131_v34  ;;  %v6063_v57 = vpack.c.bf16 %v3130_v54, %v3130_v54  ;;  %v9108_v14 = vadd.f32 %v9030_v0, %v3668_v50  ;;  %v7000_v49 = vpop.permute.xlu1 %6999 }
 0x23a   : > { %v4028_v21 = vadd.f32 %v4027_v4, %v4026_v12  ;;  %v3930_v28 = vadd.f32 %v3929_v24, %v3928_v45  ;;  %v9111_v29 = vadd.f32 %v9042_v59, %v3671_v3  ;;  %v7002_v58 = vunpack.i.h.bf16 %v7000_v49  ;;  %v6743_v41 = vpop.f32.mrf.mxu0  ;;  %v9113_v43 = vpop.f32.mrf.mxu1  ;;  %v10541_v4 = vld [vmem:[#allocation37_spill] sm:$0xff] }
 0x23b   : > { %10539 = vst [vmem:[#allocation43_spill] sm:$0xff] %v9108_v14  ;;  %v1709_v52 = vadd.f32 %v1708_v63, %v1707_v47  ;;  %v1767_v19 = vmul.f32 %v10537_v17, %v10537_v17  ;;  %v1809_v27 = vadd.f32 %v1808_v44, %v1807_v35  ;;  %5436 = vst.msk [vmem:[%s9017_s11 + $0x24] sm:$0xf] %vm5426_vm9, %v6064_v32  ;;  %v7001_v0 = vunpack.i.l.bf16 %v7000_v49  ;;  %v7005_v50 = vpop.permute.xlu0 %7004 }
 0x23c   : > { %10540 = vst [vmem:[#allocation24_spill] sm:$0xff] %v9111_v29  ;;  %5435 = vst.msk [vmem:[%s9017_s11 + $0x20] sm:$0xf] %vm5426_vm9, %v6063_v57  ;;  %v1768_v45 = vmul.f32 %v10541_v4, %v10541_v4  ;;  %v4029_v59 = vsel %vm1684_vm8, %v3996_v10, 0.0  ;;  %v3997_v3 = vmul.f32 %v9060_v9, %v9060_v9  ;;  %v3137_v63 = vsel %vm1684_vm8, %v10533_v26, %v7002_v58  ;;  %v3569_v47 = vpop.f32.mrf.mxu0  ;;  %v9128_v44 = vpop.f32.mrf.mxu1 }
 0x23d   : > { %v3931_v35 = vsel %vm1684_vm8, %v9108_v14, 0.0  ;;  %v6076_v12 = vpack.c.bf16 %v3137_v63, %v3137_v63  ;;  %v3136_v34 = vsel %vm1684_vm8, %v10531_v8, %v7001_v0  ;;  %v3669_v54 = vadd.f32 %v3556_v31, %v8868_v33 }
 0x23e   : > { %v4030_v10 = vadd.f32 %v4029_v59, %v4028_v21  ;;  %v3932_v24 = vadd.f32 %v3931_v35, %v3930_v28  ;;  %v6075_v32 = vpack.c.bf16 %v3136_v34, %v3136_v34  ;;  %v7007_v57 = vunpack.i.h.bf16 %v7005_v50  ;;  %v6744_v49 = vpop.f32.mrf.mxu0  ;;  %v9135_v11 = vpop.f32.mrf.mxu1 }
 0x23f   : > { %5448 = vst.msk [vmem:[%s9017_s11 + $0x54] sm:$0xf] %vm5426_vm9, %v6076_v12  ;;  %v9140_v26 = vadd.f32 %v9051_v25, %v3669_v54  ;;  %v7006_v58 = vunpack.i.l.bf16 %v7005_v50  ;;  %v3674_v63 = vadd.f32 %v6743_v41, %v8872_v18  ;;  %v3672_v9 = vadd.f32 %v3569_v47, %v8880_v36  ;;  %v7010_v8 = vpop.permute.xlu1 %7009  ;;  %v10546_v54 = vld [vmem:[#allocation57_spill] sm:$0xff] }
 0x240   : > { %5447 = vst.msk [vmem:[%s9017_s11 + $0x50] sm:$0xf] %vm5426_vm9, %v6075_v32  ;;  %v3135_v33 = vsel %vm1684_vm8, %v10529_v53, %v7007_v57  ;;  %v3675_v31 = vadd.f32 %v6744_v49, %v8882_v15  ;;  %v7012_v21 = vunpack.i.h.bf16 %v7010_v8  ;;  %v7011_v28 = vunpack.i.l.bf16 %v7010_v8  ;;  %v3572_v0 = vpop.f32.mrf.mxu0  ;;  %v9149_v59 = vpop.f32.mrf.mxu1 }
 0x241   : > { %10542 = vst [vmem:[#allocation45_spill] sm:$0xff] %v9140_v26  ;;  %v4031_v25 = vsel %vm1684_vm8, %v3997_v3, 0.0  ;;  %v3933_v18 = vsel %vm1684_vm8, %v9140_v26, 0.0  ;;  %v6072_v36 = vpack.c.bf16 %v3135_v33, %v3135_v33  ;;  %v3134_v41 = vsel %vm1684_vm8, %v10526_v61, %v7006_v58 }
 0x242   : > { %v3998_v53 = vmul.f32 %v9108_v14, %v9108_v14  ;;  %v6071_v15 = vpack.c.bf16 %v3134_v41, %v3134_v41  ;;  %v9159_v50 = vadd.f32 %v9065_v13, %v3674_v63  ;;  %v9162_v47 = vadd.f32 %v9081_v46, %v3672_v9  ;;  %v6747_v35 = vpop.f32.mrf.mxu0  ;;  %v9164_v3 = vpop.f32.mrf.mxu1  ;;  %v10547_v46 = vld [vmem:[#allocation56_spill] sm:$0xff] }
 0x243   : > { %v1710_v12 = vsel %vm1684_vm8, %v10541_v4, 0.0  ;;  %v4032_v34 = vadd.f32 %v4031_v25, %v4030_v10  ;;  %5444 = vst.msk [vmem:[%s9017_s11 + $0x44] sm:$0xf] %vm5426_vm9, %v6072_v36  ;;  %v9171_v61 = vadd.f32 %v9087_v39, %v3675_v31  ;;  %v3141_v32 = vsel %vm1684_vm8, %v10546_v54, %v7012_v21 }
 0x244   : > { %10543 = vst [vmem:[#allocation63_spill] sm:$0xff] %v9159_v50  ;;  %10544 = vst [vmem:[#allocation30_spill] sm:$0xff] %v9162_v47  ;;  %v1810_v13 = vsel %vm1684_vm8, %v1767_v19, 0.0  ;;  %v3934_v57 = vadd.f32 %v3933_v18, %v3932_v24  ;;  %v3999_v9 = vmul.f32 %v9140_v26, %v9140_v26  ;;  %v3140_v49 = vsel %vm1684_vm8, %v10547_v46, %v7011_v28  ;;  %v3585_v10 = vpop.f32.mrf.mxu0  ;;  %v9182_v58 = vpop.f32.mrf.mxu1 }
 0x245   : > { %10545 = vst [vmem:[#allocation32_spill] sm:$0xff] %v9171_v61  ;;  %5443 = vst.msk [vmem:[%s9017_s11 + $0x40] sm:$0xf] %vm5426_vm9, %v6071_v15  ;;  %v1769_v39 = vmul.f32 %v10547_v46, %v10547_v46  ;;  %v1811_v63 = vadd.f32 %v1810_v13, %v1809_v27  ;;  %v1770_v19 = vmul.f32 %v10546_v54, %v10546_v54  ;;  %v7015_v24 = vpop.permute.xlu0 %7014  ;;  %v1812_v33 = vsel %vm1684_vm8, %v1768_v45, 0.0 }
 0x246   : > { %v1711_v8 = vadd.f32 %v1710_v12, %v1709_v52  ;;  %v4033_v31 = vsel %vm1684_vm8, %v3998_v53, 0.0  ;;  %v6084_v21 = vpack.c.bf16 %v3141_v32, %v3141_v32  ;;  %v6748_v28 = vpop.f32.mrf.mxu0  ;;  %v9190_v25 = vpop.f32.mrf.mxu1  ;;  %v3935_v18 = vsel %vm1684_vm8, %v9085_v2, 0.0 }
 0x247   : > { %v4034_v36 = vadd.f32 %v4033_v31, %v4032_v34  ;;  %v6083_v27 = vpack.c.bf16 %v3140_v49, %v3140_v49  ;;  %v3673_v41 = vadd.f32 %v3572_v0, %v8884_v20  ;;  %v7020_v15 = vpop.permute.xlu1 %7019  ;;  %v3936_v13 = vadd.f32 %v3935_v18, %v3934_v57 }
 0x248   : > { %v4035_v52 = vsel %vm1684_vm8, %v3999_v9, 0.0  ;;  %5456 = vst.msk [vmem:[%s9017_s11 + $0x74] sm:$0xf] %vm5426_vm9, %v6084_v21  ;;  %v7017_v45 = vunpack.i.h.bf16 %v7015_v24  ;;  %v7016_v53 = vunpack.i.l.bf16 %v7015_v24  ;;  %v3588_v12 = vpop.f32.mrf.mxu0  ;;  %v9198_v32 = vpop.f32.mrf.mxu1  ;;  %v3678_v34 = vadd.f32 %v6747_v35, %v8888_v40 }
 0x249   : > { %5455 = vst.msk [vmem:[%s9017_s11 + $0x70] sm:$0xf] %vm5426_vm9, %v6083_v27  ;;  %v9203_v14 = vadd.f32 %v9103_v60, %v3673_v41  ;;  %v3676_v20 = vadd.f32 %v3585_v10, %v8896_v62  ;;  %v3679_v0 = vadd.f32 %v6748_v28, %v8900_v16  ;;  %v4000_v57 = vmul.f32 %v9085_v2, %v9085_v2 }
 0x24a   : > { %v3139_v9 = vsel %vm1684_vm8, %v10541_v4, %v7017_v45  ;;  %v3138_v49 = vsel %vm1684_vm8, %v10537_v17, %v7016_v53  ;;  %v7022_v24 = vunpack.i.h.bf16 %v7020_v15  ;;  %v6751_v60 = vpop.f32.mrf.mxu0  ;;  %v9214_v31 = vpop.f32.mrf.mxu1  ;;  %v3937_v40 = vsel %vm1684_vm8, %v9111_v29, 0.0 }
 0x24b   : > { %10548 = vst [vmem:[#allocation67_spill] sm:$0xff] %v9203_v14  ;;  %v4036_v62 = vadd.f32 %v4035_v52, %v4034_v36  ;;  %v6080_v16 = vpack.c.bf16 %v3139_v9, %v3139_v9  ;;  %v6079_v35 = vpack.c.bf16 %v3138_v49, %v3138_v49  ;;  %v4001_v10 = vmul.f32 %v9111_v29, %v9111_v29  ;;  %v10552_v36 = vld [vmem:[#allocation59_spill] sm:$0xff]  ;;  %v10553_v9 = vld [vmem:[#allocation42_spill] sm:$0xff] }
 0x24c   : > { %v9221_v4 = vadd.f32 %v9113_v43, %v3678_v34  ;;  %v9224_v21 = vadd.f32 %v9128_v44, %v3676_v20  ;;  %v9227_v17 = vadd.f32 %v9135_v11, %v3679_v0  ;;  %v3601_v28 = vpop.f32.mrf.mxu0  ;;  %v9229_v18 = vpop.f32.mrf.mxu1  ;;  %v3938_v27 = vadd.f32 %v3937_v40, %v3936_v13 }
 0x24d   : > { %5452 = vst.msk [vmem:[%s9017_s11 + $0x64] sm:$0xf] %vm5426_vm9, %v6080_v16  ;;  %5451 = vst.msk [vmem:[%s9017_s11 + $0x60] sm:$0xf] %vm5426_vm9, %v6079_v35  ;;  %v3145_v41 = vsel %vm1684_vm8, %v10552_v36, %v7022_v24  ;;  %v7021_v52 = vunpack.i.l.bf16 %v7020_v15  ;;  %v3677_v43 = vadd.f32 %v3588_v12, %v8904_v1  ;;  %v1712_v44 = vsel %vm1684_vm8, %v10547_v46, 0.0  ;;  %v7025_v46 = vpop.permute.xlu0 %7024 }
 0x24e   : > { %10549 = vst [vmem:[#allocation64_spill] sm:$0xff] %v9221_v4  ;;  %10550 = vst [vmem:[#allocation33_spill] sm:$0xff] %v9224_v21  ;;  %v1814_v11 = vsel %vm1684_vm8, %v1769_v39, 0.0  ;;  %v1714_v45 = vsel %vm1684_vm8, %v10546_v54, 0.0  ;;  %v4037_v13 = vsel %vm1684_vm8, %v4000_v57, 0.0  ;;  %v6752_v53 = vpop.f32.mrf.mxu0  ;;  %v9244_v34 = vpop.f32.mrf.mxu1  ;;  %v1816_v20 = vsel %vm1684_vm8, %v1770_v19, 0.0 }
 0x24f   : > { %10551 = vst [vmem:[#allocation36_spill] sm:$0xff] %v9227_v17  ;;  %v1713_v0 = vadd.f32 %v1712_v44, %v1711_v8  ;;  %v9249_v1 = vmul.f32 %v10553_v9, %v10553_v9  ;;  %v4038_v15 = vadd.f32 %v4037_v13, %v4036_v62  ;;  %v1813_v12 = vadd.f32 %v1812_v33, %v1811_v63  ;;  %v10554_v39 = vld [vmem:[#allocation58_spill] sm:$0xff] }
 0x250   : > { %v1716_v49 = vsel %vm1684_vm8, %v10554_v39, 0.0  ;;  %v3939_v54 = vsel %vm1684_vm8, %v9162_v47, 0.0  ;;  %v6092_v57 = vpack.c.bf16 %v3145_v41, %v3145_v41  ;;  %v3604_v24 = vpop.f32.mrf.mxu0  ;;  %v9255_v40 = vpop.f32.mrf.mxu1  ;;  %v4039_v19 = vsel %vm1684_vm8, %v4001_v10, 0.0 }
 0x251   : > { %v3940_v8 = vadd.f32 %v3939_v54, %v3938_v27  ;;  %v3144_v16 = vsel %vm1684_vm8, %v10553_v9, %v7021_v52  ;;  %v9261_v62 = vadd.f32 %v9149_v59, %v3677_v43  ;;  %v4002_v63 = vmul.f32 %v9162_v47, %v9162_v47  ;;  %v7030_v43 = vpop.permute.xlu1 %7029 }
 0x252   : > { %v3941_v33 = vsel %vm1684_vm8, %v9203_v14, 0.0  ;;  %5464 = vst.msk [vmem:[%s9017_s11 + $0x94] sm:$0xf] %vm5426_vm9, %v6092_v57  ;;  %v6091_v35 = vpack.c.bf16 %v3144_v16, %v3144_v16  ;;  %v7027_v41 = vunpack.i.h.bf16 %v7025_v46  ;;  %v6755_v44 = vpop.f32.mrf.mxu0  ;;  %v9269_v10 = vpop.f32.mrf.mxu1  ;;  %v1771_v27 = vmul.f32 %v10554_v39, %v10554_v39  ;;  %v10556_v57 = vld [vmem:[#allocation29_spill] sm:$0xff] }
 0x253   : > { %10555 = vst [vmem:[#allocation65_spill] sm:$0xff] %v9261_v62  ;;  %v4040_v52 = vadd.f32 %v4039_v19, %v4038_v15  ;;  %v7026_v13 = vunpack.i.l.bf16 %v7025_v46  ;;  %v3682_v59 = vadd.f32 %v6751_v60, %v8911_v6  ;;  %v1715_v54 = vadd.f32 %v1714_v45, %v1713_v0 }
 0x254   : > { %v4003_v47 = vmul.f32 %v9203_v14, %v9203_v14  ;;  %5463 = vst.msk [vmem:[%s9017_s11 + $0x90] sm:$0xf] %vm5426_vm9, %v6091_v35  ;;  %v3143_v16 = vsel %vm1684_vm8, %v10556_v57, %v7027_v41  ;;  %v3680_v26 = vadd.f32 %v3601_v28, %v8925_v22  ;;  %v3617_v2 = vpop.f32.mrf.mxu0  ;;  %v9281_v29 = vpop.f32.mrf.mxu1  ;;  %v3942_v15 = vadd.f32 %v3941_v33, %v3940_v8 }
 0x255   : > { %v6088_v46 = vpack.c.bf16 %v3143_v16, %v3143_v16  ;;  %v3142_v6 = vsel %vm1684_vm8, %v10554_v39, %v7026_v13  ;;  %v9286_v60 = vadd.f32 %v9164_v3, %v3682_v59  ;;  %v1815_v45 = vadd.f32 %v1814_v11, %v1813_v12  ;;  %v7035_v13 = vpop.permute.xlu0 %7034 }
 0x256   : > { %v4041_v0 = vsel %vm1684_vm8, %v4002_v63, 0.0  ;;  %v6087_v19 = vpack.c.bf16 %v3142_v6, %v3142_v6  ;;  %v9290_v35 = vadd.f32 %v9182_v58, %v3680_v26  ;;  %v6756_v22 = vpop.f32.mrf.mxu0  ;;  %v9292_v28 = vpop.f32.mrf.mxu1  ;;  %v9295_v8 = vsel %vm1684_vm8, %v1771_v27, 0.0 }
 0x257   : > { %10557 = vst [vmem:[#allocation34_spill] sm:$0xff] %v9286_v60  ;;  %v4042_v33 = vadd.f32 %v4041_v0, %v4040_v52  ;;  %5460 = vst.msk [vmem:[%s9017_s11 + $0x84] sm:$0xf] %vm5426_vm9, %v6088_v46  ;;  %v3683_v3 = vadd.f32 %v6752_v53, %v8927_v30  ;;  %v7032_v39 = vunpack.i.h.bf16 %v7030_v43  ;;  %v1717_v41 = vadd.f32 %v1716_v49, %v1715_v54  ;;  %v10560_v30 = vld [vmem:[#allocation46_spill] sm:$0xff]  ;;  %v10561_v0 = vld [vmem:[#allocation44_spill] sm:$0xff] }
 0x258   : > { %10558 = vst [vmem:[#allocation41_spill] sm:$0xff] %v9290_v35  ;;  %v3943_v11 = vsel %vm1684_vm8, %v9159_v50, 0.0  ;;  %v4004_v26 = vmul.f32 %v9159_v50, %v9159_v50  ;;  %v4043_v58 = vsel %vm1684_vm8, %v4003_v47, 0.0  ;;  %5459 = vst.msk [vmem:[%s9017_s11 + $0x80] sm:$0xf] %vm5426_vm9, %v6087_v19  ;;  %v3620_v12 = vpop.f32.mrf.mxu0  ;;  %v9307_v63 = vpop.f32.mrf.mxu1  ;;  %v7031_v49 = vunpack.i.l.bf16 %v7030_v43 }
 0x259   : > { %v3944_v27 = vadd.f32 %v3943_v11, %v3942_v15  ;;  %v9310_v52 = vadd.f32 %v9190_v25, %v3683_v3  ;;  %v3149_v53 = vsel %vm1684_vm8, %v10560_v30, %v7032_v39  ;;  %v1817_v59 = vadd.f32 %v1816_v20, %v1815_v45  ;;  %v7040_v45 = vpop.permute.xlu1 %7039 }
 0x25a   : > { %v1718_v54 = vsel %vm1684_vm8, %v10556_v57, 0.0  ;;  %v3945_v47 = vsel %vm1684_vm8, %v9171_v61, 0.0  ;;  %v6100_v16 = vpack.c.bf16 %v3149_v53, %v3149_v53  ;;  %v9318_v46 = vpop.f32.mrf.mxu0  ;;  %v9320_v15 = vpop.f32.mrf.mxu1  ;;  %v4005_v25 = vmul.f32 %v9171_v61, %v9171_v61 }
 0x25b   : > { %10559 = vst [vmem:[#allocation7_spill] sm:$0xff] %v9310_v52  ;;  %v4044_v6 = vadd.f32 %v4043_v58, %v4042_v33  ;;  %v3148_v43 = vsel %vm1684_vm8, %v10561_v0, %v7031_v49  ;;  %v3681_v20 = vadd.f32 %v3604_v24, %v8936_v42  ;;  %v4045_v19 = vsel %vm1684_vm8, %v4004_v26, 0.0  ;;  %v10563_v24 = vld [vmem:[#allocation40_spill] sm:$0xff]  ;;  %v10564_v49 = vld [vmem:[#allocation23_spill] sm:$0xff] }
 0x25c   : > { %5472 = vst.msk [vmem:[%s9017_s11 + $0xb4] sm:$0xf] %vm5426_vm9, %v6100_v16  ;;  %v6099_v3 = vpack.c.bf16 %v3148_v43, %v3148_v43  ;;  %v7037_v39 = vunpack.i.h.bf16 %v7035_v13  ;;  %v7036_v11 = vunpack.i.l.bf16 %v7035_v13  ;;  %v9330_v53 = vpop.f32.mrf.mxu0  ;;  %v9332_v14 = vpop.f32.mrf.mxu1  ;;  %v3946_v50 = vadd.f32 %v3945_v47, %v3944_v27 }
 0x25d   : > { %v9335_v33 = vadd.f32 %v9198_v32, %v3681_v20  ;;  %v3686_v58 = vadd.f32 %v6755_v44, %v8940_v23  ;;  %v3684_v42 = vadd.f32 %v3617_v2, %v8957_v7  ;;  %v3687_v16 = vadd.f32 %v6756_v22, %v8961_v56 }
 0x25e   : > { %5471 = vst.msk [vmem:[%s9017_s11 + $0xb0] sm:$0xf] %vm5426_vm9, %v6099_v3  ;;  %v3147_v26 = vsel %vm1684_vm8, %v10563_v24, %v7037_v39  ;;  %v3146_v13 = vsel %vm1684_vm8, %v10564_v49, %v7036_v11  ;;  %v7042_v27 = vunpack.i.h.bf16 %v7040_v45  ;;  %v9346_v47 = vpop.f32.mrf.mxu0  ;;  %v9348_v32 = vpop.f32.mrf.mxu1  ;;  %v1772_v23 = vmul.f32 %v10556_v57, %v10556_v57 }
 0x25f   : > { %10562 = vst [vmem:[#allocation38_spill] sm:$0xff] %v9335_v33  ;;  %v4046_v7 = vadd.f32 %v4045_v19, %v4044_v6  ;;  %v6096_v2 = vpack.c.bf16 %v3147_v26, %v3147_v26  ;;  %v6095_v44 = vpack.c.bf16 %v3146_v13, %v3146_v13  ;;  %v3947_v43 = vsel %vm1684_vm8, %v9224_v21, 0.0  ;;  %v10568_v6 = vld [vmem:[#allocation62_spill] sm:$0xff]  ;;  %v7050_v61 = vpop.permute.xlu1 %7049 }
 0x260   : > { %v9355_v20 = vadd.f32 %v9214_v31, %v3686_v58  ;;  %v9358_v56 = vadd.f32 %v9229_v18, %v3684_v42  ;;  %v9361_v22 = vadd.f32 %v9244_v34, %v3687_v16  ;;  %v9363_v3 = vpop.f32.mrf.mxu0  ;;  %v9365_v39 = vpop.f32.mrf.mxu1  ;;  %v3948_v57 = vadd.f32 %v3947_v43, %v3946_v50 }
 0x261   : > { %5468 = vst.msk [vmem:[%s9017_s11 + $0xa4] sm:$0xf] %vm5426_vm9, %v6096_v2  ;;  %5467 = vst.msk [vmem:[%s9017_s11 + $0xa0] sm:$0xf] %vm5426_vm9, %v6095_v44  ;;  %v3153_v19 = vsel %vm1684_vm8, %v10568_v6, %v7042_v27  ;;  %v7041_v31 = vunpack.i.l.bf16 %v7040_v45  ;;  %v3685_v11 = vadd.f32 %v3620_v12, %v8966_v37  ;;  %v1719_v18 = vadd.f32 %v1718_v54, %v1717_v41  ;;  %v7045_v12 = vpop.permute.xlu0 %7044 }
 0x262   : > { %10565 = vst [vmem:[#allocation70_spill] sm:$0xff] %v9355_v20  ;;  %10566 = vst [vmem:[#allocation66_spill] sm:$0xff] %v9358_v56  ;;  %v4047_v58 = vsel %vm1684_vm8, %v4005_v25, 0.0  ;;  %v4006_v34 = vmul.f32 %v9224_v21, %v9224_v21  ;;  %v3949_v42 = vsel %vm1684_vm8, %v9261_v62, 0.0  ;;  %v9379_v50 = vpop.f32.mrf.mxu0  ;;  %v9381_v26 = vpop.f32.mrf.mxu1  ;;  %v1720_v13 = vsel %vm1684_vm8, %v10553_v9, 0.0 }
 0x263   : > { %10567 = vst [vmem:[#allocation19_spill] sm:$0xff] %v9361_v22  ;;  %v1822_v45 = vsel %vm1684_vm8, %v9249_v1, 0.0  ;;  %v1819_v37 = vadd.f32 %v9295_v8, %v1817_v59  ;;  %v4048_v41 = vadd.f32 %v4047_v58, %v4046_v7  ;;  %v1722_v54 = vsel %vm1684_vm8, %v10552_v36, 0.0  ;;  %v10569_v8 = vld [vmem:[#allocation60_spill] sm:$0xff] }
 0x264   : > { %v1820_v25 = vsel %vm1684_vm8, %v1772_v23, 0.0  ;;  %v4007_v16 = vmul.f32 %v9261_v62, %v9261_v62  ;;  %v6108_v27 = vpack.c.bf16 %v3153_v19, %v3153_v19  ;;  %v9393_v2 = vpop.f32.mrf.mxu0  ;;  %v9395_v9 = vpop.f32.mrf.mxu1  ;;  %v1774_v1 = vmul.f32 %v10552_v36, %v10552_v36 }
 0x265   : > { %v3950_v44 = vadd.f32 %v3949_v42, %v3948_v57  ;;  %v3152_v59 = vsel %vm1684_vm8, %v10569_v8, %v7041_v31  ;;  %v9402_v7 = vadd.f32 %v9255_v40, %v3685_v11  ;;  %v1721_v23 = vadd.f32 %v1720_v13, %v1719_v18  ;;  %v10571_v18 = vld [vmem:[#allocation35_spill] sm:$0xff] }
 0x266   : > { %v4049_v43 = vsel %vm1684_vm8, %v4006_v34, 0.0  ;;  %5480 = vst.msk [vmem:[%s9017_s11 + $0xd4] sm:$0xf] %vm5426_vm9, %v6108_v27  ;;  %v6107_v19 = vpack.c.bf16 %v3152_v59, %v3152_v59  ;;  %v7047_v58 = vunpack.i.h.bf16 %v7045_v12  ;;  %v9407_v21 = vpop.f32.mrf.mxu0  ;;  %v9409_v62 = vpop.f32.mrf.mxu1  ;;  %v1821_v36 = vadd.f32 %v1820_v25, %v1819_v37 }
 0x267   : > { %10570 = vst [vmem:[#allocation14_spill] sm:$0xff] %v9402_v7  ;;  %v4050_v57 = vadd.f32 %v4049_v43, %v4048_v41  ;;  %v7046_v42 = vunpack.i.l.bf16 %v7045_v12  ;;  %v3690_v31 = vadd.f32 %v9318_v46, %v8973_v55  ;;  %v3951_v40 = vsel %vm1684_vm8, %v9221_v4, 0.0  ;;  %v10572_v46 = vld [vmem:[#allocation61_spill] sm:$0xff] }
 0x268   : > { %v4051_v11 = vsel %vm1684_vm8, %v4007_v16, 0.0  ;;  %5479 = vst.msk [vmem:[%s9017_s11 + $0xd0] sm:$0xf] %vm5426_vm9, %v6107_v19  ;;  %v3151_v34 = vsel %vm1684_vm8, %v10571_v18, %v7047_v58  ;;  %v3688_v13 = vadd.f32 %v9330_v53, %v8980_v38  ;;  %v3652_v37 = vpop.f32.mrf.mxu0  ;;  %v9422_v41 = vpop.f32.mrf.mxu1  ;;  %v3952_v12 = vadd.f32 %v3951_v40, %v3950_v44 }
 0x269   : > { %v6104_v55 = vpack.c.bf16 %v3151_v34, %v3151_v34  ;;  %v3150_v25 = vsel %vm1684_vm8, %v10572_v46, %v7046_v42  ;;  %v9427_v27 = vadd.f32 %v9269_v10, %v3690_v31  ;;  %v4008_v16 = vmul.f32 %v9221_v4, %v9221_v4 }
 0x26a   : > { %v4009_v59 = vmul.f32 %v9227_v17, %v9227_v17  ;;  %v6103_v43 = vpack.c.bf16 %v3150_v25, %v3150_v25  ;;  %v9434_v38 = vadd.f32 %v9281_v29, %v3688_v13  ;;  %v6803_v53 = vpop.f32.mrf.mxu0  ;;  %v9436_v44 = vpop.f32.mrf.mxu1  ;;  %v1824_v19 = vsel %vm1684_vm8, %v1774_v1, 0.0 }
 0x26b   : > { %10573 = vst [vmem:[#allocation69_spill] sm:$0xff] %v9427_v27  ;;  %v4052_v58 = vadd.f32 %v4051_v11, %v4050_v57  ;;  %5476 = vst.msk [vmem:[%s9017_s11 + $0xc4] sm:$0xf] %vm5426_vm9, %v6104_v55  ;;  %v3691_v10 = vadd.f32 %v9346_v47, %v8982_v5  ;;  %v7052_v42 = vunpack.i.h.bf16 %v7050_v61  ;;  %v1823_v31 = vadd.f32 %v1822_v45, %v1821_v36  ;;  %v10576_v47 = vld [vmem:[#allocation27_spill] sm:$0xff]  ;;  %v7055_v13 = vpop.permute.xlu0 %7054 }
 0x26c   : > { %10574 = vst [vmem:[#allocation48_spill] sm:$0xff] %v9434_v38  ;;  %v1724_v40 = vsel %vm1684_vm8, %v10564_v49, 0.0  ;;  %v9447_v29 = vmul.f32 %v10564_v49, %v10564_v49  ;;  %v3953_v34 = vsel %vm1684_vm8, %v9227_v17, 0.0  ;;  %5475 = vst.msk [vmem:[%s9017_s11 + $0xc0] sm:$0xf] %vm5426_vm9, %v6103_v43  ;;  %v4137_v1 = vpop.f32.mrf.mxu0  ;;  %v9453_v57 = vpop.f32.mrf.mxu1  ;;  %v7051_v36 = vunpack.i.l.bf16 %v7050_v61 }
 0x26d   : > { %v3954_v11 = vadd.f32 %v3953_v34, %v3952_v12  ;;  %v9456_v5 = vadd.f32 %v9292_v28, %v3691_v10  ;;  %v3157_v45 = vsel %vm1684_vm8, %v10576_v47, %v7052_v42  ;;  %v1723_v49 = vadd.f32 %v1722_v54, %v1721_v23  ;;  %v10578_v10 = vld [vmem:[#allocation25_spill] sm:$0xff] }
 0x26e   : > { %v4053_v55 = vsel %vm1684_vm8, %v4008_v16, 0.0  ;;  %v4055_v25 = vsel %vm1684_vm8, %v4009_v59, 0.0  ;;  %v6116_v4 = vpack.c.bf16 %v3157_v45, %v3157_v45  ;;  %v9462_v43 = vpop.f32.mrf.mxu0  ;;  %v9464_v17 = vpop.f32.mrf.mxu1  ;;  %v3955_v28 = vsel %vm1684_vm8, %v9290_v35, 0.0 }
 0x26f   : > { %10575 = vst [vmem:[#allocation71_spill] sm:$0xff] %v9456_v5  ;;  %10577 = vst [vmem:[#allocation68_spill] sm:$0xff] %v9464_v17  ;;  %v4054_v12 = vadd.f32 %v4053_v55, %v4052_v58  ;;  %v3156_v42 = vsel %vm1684_vm8, %v10578_v10, %v7051_v36  ;;  %v3689_v61 = vadd.f32 %v9363_v3, %v8989_v48  ;;  %v7057_v16 = vunpack.i.h.bf16 %v7055_v13  ;;  %v10581_v48 = vld [vmem:[#allocation50_spill] sm:$0xff]  ;;  %v10584_v17 = vld [vmem:[#allocation51_spill] sm:$0xff] }
 0x270   : > { %v4010_v54 = vmul.f32 %v9290_v35, %v9290_v35  ;;  %5488 = vst.msk [vmem:[%s9017_s11 + $0xf4] sm:$0xf] %vm5426_vm9, %v6116_v4  ;;  %v6115_v23 = vpack.c.bf16 %v3156_v42, %v3156_v42  ;;  %v7056_v59 = vunpack.i.l.bf16 %v7055_v13  ;;  %v9476_v34 = vpop.f32.mrf.mxu0  ;;  %v9478_v58 = vpop.f32.mrf.mxu1  ;;  %v3956_v45 = vadd.f32 %v3955_v28, %v3954_v11  ;;  %v10582_v4 = vld [vmem:[#allocation39_spill] sm:$0xff] }
 0x271   : > { %10579 = vst [vmem:[#allocation16_spill] sm:$0xff] %v9478_v58  ;;  %v9481_v55 = vadd.f32 %v9307_v63, %v3689_v61  ;;  %v3694_v36 = vadd.f32 %v9379_v50, %v8993_v51  ;;  %v3692_v3 = vadd.f32 %v9393_v2, %v10581_v48  ;;  %v10583_v13 = vld [vmem:[#allocation31_spill] sm:$0xff]  ;;  %v3695_v11 = vadd.f32 %v9407_v21, %v10584_v17  ;;  %v10585_v63 = vld [vmem:[#allocation52_spill] sm:$0xff] }
 0x272   : > { %5487 = vst.msk [vmem:[%s9017_s11 + $0xf0] sm:$0xf] %vm5426_vm9, %v6115_v23  ;;  %v3154_v42 = vsel %vm1684_vm8, %v10582_v4, %v7056_v59  ;;  %v3155_v35 = vsel %vm1684_vm8, %v10583_v13, %v7057_v16  ;;  %v3693_v28 = vadd.f32 %v3652_v37, %v10585_v63  ;;  %v6807_v61 = vpop.f32.mrf.mxu0  ;;  %v6845_v51 = vpop.f32.mrf.mxu1  ;;  %v4056_v50 = vadd.f32 %v4055_v25, %v4054_v12 }
 0x273   : > { %10580 = vst [vmem:[#allocation18_spill] sm:$0xff] %v9481_v55  ;;  %v3957_v2 = vsel %vm1684_vm8, %v9335_v33, 0.0  ;;  %v6111_v23 = vpack.c.bf16 %v3154_v42, %v3154_v42  ;;  %v6112_v48 = vpack.c.bf16 %v3155_v35, %v3155_v35  ;;  %v4011_v59 = vmul.f32 %v9335_v33, %v9335_v33 }
 0x274   : > { %v9501_v16 = vadd.f32 %v9320_v15, %v3694_v36  ;;  %v9504_v58 = vadd.f32 %v9332_v14, %v3692_v3  ;;  %v9507_v21 = vadd.f32 %v9348_v32, %v3695_v11  ;;  %v9509_v17 = vpop.f32.mrf.mxu0  ;;  %v9511_v37 = vpop.f32.mrf.mxu1  ;;  %v1725_v25 = vadd.f32 %v1724_v40, %v1723_v49 }
 0x275   : > { %5483 = vst.msk [vmem:[%s9017_s11 + $0xe0] sm:$0xf] %vm5426_vm9, %v6111_v23  ;;  %5484 = vst.msk [vmem:[%s9017_s11 + $0xe4] sm:$0xf] %vm5426_vm9, %v6112_v48  ;;  %v9518_v35 = vadd.f32 %v9365_v39, %v3693_v28  ;;  %v9521_v15 = vadd.f32 %v9381_v26, %v6803_v53  ;;  %v9524_v14 = vadd.f32 %v9395_v9, %v4137_v1  ;;  %v1726_v12 = vsel %vm1684_vm8, %v10563_v24, 0.0 }
 0x276   : > { %10586 = vst [vmem:[#allocation20_spill] sm:$0xff] %v9501_v16  ;;  %10587 = vst [vmem:[#allocation6_spill] sm:$0xff] %v9504_v58  ;;  %v1825_v32 = vadd.f32 %v1824_v19, %v1823_v31  ;;  %v4057_v36 = vsel %vm1684_vm8, %v4010_v54, 0.0  ;;  %v9529_v40 = vpop.f32.mrf.mxu0  ;;  %v9531_v49 = vpop.f32.mrf.mxu1  ;;  %v1776_v39 = vmul.f32 %v10563_v24, %v10563_v24  ;;  %v3958_v26 = vadd.f32 %v3957_v2, %v3956_v45 }
 0x277   : > { %10588 = vst [vmem:[#allocation3_spill] sm:$0xff] %v9518_v35  ;;  %v4058_v3 = vadd.f32 %v4057_v36, %v4056_v50  ;;  %v4059_v9 = vsel %vm1684_vm8, %v4011_v59, 0.0  ;;  %v1826_v31 = vsel %vm1684_vm8, %v9447_v29, 0.0  ;;  %v1727_v1 = vadd.f32 %v1726_v12, %v1725_v25 }
 0x278   : > { %v9536_v53 = vpop.f32.mrf.mxu0  ;;  %v9538_v19 = vpop.f32.mrf.mxu1  ;;  %v1827_v54 = vadd.f32 %v1826_v31, %v1825_v32  ;;  %v3959_v42 = vsel %vm1684_vm8, %v9286_v60, 0.0  ;;  %v4012_v24 = vmul.f32 %v9286_v60, %v9286_v60  ;;  %v9547_v45 = vadd.f32 %v9436_v44, %v6807_v61 }
 0x279   : > { %v1828_v28 = vsel %vm1684_vm8, %v1776_v39, 0.0  ;;  %v3960_v50 = vadd.f32 %v3959_v42, %v3958_v26  ;;  %v4060_v2 = vadd.f32 %v4059_v9, %v4058_v3  ;;  %v1728_v44 = vsel %vm1684_vm8, %v10561_v0, 0.0 }
 0x27a   : > { %v6811_v11 = vpop.f32.mrf.mxu0  ;;  %v6849_v63 = vpop.f32.mrf.mxu1  ;;  %v1777_v48 = vmul.f32 %v10561_v0, %v10561_v0  ;;  %v1729_v59 = vadd.f32 %v1728_v44, %v1727_v1  ;;  %v1829_v25 = vadd.f32 %v1828_v28, %v1827_v54  ;;  %v4061_v32 = vsel %vm1684_vm8, %v4012_v24, 0.0 }
 0x27b   : > { %v9564_v29 = vadd.f32 %v6845_v51, %v6811_v11  ;;  %v3961_v12 = vsel %vm1684_vm8, %v9310_v52, 0.0  ;;  %v4013_v36 = vmul.f32 %v9310_v52, %v9310_v52  ;;  %v7185_v3 = vmov 0.0  }
 0x27c   : > { %v9566_v61 = vpop.f32.mrf.mxu0  ;;  %v9568_v23 = vpop.f32.mrf.mxu1  ;;  %246 = vst.msk [vmem:[%s9554_s14] sm:$0x1] %vm245_vm10, %v7185_v3  ;;  %247 = vst.msk [vmem:[%s9560_s21] sm:$0x1] %vm245_vm10, %v7185_v3  ;;  %v4062_v0 = vadd.f32 %v4061_v32, %v4060_v2  ;;  %v3962_v26 = vadd.f32 %v3961_v12, %v3960_v50  ;;  %v1730_v9 = vsel %vm1684_vm8, %v10560_v30, 0.0  ;;  %v1830_v54 = vsel %vm1684_vm8, %v1777_v48, 0.0 }
 0x27d   : > { %v1778_v42 = vmul.f32 %v10560_v30, %v10560_v30  ;;  %v1731_v24 = vadd.f32 %v1730_v9, %v1729_v59  ;;  %v1831_v11 = vadd.f32 %v1830_v54, %v1829_v25  ;;  %v4063_v28 = vsel %vm1684_vm8, %v4013_v36, 0.0 }
 0x27e   : > { %v9577_v51 = vpop.f32.mrf.mxu0  ;;  %v9579_v39 = vpop.f32.mrf.mxu1  ;;  %v3963_v2 = vsel %vm1684_vm8, %v9358_v56, 0.0  ;;  %v4014_v50 = vmul.f32 %v9358_v56, %v9358_v56  ;;  %v4064_v3 = vadd.f32 %v4063_v28, %v4062_v0  ;;  %v1732_v48 = vsel %vm1684_vm8, %v10572_v46, 0.0 }
 0x27f   : > { %v3964_v12 = vadd.f32 %v3963_v2, %v3962_v26  ;;  %v3965_v30 = vsel %vm1684_vm8, %v9402_v7, 0.0  ;;  %v4015_v59 = vmul.f32 %v9402_v7, %v9402_v7  ;;  %v1832_v9 = vsel %vm1684_vm8, %v1778_v42, 0.0 }
 0x280   : > { %v9587_v31 = vpop.f32.mrf.mxu0  ;;  %v9589_v1 = vpop.f32.mrf.mxu1  ;;  %v1733_v54 = vadd.f32 %v1732_v48, %v1731_v24  ;;  %v1833_v0 = vadd.f32 %v1832_v9, %v1831_v11  ;;  %v1734_v26 = vsel %vm1684_vm8, %v10571_v18, 0.0  ;;  %v4065_v28 = vsel %vm1684_vm8, %v4014_v50, 0.0 }
 0x281   : > { %v1780_v56 = vmul.f32 %v10571_v18, %v10571_v18  ;;  %v4066_v7 = vadd.f32 %v4065_v28, %v4064_v3  ;;  %v3966_v60 = vadd.f32 %v3965_v30, %v3964_v12  ;;  %v4067_v42 = vsel %vm1684_vm8, %v4015_v59, 0.0 }
 0x282   : > { %v6815_v44 = vpop.f32.mrf.mxu0  ;;  %v6853_v32 = vpop.f32.mrf.mxu1  ;;  %v1735_v48 = vadd.f32 %v1734_v26, %v1733_v54  ;;  %v3967_v50 = vsel %vm1684_vm8, %v9355_v20, 0.0  ;;  %v4016_v52 = vmul.f32 %v9355_v20, %v9355_v20  ;;  %v1736_v28 = vsel %vm1684_vm8, %v10569_v8, 0.0 }
 0x283   : > { %v9599_v33 = vadd.f32 %v6849_v63, %v6815_v44  ;;  %v1779_v63 = vmul.f32 %v10572_v46, %v10572_v46  ;;  %v1836_v12 = vsel %vm1684_vm8, %v1780_v56, 0.0  ;;  %v3968_v3 = vadd.f32 %v3967_v50, %v3966_v60 }
 0x284   : > { %v9607_v25 = vpop.f32.mrf.mxu0  ;;  %v9609_v36 = vpop.f32.mrf.mxu1  ;;  %v4068_v30 = vadd.f32 %v4067_v42, %v4066_v7  ;;  %v1737_v26 = vadd.f32 %v1736_v28, %v1735_v48  ;;  %v4069_v20 = vsel %vm1684_vm8, %v4016_v52, 0.0  ;;  %v3969_v60 = vsel %vm1684_vm8, %v9361_v22, 0.0 }
 0x285   : > { %10589 = vst [vmem:[#allocation9_spill] sm:$0xff] %v9599_v33  ;;  %v1834_v11 = vsel %vm1684_vm8, %v1779_v63, 0.0  ;;  %v3970_v42 = vadd.f32 %v3969_v60, %v3968_v3  ;;  %v1738_v50 = vsel %vm1684_vm8, %v10568_v6, 0.0  ;;  %v4018_v3 = vmul.f32 %v9434_v38, %v9434_v38 }
 0x286   : > { %v9617_v2 = vpop.f32.mrf.mxu0  ;;  %v9619_v44 = vpop.f32.mrf.mxu1  ;;  %v1835_v9 = vadd.f32 %v1834_v11, %v1833_v0  ;;  %v1781_v0 = vmul.f32 %v10569_v8, %v10569_v8 }
 0x288   : > { %v9624_v24 = vpop.f32.mrf.mxu0  ;;  %v9626_v46 = vpop.f32.mrf.mxu1  ;;  %v1837_v11 = vadd.f32 %v1836_v12, %v1835_v9  ;;  %v1838_v52 = vsel %vm1684_vm8, %v1781_v0, 0.0  ;;  %v1782_v9 = vmul.f32 %v10568_v6, %v10568_v6  ;;  %v1739_v12 = vadd.f32 %v1738_v50, %v1737_v26 }
 0x289   : > { %v1740_v0 = vsel %vm1684_vm8, %v10582_v4, 0.0  ;;  %v3973_v6 = vsel %vm1684_vm8, %v9481_v55, 0.0  ;;  %v4019_v26 = vmul.f32 %v9481_v55, %v9481_v55 }
 0x28a   : > { %v6819_v33 = vpop.f32.mrf.mxu0  ;;  %v6857_v18 = vpop.f32.mrf.mxu1  ;;  %v1839_v28 = vadd.f32 %v1838_v52, %v1837_v11  ;;  %v1840_v50 = vsel %vm1684_vm8, %v1782_v9, 0.0  ;;  %v1741_v52 = vadd.f32 %v1740_v0, %v1739_v12 }
 0x28b   : > { %v9634_v59 = vadd.f32 %v6853_v32, %v6819_v33  ;;  %v4017_v33 = vmul.f32 %v9361_v22, %v9361_v22  ;;  %v4070_v32 = vadd.f32 %v4069_v20, %v4068_v30  ;;  %v3971_v20 = vsel %vm1684_vm8, %v9434_v38, 0.0 }
 0x28c   : > { %v9638_v63 = vpop.f32.mrf.mxu0  ;;  %v9640_v54 = vpop.f32.mrf.mxu1  ;;  %v1784_v38 = vmul.f32 %v10583_v13, %v10583_v13  ;;  %v4075_v9 = vsel %vm1684_vm8, %v4019_v26, 0.0 }
 0x28d   : > { %10590 = vst [vmem:[#allocation4_spill] sm:$0xff] %v9634_v59  ;;  %v4071_v22 = vsel %vm1684_vm8, %v4017_v33, 0.0  ;;  %v3972_v59 = vadd.f32 %v3971_v20, %v3970_v42  ;;  %v4073_v42 = vsel %vm1684_vm8, %v4018_v3, 0.0  ;;  %v3975_v3 = vsel %vm1684_vm8, %v9427_v27, 0.0 }
 0x28e   : > { %v9649_v56 = vpop.f32.mrf.mxu0  ;;  %v9651_v7 = vpop.f32.mrf.mxu1 }
 0x28f   : > { %10591 = vst [vmem:[#allocation47_spill] sm:$0xff] %v9651_v7  ;;  %v4072_v7 = vadd.f32 %v4071_v22, %v4070_v32  ;;  %v1783_v22 = vmul.f32 %v10582_v4, %v10582_v4  ;;  %v1742_v32 = vsel %vm1684_vm8, %v10583_v13, 0.0 }
 0x290   : > { %v9655_v8 = vpop.f32.mrf.mxu0  ;;  %v9657_v48 = vpop.f32.mrf.mxu1  ;;  %v1743_v0 = vadd.f32 %v1742_v32, %v1741_v52 }
 0x291   : > { %10592 = vst [vmem:[#allocation5_spill] sm:$0xff] %v9657_v48  ;;  %v4074_v55 = vadd.f32 %v4073_v42, %v4072_v7  ;;  %v1744_v42 = vsel %vm1684_vm8, %v10578_v10, 0.0 }
 0x292   : > { %v6823_v30 = vpop.f32.mrf.mxu0  ;;  %v6861_v60 = vpop.f32.mrf.mxu1  ;;  %v1745_v32 = vadd.f32 %v1744_v42, %v1743_v0 }
 0x293   : > { %v9667_v48 = vadd.f32 %v6857_v18, %v6823_v30  ;;  %v1841_v18 = vadd.f32 %v1840_v50, %v1839_v28  ;;  %v1842_v28 = vsel %vm1684_vm8, %v1783_v22, 0.0 }
 0x294   : > { %v9675_v11 = vpop.f32.mrf.mxu0  ;;  %v9677_v33 = vpop.f32.mrf.mxu1 }
 0x295   : > { %10593 = vst [vmem:[#allocation10_spill] sm:$0xff] %v9667_v48  ;;  %10594 = vst [vmem:[#allocation11_spill] sm:$0xff] %v9677_v33  ;;  %v3974_v48 = vadd.f32 %v3973_v6, %v3972_v59  ;;  %v1843_v50 = vadd.f32 %v1842_v28, %v1841_v18  ;;  %v1844_v59 = vsel %vm1684_vm8, %v1784_v38, 0.0  ;;  %v4076_v6 = vadd.f32 %v4075_v9, %v4074_v55 }
 0x296   : > { %v9685_v20 = vpop.f32.mrf.mxu0  ;;  %v9687_v30 = vpop.f32.mrf.mxu1  ;;  %v1785_v18 = vmul.f32 %v10578_v10, %v10578_v10  ;;  %v3977_v38 = vsel %vm1684_vm8, %v9456_v5, 0.0  ;;  %v4021_v55 = vmul.f32 %v9456_v5, %v9456_v5 }
 0x297   : > { %10595 = vst [vmem:[#allocation8_spill] sm:$0xff] %v9687_v30  ;;  %v4020_v30 = vmul.f32 %v9427_v27, %v9427_v27  ;;  %v3976_v7 = vadd.f32 %v3975_v3, %v3974_v48  ;;  %v1845_v28 = vadd.f32 %v1844_v59, %v1843_v50  ;;  %v1746_v3 = vsel %vm1684_vm8, %v10576_v47, 0.0 }
 0x298   : > { %v9692_v12 = vpop.f32.mrf.mxu0  ;;  %v9694_v4 = vpop.f32.mrf.mxu1  ;;  %v1786_v50 = vmul.f32 %v10576_v47, %v10576_v47  ;;  %v1747_v59 = vadd.f32 %v1746_v3, %v1745_v32  ;;  %v4079_v5 = vsel %vm1684_vm8, %v4021_v55, 0.0  ;;  %v4023_v47 = vmul.f32 %v9518_v35, %v9518_v35 }
 0x299   : > { %10596 = vst [vmem:[#allocation2_spill] sm:$0xff] %v9694_v4  ;;  %v4077_v27 = vsel %vm1684_vm8, %v4020_v30, 0.0  ;;  %v3978_v9 = vadd.f32 %v3977_v38, %v3976_v7  ;;  %v1846_v30 = vsel %vm1684_vm8, %v1785_v18, 0.0  ;;  %v4022_v7 = vmul.f32 %v9504_v58, %v9504_v58 }
 0x29a   : > { %v6827_v33 = vpop.f32.mrf.mxu0  ;;  %v6865_v13 = vpop.f32.mrf.mxu1  ;;  %v1847_v42 = vadd.f32 %v1846_v30, %v1845_v28  ;;  %v3981_v18 = vsel %vm1684_vm8, %v9518_v35, 0.0  ;;  %v1848_v55 = vsel %vm1684_vm8, %v1786_v50, 0.0  ;;  %v1748_v3 = vrot.slane %v1747_v59, 4 }
 0x29b   : > { %v9702_v26 = vadd.f32 %v6861_v60, %v6827_v33  ;;  %v4078_v33 = vadd.f32 %v4077_v27, %v4076_v6  ;;  %v3979_v27 = vsel %vm1684_vm8, %v9504_v58, 0.0  ;;  %v4081_v58 = vsel %vm1684_vm8, %v4022_v7, 0.0 }
 0x29c   : > { %v9706_v22 = vpop.f32.mrf.mxu0  ;;  %v9708_v52 = vpop.f32.mrf.mxu1  ;;  %v1849_v30 = vadd.f32 %v1848_v55, %v1847_v42  ;;  %v3983_v50 = vsel %vm1684_vm8, %v9501_v16, 0.0  ;;  %v4024_v42 = vmul.f32 %v9501_v16, %v9501_v16 }
 0x29d   : > { %10597 = vst [vmem:[#allocation53_spill] sm:$0xff] %v9702_v26  ;;  %10598 = vst [vmem:[#allocation55_spill] sm:$0xff] %v9708_v52  ;;  %v4080_v52 = vadd.f32 %v4079_v5, %v4078_v33 }
 0x29e   : > { %v9717_v48 = vpop.f32.mrf.mxu0  ;;  %v9719_v60 = vpop.f32.mrf.mxu1  ;;  %v1850_v4 = vrot.slane %v1849_v30, 4 }
 0x29f   : > { %10599 = vst [vmem:[#allocation13_spill] sm:$0xff] %v9717_v48  ;;  %10600 = vst [vmem:[#allocation54_spill] sm:$0xff] %v9719_v60  ;;  %v3980_v60 = vadd.f32 %v3979_v27, %v3978_v9  ;;  %v10606_v9 = vld [vmem:[#allocation26_spill] sm:$0xff] }
 0x2a0   : > { %v9723_v10 = vpop.f32.mrf.mxu0  ;;  %v9725_v0 = vpop.f32.mrf.mxu1  ;;  %v2889_v27 = vrot.slane %v10606_v9, 4 }
 0x2a1   : > { %10601 = vst [vmem:[#allocation21_spill] sm:$0xff] %v9723_v10  ;;  %10602 = vst [vmem:[#allocation37_spill] sm:$0xff] %v9725_v0  ;;  %v3982_v33 = vadd.f32 %v3981_v18, %v3980_v60  ;;  %v4025_v18 = vmul.f32 %v9507_v21, %v9507_v21  ;;  %v9769_v10 = vadd.f32 %v1850_v4, %v1849_v30 }
 0x2a2   : > { %v6831_v6 = vpop.f32.mrf.mxu0  ;;  %v6905_v38 = vpop.f32.mrf.mxu1  ;;  %v9760_v60 = vadd.f32 %v2889_v27, %v10606_v9  ;;  %v4305_v4 = vadd.f32 %v9422_v41, %v9476_v34 }
 0x2a3   : > { %v9735_v0 = vadd.f32 %v6865_v13, %v6831_v6  ;;  %v4082_v13 = vadd.f32 %v4081_v58, %v4080_v52  ;;  %v4083_v6 = vsel %vm1684_vm8, %v4023_v47, 0.0  ;;  %v3984_v58 = vadd.f32 %v3983_v50, %v3982_v33 }
 0x2a4   : > { %v9741_v32 = vpop.f32.mrf.mxu0  ;;  %v4679_v28 = vpop.f32.mrf.mxu1  ;;  %v3985_v33 = vsel %vm1684_vm8, %v9507_v21, 0.0 }
 0x2a5   : > { %10603 = vst [vmem:[#allocation57_spill] sm:$0xff] %v9735_v0  ;;  %10604 = vst [vmem:[#allocation56_spill] sm:$0xff] %v9741_v32  ;;  %v9751_v32 = vadd.f32 %v1748_v3, %v1747_v59  ;;  %v4084_v52 = vadd.f32 %v4083_v6, %v4082_v13  ;;  %v4313_v3 = vadd.f32 %v9409_v62, %v9462_v43  ;;  %v4085_v13 = vsel %vm1684_vm8, %v4024_v42, 0.0 }
 0x2a6   : > { %v9745_v26 = vpop.f32.mrf.mxu0  ;;  %v6906_v5 = vpop.f32.mrf.mxu1  ;;  %v9774_v6 = vadd.f32 %v3985_v33, %v3984_v58  ;;  %v2891_v43 = vrot.slane %v9760_v60, 2  ;;  %v10609_v58 = vld [vmem:[#allocation68_spill] sm:$0xff] }
 0x2a7   : > { %10605 = vst [vmem:[#allocation59_spill] sm:$0xff] %v9745_v26  ;;  %v1750_v26 = vrot.slane %v9751_v32, 2  ;;  %v4086_v50 = vadd.f32 %v4085_v13, %v4084_v52  ;;  %v4329_v33 = vadd.f32 %v10609_v58, %v9529_v40  ;;  %v4334_v13 = vadd.f32 %v9511_v37, %v9566_v61 }
 0x2a8   : > { %v9749_v0 = vpop.f32.mrf.mxu0  ;;  %v4682_v35 = vpop.f32.mrf.mxu1  ;;  %v9800_v40 = vadd.f32 %v9538_v19, %v9587_v31  ;;  %v9804_v37 = vadd.f32 %v9568_v23, %v9607_v25 }
 0x2a9   : > { %10607 = vst [vmem:[#allocation42_spill] sm:$0xff] %v9749_v0 }
 0x2aa   : > { %v6871_v7 = vpop.f32.mrf.mxu0  ;;  %v9757_v55 = vpop.f32.mrf.mxu1 }
 0x2ab   : > { %v4596_v0 = vadd.f32 %v6871_v7, %v9521_v15  ;;  %v10608_v15 = vld [vmem:[#allocation49_spill] sm:$0xff]  ;;  %v4087_v7 = vsel %vm1684_vm8, %v4025_v18, 0.0  ;;  %v9791_v18 = vadd.f32 %v9531_v49, %v9577_v51 }
 0x2ac   : > { %v4467_v59 = vpop.f32.mrf.mxu0  ;;  %v4695_v47 = vpop.f32.mrf.mxu1 }
 0x2ad   : > { %v4594_v16 = vadd.f32 %v4467_v59, %v9524_v14  ;;  %v2991_v14 = vrot.slane %v10608_v15, 4  ;;  %v4318_v59 = vadd.f32 %v9453_v57, %v9509_v17  ;;  %v4808_v52 = vadd.f32 %v6905_v38, %v4596_v0 }
 0x2ae   : > { %v6872_v9 = vpop.f32.mrf.mxu0  ;;  %v6910_v27 = vpop.f32.mrf.mxu1  ;;  %v3987_v57 = vrot.slane %v9774_v6, 4  ;;  %v9796_v17 = vadd.f32 %v4087_v7, %v4086_v50  ;;  %v9813_v50 = vadd.f32 %v9589_v1, %v9624_v24 }
 0x2af   : > { %v4806_v48 = vadd.f32 %v4679_v28, %v4594_v16  ;;  %v4597_v62 = vadd.f32 %v6872_v9, %v4313_v3  ;;  %v10610_v28 = vld [vmem:[#allocation16_spill] sm:$0xff]  ;;  %v4910_v19 = vmul.f32 %v4808_v52, %v4808_v52 }
 0x2b0   : > { %v4470_v30 = vpop.f32.mrf.mxu0  ;;  %v4698_v42 = vpop.f32.mrf.mxu1  ;;  %v4321_v3 = vadd.f32 %v10610_v28, %v9536_v53 }
 0x2b1   : > { %v4809_v16 = vadd.f32 %v6906_v5, %v4597_v62  ;;  %v4595_v41 = vadd.f32 %v4470_v30, %v4305_v4  ;;  %v4908_v53 = vmul.f32 %v4806_v48, %v4806_v48  ;;  %v9809_v5 = vadd.f32 %v9579_v39, %v9617_v2 }
 0x2b2   : > { %v6875_v34 = vpop.f32.mrf.mxu0  ;;  %v9793_v9 = vpop.f32.mrf.mxu1  ;;  %v4838_v62 = vsel %vm1684_vm8, %v4806_v48, 0.0  ;;  %v4841_v4 = vsel %vm1684_vm8, %v4808_v52, 0.0 }
 0x2b3   : > { %v4807_v61 = vadd.f32 %v4682_v35, %v4595_v41  ;;  %v4600_v49 = vadd.f32 %v6875_v34, %v9547_v45  ;;  %v7058_v0 = vpack.i.bf16 %v4809_v16, %v4808_v52  ;;  %v4940_v39 = vsel %vm1684_vm8, %v4908_v53, 0.0 }
 0x2b4   : > { %v4483_v51 = vpop.f32.mrf.mxu0  ;;  %v4711_v38 = vpop.f32.mrf.mxu1  ;;  %v4911_v1 = vmul.f32 %v4809_v16, %v4809_v16  ;;  %v4943_v52 = vsel %vm1684_vm8, %v4910_v19, 0.0 }
 0x2b5   : > { %v4598_v31 = vadd.f32 %v4483_v51, %v4318_v59  ;;  %v4839_v23 = vsel %vm1684_vm8, %v4807_v61, 0.0  ;;  %v4909_v35 = vmul.f32 %v4807_v61, %v4807_v61  ;;  %7059 = vrot.lane.b32.xlu1 %v7058_v0, %s7184_s8  ;;  %v7063_v25 = vpack.i.bf16 %v4807_v61, %v4806_v48 }
 0x2b6   : > { %v6876_v45 = vpop.f32.mrf.mxu0  ;;  %v6914_v7 = vpop.f32.mrf.mxu1  ;;  %v4840_v2 = vadd.f32 %v4839_v23, %v4838_v62  ;;  %v4812_v59 = vadd.f32 %v9757_v55, %v4600_v49  ;;  %v9825_v48 = vadd.f32 %v9609_v36, %v9638_v63  ;;  %v4945_v63 = vsel %vm1684_vm8, %v4911_v1, 0.0 }
 0x2b7   : > { %v4810_v30 = vadd.f32 %v4695_v47, %v4598_v31  ;;  %v4941_v24 = vsel %vm1684_vm8, %v4909_v35, 0.0  ;;  %v4601_v58 = vadd.f32 %v6876_v45, %v4329_v33  ;;  %7064 = vrot.lane.b32.xlu0 %v7063_v25, %s7184_s8  ;;  %v4843_v47 = vsel %vm1684_vm8, %v4809_v16, 0.0 }
 0x2b8   : > { %v4486_v28 = vpop.f32.mrf.mxu0  ;;  %v4714_v41 = vpop.f32.mrf.mxu1  ;;  %v4842_v34 = vadd.f32 %v4841_v4, %v4840_v2  ;;  %v4942_v53 = vadd.f32 %v4941_v24, %v4940_v39  ;;  %v9831_v33 = vadd.f32 %v9619_v44, %v9649_v56  ;;  %v4914_v19 = vmul.f32 %v4812_v59, %v4812_v59 }
 0x2b9   : > { %v4912_v61 = vmul.f32 %v4810_v30, %v4810_v30  ;;  %v4813_v51 = vadd.f32 %v6910_v27, %v4601_v58  ;;  %v4599_v0 = vadd.f32 %v4486_v28, %v4321_v3  ;;  %v4845_v23 = vsel %vm1684_vm8, %v4810_v30, 0.0 }
 0x2ba   : > { %v6879_v31 = vpop.f32.mrf.mxu0  ;;  %v6917_v55 = vpop.f32.mrf.mxu1  ;;  %v4944_v49 = vadd.f32 %v4943_v52, %v4942_v53  ;;  %v4844_v62 = vadd.f32 %v4843_v47, %v4842_v34  ;;  %v4849_v1 = vsel %vm1684_vm8, %v4812_v59, 0.0 }
 0x2bb   : > { %v4604_v36 = vadd.f32 %v6879_v31, %v9564_v29  ;;  %v4811_v35 = vadd.f32 %v4698_v42, %v4599_v0  ;;  %v4947_v25 = vsel %vm1684_vm8, %v4912_v61, 0.0  ;;  %v4915_v39 = vmul.f32 %v4813_v51, %v4813_v51 }
 0x2bc   : > { %v4499_v16 = vpop.f32.mrf.mxu0  ;;  %v4727_v45 = vpop.f32.mrf.mxu1  ;;  %v4846_v27 = vadd.f32 %v4845_v23, %v4844_v62  ;;  %v4946_v3 = vadd.f32 %v4945_v63, %v4944_v49  ;;  %v7068_v2 = vpack.i.bf16 %v4813_v51, %v4812_v59  ;;  %v4951_v0 = vsel %vm1684_vm8, %v4914_v19, 0.0 }
 0x2bd   : > { %v4602_v4 = vadd.f32 %v4499_v16, %v4334_v13  ;;  %v4847_v44 = vsel %vm1684_vm8, %v4811_v35, 0.0  ;;  %v4913_v56 = vmul.f32 %v4811_v35, %v4811_v35  ;;  %v4816_v42 = vadd.f32 %v9793_v9, %v4604_v36  ;;  %v10611_v16 = vld [vmem:[#allocation9_spill] sm:$0xff] }
 0x2be   : > { %v6880_v24 = vpop.f32.mrf.mxu0  ;;  %v6918_v29 = vpop.f32.mrf.mxu1  ;;  %v4948_v58 = vadd.f32 %v4947_v25, %v4946_v3  ;;  %v4848_v28 = vadd.f32 %v4847_v44, %v4846_v27  ;;  %7069 = vrot.lane.b32.xlu1 %v7068_v2, %s7184_s8  ;;  %v7073_v53 = vpack.i.bf16 %v4811_v35, %v4810_v30  ;;  %v4851_v62 = vsel %vm1684_vm8, %v4813_v51, 0.0 }
 0x2bf   : > { %v4949_v52 = vsel %vm1684_vm8, %v4913_v56, 0.0  ;;  %v4814_v34 = vadd.f32 %v4711_v38, %v4602_v4  ;;  %v4605_v13 = vadd.f32 %v6880_v24, %v9791_v18  ;;  %v4953_v9 = vsel %vm1684_vm8, %v4915_v39, 0.0 }
 0x2c0   : > { %v4502_v47 = vpop.f32.mrf.mxu0  ;;  %v4730_v61 = vpop.f32.mrf.mxu1  ;;  %v4850_v31 = vadd.f32 %v4849_v1, %v4848_v28  ;;  %v4950_v49 = vadd.f32 %v4949_v52, %v4948_v58  ;;  %7074 = vrot.lane.b32.xlu0 %v7073_v53, %s7184_s8  ;;  %v4918_v27 = vmul.f32 %v4816_v42, %v4816_v42 }
 0x2c1   : > { %v4603_v59 = vadd.f32 %v4502_v47, %v9800_v40  ;;  %v4916_v36 = vmul.f32 %v4814_v34, %v4814_v34  ;;  %v4817_v63 = vadd.f32 %v6914_v7, %v4605_v13  ;;  %v4853_v3 = vsel %vm1684_vm8, %v4814_v34, 0.0 }
 0x2c2   : > { %v6883_v38 = vpop.f32.mrf.mxu0  ;;  %v9848_v23 = vpop.f32.mrf.mxu1  ;;  %v4952_v18 = vadd.f32 %v4951_v0, %v4950_v49  ;;  %v4852_v30 = vadd.f32 %v4851_v62, %v4850_v31  ;;  %v4369_v0 = vadd.f32 %v9626_v46, %v9655_v8  ;;  %v9862_v31 = vadd.f32 %v9640_v54, %v9675_v11 }
 0x2c3   : > { %v4815_v35 = vadd.f32 %v4714_v41, %v4603_v59  ;;  %v4608_v19 = vadd.f32 %v6883_v38, %v10611_v16  ;;  %v4955_v40 = vsel %vm1684_vm8, %v4916_v36, 0.0  ;;  %v7078_v25 = vpack.i.bf16 %v4817_v63, %v4816_v42 }
 0x2c4   : > { %v4515_v51 = vpop.f32.mrf.mxu0  ;;  %v4743_v4 = vpop.f32.mrf.mxu1  ;;  %v4854_v39 = vadd.f32 %v4853_v3, %v4852_v30  ;;  %v4954_v7 = vadd.f32 %v4953_v9, %v4952_v18  ;;  %v4919_v2 = vmul.f32 %v4817_v63, %v4817_v63  ;;  %v4959_v46 = vsel %vm1684_vm8, %v4918_v27, 0.0 }
 0x2c5   : > { %v4855_v44 = vsel %vm1684_vm8, %v4815_v35, 0.0  ;;  %v4917_v56 = vmul.f32 %v4815_v35, %v4815_v35  ;;  %v4820_v24 = vadd.f32 %v6917_v55, %v4608_v19  ;;  %v4606_v1 = vadd.f32 %v4515_v51, %v9804_v37  ;;  %7079 = vrot.lane.b32.xlu1 %v7078_v25, %s7184_s8  ;;  %v10613_v51 = vld [vmem:[#allocation4_spill] sm:$0xff] }
 0x2c6   : > { %v6884_v41 = vpop.f32.mrf.mxu0  ;;  %v7083_v58 = vpack.i.bf16 %v4815_v35, %v4814_v34  ;;  %v6922_v28 = vpop.f32.mrf.mxu1  ;;  %v4956_v52 = vadd.f32 %v4955_v40, %v4954_v7  ;;  %v4856_v13 = vadd.f32 %v4855_v44, %v4854_v39  ;;  %v4857_v37 = vsel %vm1684_vm8, %v4816_v42, 0.0 }
 0x2c7   : > { %v4957_v53 = vsel %vm1684_vm8, %v4917_v56, 0.0  ;;  %v4609_v47 = vadd.f32 %v6884_v41, %v9809_v5  ;;  %v4818_v55 = vadd.f32 %v4727_v45, %v4606_v1  ;;  %v10612_v5 = vld [vmem:[#allocation47_spill] sm:$0xff]  ;;  %v4859_v54 = vsel %vm1684_vm8, %v4817_v63, 0.0 }
 0x2c8   : > { %7084 = vrot.lane.b32.xlu0 %v7083_v58, %s7184_s8  ;;  %v4518_v34 = vpop.f32.mrf.mxu0  ;;  %v4746_v49 = vpop.f32.mrf.mxu1  ;;  %v4858_v59 = vadd.f32 %v4857_v37, %v4856_v13  ;;  %v4958_v62 = vadd.f32 %v4957_v53, %v4956_v52  ;;  %v9869_v38 = vadd.f32 %v10612_v5, %v9685_v20  ;;  %v4961_v42 = vsel %vm1684_vm8, %v4919_v2, 0.0  ;;  %v10614_v13 = vld [vmem:[#allocation5_spill] sm:$0xff] }
 0x2c9   : > { %v4821_v9 = vadd.f32 %v6918_v29, %v4609_v47  ;;  %v4607_v36 = vadd.f32 %v4518_v34, %v9813_v50  ;;  %v4920_v8 = vmul.f32 %v4818_v55, %v4818_v55  ;;  %v4922_v30 = vmul.f32 %v4820_v24, %v4820_v24 }
 0x2ca   : > { %v6887_v11 = vpop.f32.mrf.mxu0  ;;  %v9873_v45 = vpop.f32.mrf.mxu1  ;;  %v4960_v18 = vadd.f32 %v4959_v46, %v4958_v62  ;;  %v4860_v35 = vadd.f32 %v4859_v54, %v4858_v59  ;;  %v4861_v29 = vsel %vm1684_vm8, %v4818_v55, 0.0  ;;  %v4385_v53 = vadd.f32 %v10614_v13, %v9692_v12 }
 0x2cb   : > { %v4923_v50 = vmul.f32 %v4821_v9, %v4821_v9  ;;  %v4819_v16 = vadd.f32 %v4730_v61, %v4607_v36  ;;  %v7088_v20 = vpack.i.bf16 %v4821_v9, %v4820_v24  ;;  %v4612_v63 = vadd.f32 %v6887_v11, %v10613_v51  ;;  %v10617_v11 = vld [vmem:[#allocation8_spill] sm:$0xff] }
 0x2cc   : > { %v4531_v19 = vpop.f32.mrf.mxu0  ;;  %v4759_v3 = vpop.f32.mrf.mxu1  ;;  %v4862_v40 = vadd.f32 %v4861_v29, %v4860_v35  ;;  %v4962_v27 = vadd.f32 %v4961_v42, %v4960_v18  ;;  %v4963_v39 = vsel %vm1684_vm8, %v4920_v8, 0.0  ;;  %v4865_v37 = vsel %vm1684_vm8, %v4820_v24, 0.0  ;;  %v10616_v24 = vld [vmem:[#allocation13_spill] sm:$0xff] }
 0x2cd   : > { %v4610_v25 = vadd.f32 %v4531_v19, %v9825_v48  ;;  %v4863_v7 = vsel %vm1684_vm8, %v4819_v16, 0.0  ;;  %v4921_v44 = vmul.f32 %v4819_v16, %v4819_v16  ;;  %7089 = vrot.lane.b32.xlu1 %v7088_v20, %s7184_s8  ;;  %v7093_v2 = vpack.i.bf16 %v4819_v16, %v4818_v55  ;;  %v10615_v48 = vld [vmem:[#allocation11_spill] sm:$0xff] }
 0x2ce   : > { %v6888_v56 = vpop.f32.mrf.mxu0  ;;  %v6926_v1 = vpop.f32.mrf.mxu1  ;;  %v4964_v61 = vadd.f32 %v4963_v39, %v4962_v27  ;;  %v4864_v41 = vadd.f32 %v4863_v7, %v4862_v40  ;;  %v9887_v47 = vadd.f32 %v10615_v48, %v9706_v22  ;;  %v4967_v62 = vsel %vm1684_vm8, %v4922_v30, 0.0 }
 0x2cf   : > { %v4822_v58 = vadd.f32 %v4743_v4, %v4610_v25  ;;  %v4613_v52 = vadd.f32 %v6888_v56, %v9831_v33  ;;  %v4965_v34 = vsel %vm1684_vm8, %v4921_v44, 0.0  ;;  %7094 = vrot.lane.b32.xlu0 %v7093_v2, %s7184_s8  ;;  %v4824_v33 = vadd.f32 %v9848_v23, %v4612_v63  ;;  %v10618_v23 = vld [vmem:[#allocation10_spill] sm:$0xff] }
 0x2d0   : > { %v4534_v55 = vpop.f32.mrf.mxu0  ;;  %v4762_v59 = vpop.f32.mrf.mxu1  ;;  %v4866_v4 = vadd.f32 %v4865_v37, %v4864_v41  ;;  %v4966_v36 = vadd.f32 %v4965_v34, %v4964_v61  ;;  %v4867_v12 = vsel %vm1684_vm8, %v4821_v9, 0.0  ;;  %v9899_v42 = vadd.f32 %v10617_v11, %v10616_v24  ;;  %v10619_v37 = vld [vmem:[#allocation21_spill] sm:$0xff]  ;;  %v10620_v34 = vld [vmem:[#allocation2_spill] sm:$0xff] }
 0x2d1   : > { %v4924_v5 = vmul.f32 %v4822_v58, %v4822_v58  ;;  %v4825_v46 = vadd.f32 %v6922_v28, %v4613_v52  ;;  %v4611_v22 = vadd.f32 %v4534_v55, %v4369_v0  ;;  %v4969_v18 = vsel %vm1684_vm8, %v4923_v50, 0.0 }
 0x2d2   : > { %v6891_v54 = vpop.f32.mrf.mxu0  ;;  %v9895_v8 = vpop.f32.mrf.mxu1  ;;  %v4968_v35 = vadd.f32 %v4967_v62, %v4966_v36  ;;  %v4868_v30 = vadd.f32 %v4867_v12, %v4866_v4  ;;  %v4869_v29 = vsel %vm1684_vm8, %v4822_v58, 0.0  ;;  %v4926_v0 = vmul.f32 %v4824_v33, %v4824_v33 }
 0x2d3   : > { %v4823_v16 = vadd.f32 %v4746_v49, %v4611_v22  ;;  %v4616_v19 = vadd.f32 %v6891_v54, %v10618_v23  ;;  %v7098_v20 = vpack.i.bf16 %v4825_v46, %v4824_v33  ;;  %v4971_v63 = vsel %vm1684_vm8, %v4924_v5, 0.0 }
 0x2d4   : > { %v4547_v9 = vpop.f32.mrf.mxu0  ;;  %v4775_v28 = vpop.f32.mrf.mxu1  ;;  %v4870_v40 = vadd.f32 %v4869_v29, %v4868_v30  ;;  %v4970_v27 = vadd.f32 %v4969_v18, %v4968_v35  ;;  %v4873_v49 = vsel %vm1684_vm8, %v4824_v33, 0.0  ;;  %v4927_v56 = vmul.f32 %v4825_v46, %v4825_v46  ;;  %v10621_v35 = vld [vmem:[#allocation53_spill] sm:$0xff] }
 0x2d5   : > { %v4614_v51 = vadd.f32 %v4547_v9, %v9862_v31  ;;  %v4871_v25 = vsel %vm1684_vm8, %v4823_v16, 0.0  ;;  %v4925_v50 = vmul.f32 %v4823_v16, %v4823_v16  ;;  %7099 = vrot.lane.b32.xlu1 %v7098_v20, %s7184_s8  ;;  %v7103_v7 = vpack.i.bf16 %v4823_v16, %v4822_v58 }
 0x2d6   : > { %v6892_v39 = vpop.f32.mrf.mxu0  ;;  %v4972_v44 = vadd.f32 %v4971_v63, %v4970_v27  ;;  %v4872_v2 = vadd.f32 %v4871_v25, %v4870_v40  ;;  %v6930_v61 = vpop.f32.mrf.mxu1  ;;  %v4828_v52 = vadd.f32 %v9873_v45, %v4616_v19  ;;  %v4401_v55 = vadd.f32 %v10620_v34, %v10619_v37 }
 0x2d7   : > { %v4973_v41 = vsel %vm1684_vm8, %v4925_v50, 0.0  ;;  %v4826_v31 = vadd.f32 %v4759_v3, %v4614_v51  ;;  %v4617_v13 = vadd.f32 %v6892_v39, %v9869_v38  ;;  %7104 = vrot.lane.b32.xlu0 %v7103_v7, %s7184_s8  ;;  %v4975_v36 = vsel %vm1684_vm8, %v4926_v0, 0.0 }
 0x2d8   : > { %v4550_v48 = vpop.f32.mrf.mxu0  ;;  %v4874_v58 = vadd.f32 %v4873_v49, %v4872_v2  ;;  %v4974_v62 = vadd.f32 %v4973_v41, %v4972_v44  ;;  %v4875_v33 = vsel %vm1684_vm8, %v4825_v46, 0.0  ;;  %v4977_v45 = vsel %vm1684_vm8, %v4927_v56, 0.0  ;;  %v4778_v24 = vpop.f32.mrf.mxu1 }
 0x2d9   : > { %v4615_v4 = vadd.f32 %v4550_v48, %v4385_v53  ;;  %v4928_v12 = vmul.f32 %v4826_v31, %v4826_v31  ;;  %v4829_v5 = vadd.f32 %v6926_v1, %v4617_v13  ;;  %v4930_v11 = vmul.f32 %v4828_v52, %v4828_v52  ;;  %v10623_v13 = vld [vmem:[#allocation55_spill] sm:$0xff] }
 0x2da   : > { %v6895_v22 = vpop.f32.mrf.mxu0  ;;  %v4976_v3 = vadd.f32 %v4975_v36, %v4974_v62  ;;  %v4876_v38 = vadd.f32 %v4875_v33, %v4874_v58  ;;  %v4877_v18 = vsel %vm1684_vm8, %v4826_v31, 0.0  ;;  %v6933_v25 = vpop.f32.mrf.mxu1  ;;  %v4089_v50 = vrot.slane %v9796_v17, 4  ;;  %v10625_v62 = vld [vmem:[#allocation54_spill] sm:$0xff] }
 0x2db   : > { %v4827_v54 = vadd.f32 %v4762_v59, %v4615_v4  ;;  %v4620_v30 = vadd.f32 %v6895_v22, %v10621_v35  ;;  %v7108_v53 = vpack.i.bf16 %v4829_v5, %v4828_v52  ;;  %v4979_v1 = vsel %vm1684_vm8, %v4928_v12, 0.0 }
 0x2dc   : > { %v4563_v29 = vpop.f32.mrf.mxu0  ;;  %v4878_v16 = vadd.f32 %v4877_v18, %v4876_v38  ;;  %v4978_v23 = vadd.f32 %v4977_v45, %v4976_v3  ;;  %v4931_v9 = vmul.f32 %v4829_v5, %v4829_v5  ;;  %v4881_v39 = vsel %vm1684_vm8, %v4828_v52, 0.0  ;;  %v10624_v52 = vld [vmem:[#allocation59_spill] sm:$0xff]  ;;  %v4791_v33 = vpop.f32.mrf.mxu1 }
 0x2dd   : > { %v4879_v46 = vsel %vm1684_vm8, %v4827_v54, 0.0  ;;  %v4929_v19 = vmul.f32 %v4827_v54, %v4827_v54  ;;  %v4618_v20 = vadd.f32 %v4563_v29, %v9887_v47  ;;  %7109 = vrot.lane.b32.xlu1 %v7108_v53, %s7184_s8  ;;  %v7113_v0 = vpack.i.bf16 %v4827_v54, %v4826_v31  ;;  %v10622_v31 = vld [vmem:[#allocation56_spill] sm:$0xff]  ;;  %v10626_v54 = vld [vmem:[#allocation57_spill] sm:$0xff] }
 0x2de   : > { %v6896_v59 = vpop.f32.mrf.mxu0  ;;  %v4980_v40 = vadd.f32 %v4979_v1, %v4978_v23  ;;  %v4880_v27 = vadd.f32 %v4879_v46, %v4878_v16  ;;  %v4832_v7 = vadd.f32 %v9895_v8, %v4620_v30  ;;  %v4414_v48 = vadd.f32 %v10623_v13, %v10622_v31  ;;  %v6934_v46 = vpop.f32.mrf.mxu1  ;;  %v10627_v1 = vld [vmem:[#allocation42_spill] sm:$0xff] }
 0x2df   : > { %v4981_v51 = vsel %vm1684_vm8, %v4929_v19, 0.0  ;;  %v4621_v63 = vadd.f32 %v6896_v59, %v9899_v42  ;;  %v4830_v49 = vadd.f32 %v4775_v28, %v4618_v20  ;;  %7114 = vrot.lane.b32.xlu0 %v7113_v0, %s7184_s8  ;;  %v4983_v42 = vsel %vm1684_vm8, %v4930_v11, 0.0 }
 0x2e0   : > { %v4566_v47 = vpop.f32.mrf.mxu0  ;;  %v4882_v44 = vadd.f32 %v4881_v39, %v4880_v27  ;;  %v4982_v56 = vadd.f32 %v4981_v51, %v4980_v40  ;;  %v4883_v37 = vsel %vm1684_vm8, %v4829_v5, 0.0  ;;  %v4425_v8 = vadd.f32 %v10625_v62, %v10624_v52 }
 0x2e1   : > { %v4833_v2 = vadd.f32 %v6930_v61, %v4621_v63  ;;  %v4619_v41 = vadd.f32 %v4566_v47, %v4401_v55  ;;  %v4932_v34 = vmul.f32 %v4830_v49, %v4830_v49  ;;  %v4985_v28 = vsel %vm1684_vm8, %v4931_v9, 0.0  ;;  %v10628_v9 = vld [vmem:[#allocation37_spill] sm:$0xff] }
 0x2e2   : > { %v6899_v58 = vpop.f32.mrf.mxu0  ;;  %v4984_v4 = vadd.f32 %v4983_v42, %v4982_v56  ;;  %v4884_v36 = vadd.f32 %v4883_v37, %v4882_v44  ;;  %v4934_v12 = vmul.f32 %v4832_v7, %v4832_v7  ;;  %v4885_v61 = vsel %vm1684_vm8, %v4830_v49, 0.0  ;;  %v4794_v42 = vpop.f32.mrf.mxu1 }
 0x2e3   : > { %v4831_v55 = vadd.f32 %v4778_v24, %v4619_v41  ;;  %v7118_v45 = vpack.i.bf16 %v4833_v2, %v4832_v7  ;;  %v4624_v5 = vadd.f32 %v6899_v58, %v10626_v54  ;;  %v4987_v18 = vsel %vm1684_vm8, %v4932_v34, 0.0 }
 0x2e4   : > { %v4579_v22 = vpop.f32.mrf.mxu0  ;;  %v4886_v3 = vadd.f32 %v4885_v61, %v4884_v36  ;;  %v4986_v38 = vadd.f32 %v4985_v28, %v4984_v4  ;;  %v4417_v20 = vadd.f32 %v10628_v9, %v10627_v1  ;;  %v4889_v59 = vsel %vm1684_vm8, %v4832_v7, 0.0 }
 0x2e5   : > { %v4622_v11 = vadd.f32 %v4579_v22, %v4414_v48  ;;  %v4887_v35 = vsel %vm1684_vm8, %v4831_v55, 0.0  ;;  %v4933_v30 = vmul.f32 %v4831_v55, %v4831_v55  ;;  %7119 = vrot.lane.b32.xlu1 %v7118_v45, %s7184_s8  ;;  %v7123_v53 = vpack.i.bf16 %v4831_v55, %v4830_v49 }
 0x2e6   : > { %v6900_v29 = vpop.f32.mrf.mxu0  ;;  %v4988_v16 = vadd.f32 %v4987_v18, %v4986_v38  ;;  %v4888_v23 = vadd.f32 %v4887_v35, %v4886_v3  ;;  %v4935_v0 = vmul.f32 %v4833_v2, %v4833_v2  ;;  %v4991_v51 = vsel %vm1684_vm8, %v4934_v12, 0.0 }
 0x2e7   : > { %v4834_v24 = vadd.f32 %v4791_v33, %v4622_v11  ;;  %v4625_v19 = vadd.f32 %v6900_v29, %v4425_v8  ;;  %v4989_v40 = vsel %vm1684_vm8, %v4933_v30, 0.0  ;;  %7124 = vrot.lane.b32.xlu0 %v7123_v53, %s7184_s8  ;;  %v4836_v49 = vadd.f32 %v6933_v25, %v4624_v5 }
 0x2e8   : > { %v4582_v27 = vpop.f32.mrf.mxu0  ;;  %v4890_v63 = vadd.f32 %v4889_v59, %v4888_v23  ;;  %v4990_v39 = vadd.f32 %v4989_v40, %v4988_v16  ;;  %v4891_v47 = vsel %vm1684_vm8, %v4833_v2, 0.0  ;;  %v2992_v7 = vadd.f32 %v2991_v14, %v10608_v15 }
 0x2e9   : > { %v4936_v44 = vmul.f32 %v4834_v24, %v4834_v24  ;;  %v4837_v56 = vadd.f32 %v6934_v46, %v4625_v19  ;;  %v4623_v41 = vadd.f32 %v4582_v27, %v4417_v20  ;;  %v3988_v31 = vadd.f32 %v3987_v57, %v9774_v6 }
 0x2ea   : > { %v4992_v13 = vadd.f32 %v4991_v51, %v4990_v39  ;;  %v4892_v48 = vadd.f32 %v4891_v47, %v4890_v63  ;;  %v4993_v37 = vsel %vm1684_vm8, %v4935_v0, 0.0  ;;  %v4893_v25 = vsel %vm1684_vm8, %v4834_v24, 0.0 }
 0x2eb   : > { %v4835_v34 = vadd.f32 %v4794_v42, %v4623_v41  ;;  %v7133_v2 = vpack.i.bf16 %v4837_v56, %v4836_v49  ;;  %v4090_v58 = vadd.f32 %v4089_v50, %v9796_v17  ;;  %v4938_v52 = vmul.f32 %v4836_v49, %v4836_v49 }
 0x2ec   : > { %v4894_v62 = vadd.f32 %v4893_v25, %v4892_v48  ;;  %v4994_v15 = vadd.f32 %v4993_v37, %v4992_v13  ;;  %v4995_v14 = vsel %vm1684_vm8, %v4936_v44, 0.0  ;;  %v2993_v28 = vrot.slane %v2992_v7, 2  ;;  %v5491_v48 = vld [vmem:[%s9554_s14] sm:$0x1] }
 0x2ed   : > { %v4895_v6 = vsel %vm1684_vm8, %v4835_v34, 0.0  ;;  %v4937_v57 = vmul.f32 %v4835_v34, %v4835_v34  ;;  %7134 = vrot.lane.b32.xlu1 %v7133_v2, %s7184_s8  ;;  %v7128_v8 = vpack.i.bf16 %v4835_v34, %v4834_v24  ;;  %v3989_v4 = vrot.slane %v3988_v31, 2  ;;  %v5495_v34 = vld [vmem:[%s9560_s21] sm:$0x1] }
 0x2ee   : > { %v4996_v36 = vadd.f32 %v4995_v14, %v4994_v15  ;;  %v4896_v33 = vadd.f32 %v4895_v6, %v4894_v62  ;;  %v1852_v12 = vrot.slane %v9769_v10, 2  ;;  %v4897_v61 = vsel %vm1684_vm8, %v4836_v49, 0.0 }
 0x2ef   : > { %v4939_v17 = vmul.f32 %v4837_v56, %v4837_v56  ;;  %v4997_v50 = vsel %vm1684_vm8, %v4937_v57, 0.0  ;;  %7129 = vrot.lane.b32.xlu0 %v7128_v8, %s7184_s8  ;;  %v2892_v55 = vadd.f32 %v2891_v43, %v9760_v60  ;;  %v4091_v22 = vrot.slane %v4090_v58, 2  ;;  %v10629_v57 = vld [vmem:[#allocation15_spill] sm:$0xff] }
 0x2f0   : > { %v4898_v45 = vadd.f32 %v4897_v61, %v4896_v33  ;;  %v4998_v3 = vadd.f32 %v4997_v50, %v4996_v36  ;;  %v1751_v38 = vadd.f32 %v1750_v26, %v9751_v32  ;;  %v4999_v54 = vsel %vm1684_vm8, %v4938_v52, 0.0 }
 0x2f1   : > { %v4899_v5 = vsel %vm1684_vm8, %v4837_v56, 0.0  ;;  %v2994_v11 = vadd.f32 %v2993_v28, %v2992_v7  ;;  %v3990_v18 = vadd.f32 %v3989_v4, %v3988_v31  ;;  %v1853_v29 = vadd.f32 %v1852_v12, %v9769_v10  ;;  %v10630_v28 = vld [vmem:[#allocation22_spill] sm:$0xff] }
 0x2f2   : > { %v4900_v35 = vadd.f32 %v4899_v5, %v4898_v45  ;;  %v5000_v30 = vadd.f32 %v4999_v54, %v4998_v3  ;;  %v5001_v53 = vsel %vm1684_vm8, %v4939_v17, 0.0  ;;  %v2893_v60 = vrot.slane %v2892_v55, 1  ;;  %v10631_v17 = vld [vmem:[#allocation17_spill] sm:$0xff] }
 0x2f3   : > { %v4092_v43 = vadd.f32 %v4091_v22, %v4090_v58  ;;  %v1752_v46 = vrot.slane %v1751_v38, 1  ;;  %v2995_v24 = vrot.slane %v2994_v11, 1  ;;  %v3991_v19 = vrot.slane %v3990_v18, 1 }
 0x2f4   : > { %v4901_v16 = vrot.slane %v4900_v35, 4  ;;  %v5002_v23 = vadd.f32 %v5001_v53, %v5000_v30  ;;  %v1854_v1 = vrot.slane %v1853_v29, 1  ;;  %v2894_v9 = vadd.f32 %v2893_v60, %v2892_v55  ;;  %v10632_v55 = vld [vmem:[#allocation12_spill] sm:$0xff] }
 0x2f5   : > { %v4093_v20 = vrot.slane %v4092_v43, 1  ;;  %v1753_v40 = vadd.f32 %v1752_v46, %v1751_v38  ;;  %v2996_v27 = vadd.f32 %v2995_v24, %v2994_v11  ;;  %v3992_v10 = vadd.f32 %v3991_v19, %v3990_v18  ;;  %v10633_v18 = vld [vmem:[#allocation24_spill] sm:$0xff]  ;;  %v10636_v24 = vld [vmem:[#allocation43_spill] sm:$0xff] }
 0x2f6   : > { %v4902_v26 = vadd.f32 %v4901_v16, %v4900_v35  ;;  %v5003_v32 = vrot.slane %v5002_v23, 4  ;;  %v1855_v39 = vadd.f32 %v1854_v1, %v1853_v29  ;;  %v10634_v30 = vld [vmem:[#allocation28_spill] sm:$0xff] }
 0x2f7   : > { %v2895_v49 = vadd.f32 %v2894_v9, %v1753_v40  ;;  %v4094_v47 = vadd.f32 %v4093_v20, %v4092_v43 }
 0x2f8   : > { %v4903_v59 = vrot.slane %v4902_v26, 2  ;;  %v5004_v0 = vadd.f32 %v5003_v32, %v5002_v23  ;;  %v2997_v41 = vadd.f32 %v2996_v27, %v1855_v39  ;;  %v10635_v23 = vld [vmem:[#allocation45_spill] sm:$0xff]  ;;  %v10638_v27 = vld [vmem:[#allocation63_spill] sm:$0xff] }
 0x2f9   : > { %v3993_v7 = vadd.f32 %v3992_v10, %v2895_v49 }
 0x2fa   : > { %v4904_v51 = vadd.f32 %v4903_v59, %v4902_v26  ;;  %v5005_v63 = vrot.slane %v5004_v0, 2  ;;  %v4095_v42 = vadd.f32 %v4094_v47, %v2997_v41  ;;  %v10639_v47 = vld [vmem:[#allocation67_spill] sm:$0xff] }
 0x2fc   : > { %v4905_v44 = vrot.slane %v4904_v51, 1  ;;  %v5006_v56 = vadd.f32 %v5005_v63, %v5004_v0  ;;  %v10637_v0 = vld [vmem:[#allocation32_spill] sm:$0xff] }
 0x2fe   : > { %v4906_v31 = vadd.f32 %v4905_v44, %v4904_v51  ;;  %v5007_v13 = vrot.slane %v5006_v56, 1 }
 0x300   : > { %v4907_v37 = vadd.f32 %v4906_v31, %v3993_v7  ;;  %v5008_v25 = vadd.f32 %v5007_v13, %v5006_v56  ;;  %v10640_v56 = vld [vmem:[#allocation30_spill] sm:$0xff] }
 0x302   : > { %v5009_v2 = vadd.f32 %v5008_v25, %v4095_v42  ;;  %v5492_v58 = vadd.f32 %v5491_v48, %v4907_v37  ;;  %v10641_v25 = vld [vmem:[#allocation36_spill] sm:$0xff] }
 0x304   : > { %5494 = vst.msk [vmem:[%s9554_s14] sm:$0x1] %vm245_vm10, %v5492_v58  ;;  %v5496_v52 = vadd.f32 %v5495_v34, %v5009_v2  ;;  %v10642_v2 = vld [vmem:[#allocation64_spill] sm:$0xff] }
 0x306   : > { %5497 = vst.msk [vmem:[%s9560_s21] sm:$0x1] %vm245_vm10, %v5496_v52 }
 0x327   : > { %v7060_v62 = vpop.permute.xlu1 %7059 }
 0x328   : > { %v7062_v15 = vunpack.i.h.bf16 %v7060_v62  ;;  %v7061_v14 = vunpack.i.l.bf16 %v7060_v62 }
 0x329   : > { %v7065_v6 = vpop.permute.xlu0 %7064 }
 0x32a   : > { %v5141_v8 = vsel %vm1684_vm8, %v10629_v57, %v7062_v15  ;;  %v5140_v4 = vsel %vm1684_vm8, %v10630_v28, %v7061_v14  ;;  %v7067_v36 = vunpack.i.h.bf16 %v7065_v6  ;;  %v7066_v33 = vunpack.i.l.bf16 %v7065_v6  ;;  %v10643_v6 = vld [vmem:[#allocation65_spill] sm:$0xff] }
 0x32b   : > { %v6062_v12 = vpack.c.bf16 %v5141_v8, %v5141_v8  ;;  %v6061_v61 = vpack.c.bf16 %v5140_v4, %v5140_v4  ;;  %v10644_v8 = vld [vmem:[#allocation33_spill] sm:$0xff] }
 0x32c   : > { %v5139_v50 = vsel %vm1684_vm8, %v10631_v17, %v7067_v36  ;;  %v5138_v22 = vsel %vm1684_vm8, %v10632_v55, %v7066_v33 }
 0x32d   : > { %5434 = vst.msk [vmem:[%s9017_s11 + $0x1c] sm:$0xf] %vm5426_vm9, %v6062_v12  ;;  %5433 = vst.msk [vmem:[%s9017_s11 + $0x18] sm:$0xf] %vm5426_vm9, %v6061_v61  ;;  %v6058_v45 = vpack.c.bf16 %v5139_v50, %v5139_v50  ;;  %v6057_v3 = vpack.c.bf16 %v5138_v22, %v5138_v22  ;;  %v10645_v50 = vld [vmem:[#allocation7_spill] sm:$0xff]  ;;  %v10646_v22 = vld [vmem:[#allocation34_spill] sm:$0xff] }
 0x32f   : > { %5430 = vst.msk [vmem:[%s9017_s11 + $0xc] sm:$0xf] %vm5426_vm9, %v6058_v45  ;;  %5429 = vst.msk [vmem:[%s9017_s11 + $0x8] sm:$0xf] %vm5426_vm9, %v6057_v3 }
 0x330   : > { %v7070_v38 = vpop.permute.xlu1 %7069 }
 0x331   : > { %v7072_v54 = vunpack.i.h.bf16 %v7070_v38  ;;  %v7071_v5 = vunpack.i.l.bf16 %v7070_v38 }
 0x332   : > { %v7075_v11 = vpop.permute.xlu0 %7074 }
 0x333   : > { %v5145_v35 = vsel %vm1684_vm8, %v10633_v18, %v7072_v54  ;;  %v5144_v29 = vsel %vm1684_vm8, %v10634_v30, %v7071_v5  ;;  %v7077_v53 = vunpack.i.h.bf16 %v7075_v11  ;;  %v7076_v60 = vunpack.i.l.bf16 %v7075_v11  ;;  %v10647_v11 = vld [vmem:[#allocation38_spill] sm:$0xff] }
 0x334   : > { %v6070_v43 = vpack.c.bf16 %v5145_v35, %v5145_v35  ;;  %v6069_v16 = vpack.c.bf16 %v5144_v29, %v5144_v29  ;;  %v10648_v35 = vld [vmem:[#allocation41_spill] sm:$0xff] }
 0x335   : > { %v5143_v46 = vsel %vm1684_vm8, %v10635_v23, %v7077_v53  ;;  %v5142_v19 = vsel %vm1684_vm8, %v10636_v24, %v7076_v60 }
 0x336   : > { %5442 = vst.msk [vmem:[%s9017_s11 + $0x3c] sm:$0xf] %vm5426_vm9, %v6070_v43  ;;  %5441 = vst.msk [vmem:[%s9017_s11 + $0x38] sm:$0xf] %vm5426_vm9, %v6069_v16  ;;  %v6066_v26 = vpack.c.bf16 %v5143_v46, %v5143_v46  ;;  %v6065_v32 = vpack.c.bf16 %v5142_v19, %v5142_v19  ;;  %v10649_v46 = vld [vmem:[#allocation19_spill] sm:$0xff]  ;;  %v10650_v19 = vld [vmem:[#allocation70_spill] sm:$0xff] }
 0x337   : > { %v7080_v1 = vpop.permute.xlu1 %7079 }
 0x338   : > { %v7082_v9 = vunpack.i.h.bf16 %v7080_v1  ;;  %v7081_v20 = vunpack.i.l.bf16 %v7080_v1  ;;  %5438 = vst.msk [vmem:[%s9017_s11 + $0x2c] sm:$0xf] %vm5426_vm9, %v6066_v26  ;;  %5437 = vst.msk [vmem:[%s9017_s11 + $0x28] sm:$0xf] %vm5426_vm9, %v6065_v32 }
 0x33a   : > { %v7085_v59 = vpop.permute.xlu0 %7084  ;;  %v5149_v40 = vsel %vm1684_vm8, %v10637_v0, %v7082_v9  ;;  %v5148_v10 = vsel %vm1684_vm8, %v10638_v27, %v7081_v20 }
 0x33b   : > { %v7087_v51 = vunpack.i.h.bf16 %v7085_v59  ;;  %v7086_v63 = vunpack.i.l.bf16 %v7085_v59  ;;  %v6078_v39 = vpack.c.bf16 %v5149_v40, %v5149_v40  ;;  %v6077_v49 = vpack.c.bf16 %v5148_v10, %v5148_v10  ;;  %v10651_v59 = vld [vmem:[#allocation14_spill] sm:$0xff] }
 0x33c   : > { %v10652_v40 = vld [vmem:[#allocation66_spill] sm:$0xff] }
 0x33d   : > { %v5147_v44 = vsel %vm1684_vm8, %v10639_v47, %v7087_v51  ;;  %v5146_v41 = vsel %vm1684_vm8, %v10640_v56, %v7086_v63  ;;  %5450 = vst.msk [vmem:[%s9017_s11 + $0x5c] sm:$0xf] %vm5426_vm9, %v6078_v39  ;;  %5449 = vst.msk [vmem:[%s9017_s11 + $0x58] sm:$0xf] %vm5426_vm9, %v6077_v49 }
 0x33e   : > { %v6074_v7 = vpack.c.bf16 %v5147_v44, %v5147_v44  ;;  %v6073_v31 = vpack.c.bf16 %v5146_v41, %v5146_v41  ;;  %v10653_v44 = vld [vmem:[#allocation71_spill] sm:$0xff]  ;;  %v10654_v41 = vld [vmem:[#allocation69_spill] sm:$0xff] }
 0x33f   : > { %v7090_v13 = vpop.permute.xlu1 %7089 }
 0x340   : > { %5446 = vst.msk [vmem:[%s9017_s11 + $0x4c] sm:$0xf] %vm5426_vm9, %v6074_v7  ;;  %5445 = vst.msk [vmem:[%s9017_s11 + $0x48] sm:$0xf] %vm5426_vm9, %v6073_v31  ;;  %v7092_v48 = vunpack.i.h.bf16 %v7090_v13  ;;  %v7091_v42 = vunpack.i.l.bf16 %v7090_v13 }
 0x341   : > { %v7095_v37 = vpop.permute.xlu0 %7094 }
 0x342   : > { %v5153_v34 = vsel %vm1684_vm8, %v10641_v25, %v7092_v48  ;;  %v5152_v58 = vsel %vm1684_vm8, %v10642_v2, %v7091_v42  ;;  %v7097_v52 = vunpack.i.h.bf16 %v7095_v37  ;;  %v7096_v62 = vunpack.i.l.bf16 %v7095_v37  ;;  %v10655_v37 = vld [vmem:[#allocation18_spill] sm:$0xff] }
 0x343   : > { %v6086_v15 = vpack.c.bf16 %v5153_v34, %v5153_v34  ;;  %v6085_v14 = vpack.c.bf16 %v5152_v58, %v5152_v58  ;;  %v10656_v34 = vld [vmem:[#allocation48_spill] sm:$0xff] }
 0x344   : > { %v5151_v57 = vsel %vm1684_vm8, %v10643_v6, %v7097_v52  ;;  %v5150_v28 = vsel %vm1684_vm8, %v10644_v8, %v7096_v62  ;;  %v10657_v8 = vld [vmem:[#allocation20_spill] sm:$0xff] }
 0x345   : > { %5458 = vst.msk [vmem:[%s9017_s11 + $0x7c] sm:$0xf] %vm5426_vm9, %v6086_v15  ;;  %5457 = vst.msk [vmem:[%s9017_s11 + $0x78] sm:$0xf] %vm5426_vm9, %v6085_v14  ;;  %v6082_v4 = vpack.c.bf16 %v5151_v57, %v5151_v57  ;;  %v6081_v36 = vpack.c.bf16 %v5150_v28, %v5150_v28 }
 0x347   : > { %5454 = vst.msk [vmem:[%s9017_s11 + $0x6c] sm:$0xf] %vm5426_vm9, %v6082_v4  ;;  %5453 = vst.msk [vmem:[%s9017_s11 + $0x68] sm:$0xf] %vm5426_vm9, %v6081_v36  ;;  %v7100_v33 = vpop.permute.xlu1 %7099 }
 0x348   : > { %v7102_v12 = vunpack.i.h.bf16 %v7100_v33  ;;  %v7101_v61 = vunpack.i.l.bf16 %v7100_v33 }
 0x349   : > { %v7105_v17 = vpop.permute.xlu0 %7104 }
 0x34a   : > { %v5157_v55 = vsel %vm1684_vm8, %v10645_v50, %v7102_v12  ;;  %v5156_v45 = vsel %vm1684_vm8, %v10646_v22, %v7101_v61  ;;  %v7107_v3 = vunpack.i.h.bf16 %v7105_v17  ;;  %v7106_v38 = vunpack.i.l.bf16 %v7105_v17  ;;  %v10658_v61 = vld [vmem:[#allocation3_spill] sm:$0xff]  ;;  %v10659_v50 = vld [vmem:[#allocation6_spill] sm:$0xff] }
 0x34b   : > { %v6094_v54 = vpack.c.bf16 %v5157_v55, %v5157_v55  ;;  %v6093_v5 = vpack.c.bf16 %v5156_v45, %v5156_v45 }
 0x34c   : > { %v5155_v18 = vsel %vm1684_vm8, %v10647_v11, %v7107_v3  ;;  %v5154_v30 = vsel %vm1684_vm8, %v10648_v35, %v7106_v38 }
 0x34d   : > { %5466 = vst.msk [vmem:[%s9017_s11 + $0x9c] sm:$0xf] %vm5426_vm9, %v6094_v54  ;;  %5465 = vst.msk [vmem:[%s9017_s11 + $0x98] sm:$0xf] %vm5426_vm9, %v6093_v5  ;;  %v6090_v29 = vpack.c.bf16 %v5155_v18, %v5155_v18  ;;  %v6089_v53 = vpack.c.bf16 %v5154_v30, %v5154_v30 }
 0x34f   : > { %5462 = vst.msk [vmem:[%s9017_s11 + $0x8c] sm:$0xf] %vm5426_vm9, %v6090_v29  ;;  %5461 = vst.msk [vmem:[%s9017_s11 + $0x88] sm:$0xf] %vm5426_vm9, %v6089_v53  ;;  %v7110_v60 = vpop.permute.xlu1 %7109 }
 0x350   : > { %v7112_v43 = vunpack.i.h.bf16 %v7110_v60  ;;  %v7111_v16 = vunpack.i.l.bf16 %v7110_v60 }
 0x351   : > { %v7115_v23 = vpop.permute.xlu0 %7114 }
 0x352   : > { %v5161_v24 = vsel %vm1684_vm8, %v10649_v46, %v7112_v43  ;;  %v5160_v26 = vsel %vm1684_vm8, %v10650_v19, %v7111_v16  ;;  %v7117_v32 = vunpack.i.h.bf16 %v7115_v23  ;;  %v7116_v1 = vunpack.i.l.bf16 %v7115_v23 }
 0x353   : > { %v6102_v9 = vpack.c.bf16 %v5161_v24, %v5161_v24  ;;  %v6101_v20 = vpack.c.bf16 %v5160_v26, %v5160_v26 }
 0x354   : > { %v5159_v0 = vsel %vm1684_vm8, %v10651_v59, %v7117_v32  ;;  %v5158_v27 = vsel %vm1684_vm8, %v10652_v40, %v7116_v1 }
 0x355   : > { %5474 = vst.msk [vmem:[%s9017_s11 + $0xbc] sm:$0xf] %vm5426_vm9, %v6102_v9  ;;  %5473 = vst.msk [vmem:[%s9017_s11 + $0xb8] sm:$0xf] %vm5426_vm9, %v6101_v20  ;;  %v6098_v10 = vpack.c.bf16 %v5159_v0, %v5159_v0  ;;  %v6097_v51 = vpack.c.bf16 %v5158_v27, %v5158_v27 }
 0x357   : > { %5470 = vst.msk [vmem:[%s9017_s11 + $0xac] sm:$0xf] %vm5426_vm9, %v6098_v10  ;;  %5469 = vst.msk [vmem:[%s9017_s11 + $0xa8] sm:$0xf] %vm5426_vm9, %v6097_v51  ;;  %v7120_v63 = vpop.permute.xlu1 %7119 }
 0x358   : > { %v7122_v39 = vunpack.i.h.bf16 %v7120_v63  ;;  %v7121_v49 = vunpack.i.l.bf16 %v7120_v63 }
 0x359   : > { %v7125_v47 = vpop.permute.xlu0 %7124 }
 0x35a   : > { %v5165_v56 = vsel %vm1684_vm8, %v10653_v44, %v7122_v39  ;;  %v5164_v7 = vsel %vm1684_vm8, %v10654_v41, %v7121_v49  ;;  %v7127_v31 = vunpack.i.h.bf16 %v7125_v47  ;;  %v7126_v13 = vunpack.i.l.bf16 %v7125_v47 }
 0x35b   : > { %v6110_v48 = vpack.c.bf16 %v5165_v56, %v5165_v56  ;;  %v6109_v42 = vpack.c.bf16 %v5164_v7, %v5164_v7 }
 0x35c   : > { %v5163_v25 = vsel %vm1684_vm8, %v10655_v37, %v7127_v31  ;;  %v5162_v2 = vsel %vm1684_vm8, %v10656_v34, %v7126_v13 }
 0x35d   : > { %5482 = vst.msk [vmem:[%s9017_s11 + $0xdc] sm:$0xf] %vm5426_vm9, %v6110_v48  ;;  %5481 = vst.msk [vmem:[%s9017_s11 + $0xd8] sm:$0xf] %vm5426_vm9, %v6109_v42  ;;  %v6106_v58 = vpack.c.bf16 %v5163_v25, %v5163_v25  ;;  %v6105_v52 = vpack.c.bf16 %v5162_v2, %v5162_v2 }
 0x35f   : > { %5478 = vst.msk [vmem:[%s9017_s11 + $0xcc] sm:$0xf] %vm5426_vm9, %v6106_v58  ;;  %5477 = vst.msk [vmem:[%s9017_s11 + $0xc8] sm:$0xf] %vm5426_vm9, %v6105_v52  ;;  %v7135_v62 = vpop.permute.xlu1 %7134 }
 0x360   : > { %v7137_v15 = vunpack.i.h.bf16 %v7135_v62  ;;  %v7136_v14 = vunpack.i.l.bf16 %v7135_v62 }
 0x361   : > { %v7130_v6 = vpop.permute.xlu0 %7129 }
 0x362   : > { %v5169_v57 = vsel %vm1684_vm8, %v9507_v21, %v7137_v15  ;;  %v5168_v28 = vsel %vm1684_vm8, %v10657_v8, %v7136_v14  ;;  %v7132_v4 = vunpack.i.h.bf16 %v7130_v6  ;;  %v7131_v36 = vunpack.i.l.bf16 %v7130_v6 }
 0x363   : > { %v6118_v33 = vpack.c.bf16 %v5169_v57, %v5169_v57  ;;  %v6117_v12 = vpack.c.bf16 %v5168_v28, %v5168_v28 }
 0x364   : > { %v5167_v17 = vsel %vm1684_vm8, %v10658_v61, %v7132_v4  ;;  %v5166_v55 = vsel %vm1684_vm8, %v10659_v50, %v7131_v36 }
 0x365   : > { %5490 = vst.msk [vmem:[%s9017_s11 + $0xfc] sm:$0xf] %vm5426_vm9, %v6118_v33  ;;  %5489 = vst.msk [vmem:[%s9017_s11 + $0xf8] sm:$0xf] %vm5426_vm9, %v6117_v12  ;;  %v6114_v22 = vpack.c.bf16 %v5167_v17, %v5167_v17  ;;  %v6113_v45 = vpack.c.bf16 %v5166_v55, %v5166_v55 }
 0x367   : > { %5486 = vst.msk [vmem:[%s9017_s11 + $0xec] sm:$0xf] %vm5426_vm9, %v6114_v22  ;;  %5485 = vst.msk [vmem:[%s9017_s11 + $0xe8] sm:$0xf] %vm5426_vm9, %v6113_v45 }
 0x368 PF: > { %s15_s17 = sadd.s32 1, %s7182_s17   ;;  %s10660_s15 = smov %s7178_s16 }
 0x369   : > { %p12_p5 = scmp.ge.s32.totalorder %s15_s17, 4   ;;  %s10661_s16 = smov %s10663_s18 }
 0x36b   :  { %14 = sbr.rel (!%p12_p5) target bundleno = 2 (0x2), region = 102 }

</bundles_post_ra>
